<compile_context>
chip_gen: v5e
topology: v5e:2x2
jax: 0.10.0
libtpu: 0.0.40
codegen_flags: <defaults>
</compile_context>

<pallas_src>
import jax
import jax.numpy as jnp
from jax import lax
from jax.experimental import pallas as pl
from jax.experimental.pallas import tpu as pltpu


# --------------------------- fused Pallas kernel --------------------------- #
def _disc_kernel(p1_ref, w1_ref, w2_ref, b2_ref, w3_ref, b3_ref, o_ref, e_ref):
    """Processes one batch tile of nb samples.

    p1_ref : (nb, 324, 64) bf16  conv1 im2col patches; rows ordered
                                 (pq, a, b) over the 4 space-to-batch parity
                                 classes of conv1's zero-padded 18x18 output
                                 grid (9x9 each, incl. halo). Feature col 48 is
                                 the ones/bias column, cols 49..63 are zeros.
                                 IMPORTANT: halo rows are ALL-ZERO (incl. the
                                 ones column), so the conv1 GEMM leaves them
                                 exactly 0 -> they realise conv2's zero pad.
    w1_ref : (64, 64)      bf16  conv1 weight; row 48 = bias, rows 49..63 zero
    w2_ref : (16, 64, 128) bf16  conv2 weight per tap t = dh*4 + dw
    b2_ref : (1, 128)      f32
    w3_ref : (64, 128)     f32   linear weight permuted to [ho*8+wo, c]
    b3_ref : (1, 1)        f32
    o_ref  : (nb, 1)       f32   sigmoid output
    e_ref  : (324, 64)     bf16  scratch: conv1 output (+zero halo) of the
                                 CURRENT sample; fully rewritten each loop
                                 iteration before any conv2 read (no stale
                                 data can be consumed).
    """
    nb = p1_ref.shape[0]
    w1 = w1_ref[...]
    b2 = b2_ref[...]
    w3 = w3_ref[...]
    b3 = b3_ref[...]

    def body(b, carry):
        # ---- conv1: one (324,64)x(64,64) GEMM, bias folded, LeakyReLU(0.2) --
        y1 = jnp.dot(p1_ref[b], w1, preferred_element_type=jnp.float32)
        y1 = jnp.where(y1 >= 0.0, y1, 0.2 * y1)
        e_ref[...] = y1.astype(jnp.bfloat16)          # written once, bf16

        # ---- conv2: 16 per-tap (64,64)x(64,128) GEMMs (in-kernel im2col) ----
        acc = jnp.zeros((64, 128), jnp.float32)
        for dh in range(4):
            p, dH = dh % 2, dh // 2
            for dw in range(4):
                q, dW = dw % 2, dw // 2
                base = (2 * p + q) * 81 + 9 * dH + dW
                # 8 contiguous 8-row slabs -> (64, 64) LHS, rows = ho*8+wo
                lhs = jnp.concatenate(
                    [e_ref[base + 9 * ho: base + 9 * ho + 8, :]
                     for ho in range(8)], axis=0)
                acc = acc + jnp.dot(lhs, w2_ref[dh * 4 + dw],
                                    preferred_element_type=jnp.float32)
        y2 = acc + b2
        y2 = jnp.where(y2 >= 0.0, y2, 0.2 * y2)        # LeakyReLU(0.2)

        # ---- Linear(8192 -> 1) as VPU multiply-reduce + stable sigmoid ------
        logit = jnp.sum(y2 * w3, keepdims=True) + b3   # (1, 1)
        e = jnp.exp(-jnp.abs(logit))
        sig = jnp.where(logit >= 0.0, 1.0 / (1.0 + e), e / (1.0 + e))
        o_ref[pl.ds(b, 1), :] = sig
        return carry

    lax.fori_loop(0, nb, body, 0)


# ------------------------------ param prep --------------------------------- #
def init_params(key):
    k1, k2, k3, k4, k5, k6 = jax.random.split(key, 6)
    # PyTorch-style shapes: conv weight (Cout, Cin, kh, kw), linear (out, in)
    w1 = jax.random.normal(k1, (64, 3, 4, 4), jnp.float32) * 0.05
    b1 = jax.random.normal(k2, (64,), jnp.float32) * 0.05
    w2 = jax.random.normal(k3, (128, 64, 4, 4), jnp.float32) * 0.02
    b2 = jax.random.normal(k4, (128,), jnp.float32) * 0.02
    w3 = jax.random.normal(k5, (1, 128 * 8 * 8), jnp.float32) * 0.01
    b3 = jax.random.normal(k6, (1,), jnp.float32) * 0.01
    return (w1, b1, w2, b2, w3, b3)


def prepare_params(params):
    """One-time weight reshapes / permutations (hoisted out of the forward)."""
    w1, b1, w2, b2, w3, b3 = params
    # conv1 weight -> (kh*kw*cin, cout); bias folded as row 48; K padded to 64.
    w1m = jnp.transpose(w1, (2, 3, 1, 0)).reshape(48, 64)
    w1aug = jnp.concatenate(
        [w1m, b1.reshape(1, 64), jnp.zeros((15, 64), jnp.float32)],
        axis=0).astype(jnp.bfloat16)                                  # (64, 64)
    # conv2 weight per tap: (16, cin=64, cout=128), tap index = dh*4 + dw.
    w2t = jnp.transpose(w2, (2, 3, 1, 0)).reshape(16, 64, 128).astype(jnp.bfloat16)
    b2r = b2.reshape(1, 128).astype(jnp.float32)
    # Linear weight permuted so the kernel consumes y2 in NHWC order:
    # PyTorch flatten index = c*64 + ho*8 + wo  ->  w3r[ho*8 + wo, c].
    w3r = w3.reshape(128, 64).T.astype(jnp.float32)                   # (64, 128)
    b3r = b3.reshape(1, 1).astype(jnp.float32)
    return (w1aug, w2t, b2r, w3r, b3r)


# ------------------------------ JAX glue ------------------------------------ #
def _conv1_patches_s2b(x_nhwc):
    """conv1 im2col (k4 s2 p1) + ones bias column + zero pad to K=64, packed
    into the space-to-batch parity-class layout with zero halo: (B, 324, 64),
    row index = pq*81 + a*9 + b  (pq = 2p+q, h_pad = 2a+p, w_pad = 2b+q)."""
    B, H, W, C = x_nhwc.shape
    Ho, Wo = H // 2, W // 2
    xp = jnp.pad(x_nhwc, ((0, 0), (1, 1), (1, 1), (0, 0)))
    taps = []
    for dh in range(4):
        for dw in range(4):
            taps.append(xp[:, dh:dh + 2 * Ho:2, dw:dw + 2 * Wo:2, :])
    p1 = jnp.stack(taps, axis=3).reshape(B, Ho, Wo, 16 * C)          # (B,16,16,48)
    # Ones bias column (col 48) and zero K-pad MUST be added BEFORE the zero
    # halo pad below, so that halo rows stay exactly zero after the GEMM.
    p1 = jnp.concatenate(
        [p1, jnp.ones((B, Ho, Wo, 1), p1.dtype),
         jnp.zeros((B, Ho, Wo, 15), p1.dtype)], axis=-1)             # (B,16,16,64)
    pp = jnp.pad(p1, ((0, 0), (1, 1), (1, 1), (0, 0)))               # (B,18,18,64)
    pp = pp.reshape(B, 9, 2, 9, 2, 64).transpose(0, 2, 4, 1, 3, 5)   # (B,2,2,9,9,64)
    return pp.reshape(B, 324, 64).astype(jnp.bfloat16)


def discriminator_forward(img_nchw, prepped, *, b_tile=8):
    w1aug, w2t, b2r, w3r, b3r = prepped
    B, C, H, W = img_nchw.shape
    assert (C, H, W) == (3, 32, 32), "Linear(128*8*8) implies 3x32x32 inputs"
    x = jnp.transpose(img_nchw, (0, 2, 3, 1))                        # NCHW -> NHWC
    p1s = _conv1_patches_s2b(x)                                      # (B, 324, 64)

    bt = min(b_tile, B)
    b_pad = -(-B // bt) * bt
    if b_pad != B:
        p1s = jnp.pad(p1s, ((0, b_pad - B), (0, 0), (0, 0)))
    grid = (b_pad // bt,)

    out = pl.pallas_call(
        _disc_kernel,
        out_shape=jax.ShapeDtypeStruct((b_pad, 1), jnp.float32),
        grid=grid,
        in_specs=[
            pl.BlockSpec((bt, 324, 64), lambda i: (i, 0, 0)),        # patches
            pl.BlockSpec((64, 64), lambda i: (0, 0)),                # w1 (+bias)
            pl.BlockSpec((16, 64, 128), lambda i: (0, 0, 0)),        # w2 taps
            pl.BlockSpec((1, 128), lambda i: (0, 0)),                # b2
            pl.BlockSpec((64, 128), lambda i: (0, 0)),               # w3 (permuted)
            pl.BlockSpec((1, 1), lambda i: (0, 0)),                  # b3
        ],
        out_specs=pl.BlockSpec((bt, 1), lambda i: (i, 0)),
        scratch_shapes=[pltpu.VMEM((324, 64), jnp.bfloat16)],        # conv1 out + halo
        compiler_params=pltpu.CompilerParams(
            dimension_semantics=("parallel",)),
    )(p1s, w1aug, w2t, b2r, w3r, b3r)
    return out[:B]


# ------------------------- pure-JAX reference ------------------------------- #
def reference_forward(img, params):
    w1, b1, w2, b2, w3, b3 = params
    dn = ("NCHW", "OIHW", "NCHW")
    y = jax.lax.conv_general_dilated(img, w1, (2, 2), ((1, 1), (1, 1)),
                                     dimension_numbers=dn)
    y = y + b1.reshape(1, -1, 1, 1)
    y = jnp.where(y >= 0, y, 0.2 * y)
    y = jax.lax.conv_general_dilated(y, w2, (2, 2), ((1, 1), (1, 1)),
                                     dimension_numbers=dn)
    y = y + b2.reshape(1, -1, 1, 1)
    y = jnp.where(y >= 0, y, 0.2 * y)
    logit = y.reshape(y.shape[0], -1) @ w3.T + b3
    return jax.nn.sigmoid(logit)


if __name__ == "__main__":
    key = jax.random.PRNGKey(0)
    pkey, xkey = jax.random.split(key)
    params = init_params(pkey)
    prepped = prepare_params(params)
    # Linear(128*8*8) forces 32x32 spatial input (32 -> 16 -> 8 after two s2 convs).
    img = jax.random.normal(xkey, (2, 3, 32, 32), jnp.float32)

    fwd = jax.jit(discriminator_forward)
    out = jax.block_until_ready(fwd(img, prepped))

    assert out.shape == (2, 1)
    assert bool(jnp.all((out >= 0.0) & (out <= 1.0)))
    ref = reference_forward(img, params)
    assert float(jnp.max(jnp.abs(out - ref))) < 5e-2, (out, ref)
    print("KERNEL_OK")
</pallas_src>

<mosaic_0001>
module attributes {stable_mosaic.version = 11 : i64} {
  func.func @_disc_kernel(%arg0: i32, %arg1: memref<2x324x64xbf16, #tpu.memory_space<vmem>>, %arg2: memref<64x64xbf16, #tpu.memory_space<vmem>>, %arg3: memref<16x64x128xbf16, #tpu.memory_space<vmem>>, %arg4: memref<1x128xf32, #tpu.memory_space<vmem>>, %arg5: memref<64x128xf32, #tpu.memory_space<vmem>>, %arg6: memref<1x1xf32, #tpu.memory_space<vmem>>, %arg7: memref<2x1xf32, #tpu.memory_space<vmem>>, %arg8: memref<324x64xbf16, #tpu.memory_space<vmem>>) attributes {dimension_semantics = [#tpu.dimension_semantics<parallel>], iteration_bounds = array<i64: 1>, scalar_prefetch = 0 : i64, scratch_operands = 1 : i64, tpu.core_type = #tpu.core_type<tc>, window_params = [{transform_indices = @transform_0, window_bounds = array<i64: 2, 324, 64>}, {pipeline_mode = #tpu.pipeline_mode<synchronous>, transform_indices = @transform_1, window_bounds = array<i64: 64, 64>}, {pipeline_mode = #tpu.pipeline_mode<synchronous>, transform_indices = @transform_2, window_bounds = array<i64: 16, 64, 128>}, {pipeline_mode = #tpu.pipeline_mode<synchronous>, transform_indices = @transform_3, window_bounds = array<i64: 1, 128>}, {pipeline_mode = #tpu.pipeline_mode<synchronous>, transform_indices = @transform_4, window_bounds = array<i64: 64, 128>}, {pipeline_mode = #tpu.pipeline_mode<synchronous>, transform_indices = @transform_5, window_bounds = array<i64: 1, 1>}, {transform_indices = @transform_6, window_bounds = array<i64: 2, 1>}]} {
    %c0 = arith.constant 0 : index
    %c0_0 = arith.constant 0 : index
    %0 = vector.load %arg2[%c0, %c0_0] : memref<64x64xbf16, #tpu.memory_space<vmem>>, vector<64x64xbf16>
    %c0_1 = arith.constant 0 : index
    %c0_2 = arith.constant 0 : index
    %1 = vector.load %arg4[%c0_1, %c0_2] : memref<1x128xf32, #tpu.memory_space<vmem>>, vector<1x128xf32>
    %c0_3 = arith.constant 0 : index
    %c0_4 = arith.constant 0 : index
    %2 = vector.load %arg5[%c0_3, %c0_4] : memref<64x128xf32, #tpu.memory_space<vmem>>, vector<64x128xf32>
    %c0_5 = arith.constant 0 : index
    %c0_6 = arith.constant 0 : index
    %3 = vector.load %arg6[%c0_5, %c0_6] : memref<1x1xf32, #tpu.memory_space<vmem>>, vector<1x1xf32>
    %c0_i32 = arith.constant 0 : i32
    %c2_i32 = arith.constant 2 : i32
    %4 = arith.addi %c0_i32, %c2_i32 : i32
    %c1_i32 = arith.constant 1 : i32
    scf.for %arg9 = %c0_i32 to %4 step %c1_i32  : i32 {
      %5 = arith.index_cast %arg9 : i32 to index
      %c0_8 = arith.constant 0 : index
      %c0_9 = arith.constant 0 : index
      %6 = vector.load %arg1[%5, %c0_8, %c0_9] : memref<2x324x64xbf16, #tpu.memory_space<vmem>>, vector<1x324x64xbf16>
      %7 = vector.shape_cast %6 : vector<1x324x64xbf16> to vector<324x64xbf16>
      %cst = arith.constant dense<0.000000e+00> : vector<324x64xf32>
      %8 = tpu.matmul %7, %0, %cst {dimension_numbers = #tpu.dot_dimension_numbers<[1], [0], [0], [1], [0, 0, 1, 1], [], []>} : vector<324x64xbf16>, vector<64x64xbf16>, vector<324x64xf32> -> vector<324x64xf32>
      %cst_10 = arith.constant 0.000000e+00 : f32
      %9 = vector.broadcast %cst_10 : f32 to vector<324x64xf32>
      %10 = arith.cmpf oge, %8, %9 : vector<324x64xf32>
      %cst_11 = arith.constant 2.000000e-01 : f32
      %11 = vector.broadcast %cst_11 : f32 to vector<324x64xf32>
      %12 = arith.mulf %11, %8 : vector<324x64xf32>
      %13 = arith.select %10, %8, %12 : vector<324x64xi1>, vector<324x64xf32>
      %14 = arith.truncf %13 : vector<324x64xf32> to vector<324x64xbf16>
      %c0_12 = arith.constant 0 : index
      %c0_13 = arith.constant 0 : index
      %15 = vector.load %arg8[%c0_12, %c0_13] : memref<324x64xbf16, #tpu.memory_space<vmem>>, vector<324x64xbf16>
      tpu.vector_store %arg8[%c0_12, %c0_13], %14 {strides = array<i32>} : memref<324x64xbf16, #tpu.memory_space<vmem>>, vector<324x64xbf16>,
      %cst_14 = arith.constant 0.000000e+00 : f32
      %16 = vector.broadcast %cst_14 : f32 to vector<64x128xf32>
      %c0_15 = arith.constant 0 : index
      %c0_16 = arith.constant 0 : index
      %17 = vector.load %arg8[%c0_15, %c0_16] : memref<324x64xbf16, #tpu.memory_space<vmem>>, vector<8x64xbf16>
      %c9 = arith.constant 9 : index
      %c0_17 = arith.constant 0 : index
      %18 = vector.load %arg8[%c9, %c0_17] : memref<324x64xbf16, #tpu.memory_space<vmem>>, vector<8x64xbf16>
      %c18 = arith.constant 18 : index
      %c0_18 = arith.constant 0 : index
      %19 = vector.load %arg8[%c18, %c0_18] : memref<324x64xbf16, #tpu.memory_space<vmem>>, vector<8x64xbf16>
      %c27 = arith.constant 27 : index
      %c0_19 = arith.constant 0 : index
      %20 = vector.load %arg8[%c27, %c0_19] : memref<324x64xbf16, #tpu.memory_space<vmem>>, vector<8x64xbf16>
      %c36 = arith.constant 36 : index
      %c0_20 = arith.constant 0 : index
      %21 = vector.load %arg8[%c36, %c0_20] : memref<324x64xbf16, #tpu.memory_space<vmem>>, vector<8x64xbf16>
      %c45 = arith.constant 45 : index
      %c0_21 = arith.constant 0 : index
      %22 = vector.load %arg8[%c45, %c0_21] : memref<324x64xbf16, #tpu.memory_space<vmem>>, vector<8x64xbf16>
      %c54 = arith.constant 54 : index
      %c0_22 = arith.constant 0 : index
      %23 = vector.load %arg8[%c54, %c0_22] : memref<324x64xbf16, #tpu.memory_space<vmem>>, vector<8x64xbf16>
      %c63 = arith.constant 63 : index
      %c0_23 = arith.constant 0 : index
      %24 = vector.load %arg8[%c63, %c0_23] : memref<324x64xbf16, #tpu.memory_space<vmem>>, vector<8x64xbf16>
      %25 = tpu.concatenate %17, %18, %19, %20, %21, %22, %23, %24 in 0 : vector<8x64xbf16>, vector<8x64xbf16>, vector<8x64xbf16>, vector<8x64xbf16>, vector<8x64xbf16>, vector<8x64xbf16>, vector<8x64xbf16>, vector<8x64xbf16> -> vector<64x64xbf16>
      %c0_24 = arith.constant 0 : index
      %c0_25 = arith.constant 0 : index
      %c0_26 = arith.constant 0 : index
      %26 = vector.load %arg3[%c0_24, %c0_25, %c0_26] : memref<16x64x128xbf16, #tpu.memory_space<vmem>>, vector<1x64x128xbf16>
      %27 = vector.shape_cast %26 : vector<1x64x128xbf16> to vector<64x128xbf16>
      %cst_27 = arith.constant dense<0.000000e+00> : vector<64x128xf32>
      %28 = tpu.matmul %25, %27, %cst_27 {dimension_numbers = #tpu.dot_dimension_numbers<[1], [0], [0], [1], [0, 0, 1, 1], [], []>} : vector<64x64xbf16>, vector<64x128xbf16>, vector<64x128xf32> -> vector<64x128xf32>
      %29 = arith.addf %16, %28 : vector<64x128xf32>
      %c81 = arith.constant 81 : index
      %c0_28 = arith.constant 0 : index
      %30 = vector.load %arg8[%c81, %c0_28] : memref<324x64xbf16, #tpu.memory_space<vmem>>, vector<8x64xbf16>
      %c90 = arith.constant 90 : index
      %c0_29 = arith.constant 0 : index
      %31 = vector.load %arg8[%c90, %c0_29] : memref<324x64xbf16, #tpu.memory_space<vmem>>, vector<8x64xbf16>
      %c99 = arith.constant 99 : index
      %c0_30 = arith.constant 0 : index
      %32 = vector.load %arg8[%c99, %c0_30] : memref<324x64xbf16, #tpu.memory_space<vmem>>, vector<8x64xbf16>
      %c108 = arith.constant 108 : index
      %c0_31 = arith.constant 0 : index
      %33 = vector.load %arg8[%c108, %c0_31] : memref<324x64xbf16, #tpu.memory_space<vmem>>, vector<8x64xbf16>
      %c117 = arith.constant 117 : index
      %c0_32 = arith.constant 0 : index
      %34 = vector.load %arg8[%c117, %c0_32] : memref<324x64xbf16, #tpu.memory_space<vmem>>, vector<8x64xbf16>
      %c126 = arith.constant 126 : index
      %c0_33 = arith.constant 0 : index
      %35 = vector.load %arg8[%c126, %c0_33] : memref<324x64xbf16, #tpu.memory_space<vmem>>, vector<8x64xbf16>
      %c135 = arith.constant 135 : index
      %c0_34 = arith.constant 0 : index
      %36 = vector.load %arg8[%c135, %c0_34] : memref<324x64xbf16, #tpu.memory_space<vmem>>, vector<8x64xbf16>
      %c144 = arith.constant 144 : index
      %c0_35 = arith.constant 0 : index
      %37 = vector.load %arg8[%c144, %c0_35] : memref<324x64xbf16, #tpu.memory_space<vmem>>, vector<8x64xbf16>
      %38 = tpu.concatenate %30, %31, %32, %33, %34, %35, %36, %37 in 0 : vector<8x64xbf16>, vector<8x64xbf16>, vector<8x64xbf16>, vector<8x64xbf16>, vector<8x64xbf16>, vector<8x64xbf16>, vector<8x64xbf16>, vector<8x64xbf16> -> vector<64x64xbf16>
      %c1 = arith.constant 1 : index
      %c0_36 = arith.constant 0 : index
      %c0_37 = arith.constant 0 : index
      %39 = vector.load %arg3[%c1, %c0_36, %c0_37] : memref<16x64x128xbf16, #tpu.memory_space<vmem>>, vector<1x64x128xbf16>
      %40 = vector.shape_cast %39 : vector<1x64x128xbf16> to vector<64x128xbf16>
      %cst_38 = arith.constant dense<0.000000e+00> : vector<64x128xf32>
      %41 = tpu.matmul %38, %40, %cst_38 {dimension_numbers = #tpu.dot_dimension_numbers<[1], [0], [0], [1], [0, 0, 1, 1], [], []>} : vector<64x64xbf16>, vector<64x128xbf16>, vector<64x128xf32> -> vector<64x128xf32>
      %42 = arith.addf %29, %41 : vector<64x128xf32>
      %c1_39 = arith.constant 1 : index
      %c0_40 = arith.constant 0 : index
      %43 = vector.load %arg8[%c1_39, %c0_40] : memref<324x64xbf16, #tpu.memory_space<vmem>>, vector<8x64xbf16>
      %c10 = arith.constant 10 : index
      %c0_41 = arith.constant 0 : index
      %44 = vector.load %arg8[%c10, %c0_41] : memref<324x64xbf16, #tpu.memory_space<vmem>>, vector<8x64xbf16>
      %c19 = arith.constant 19 : index
      %c0_42 = arith.constant 0 : index
      %45 = vector.load %arg8[%c19, %c0_42] : memref<324x64xbf16, #tpu.memory_space<vmem>>, vector<8x64xbf16>
      %c28 = arith.constant 28 : index
      %c0_43 = arith.constant 0 : index
      %46 = vector.load %arg8[%c28, %c0_43] : memref<324x64xbf16, #tpu.memory_space<vmem>>, vector<8x64xbf16>
      %c37 = arith.constant 37 : index
      %c0_44 = arith.constant 0 : index
      %47 = vector.load %arg8[%c37, %c0_44] : memref<324x64xbf16, #tpu.memory_space<vmem>>, vector<8x64xbf16>
      %c46 = arith.constant 46 : index
      %c0_45 = arith.constant 0 : index
      %48 = vector.load %arg8[%c46, %c0_45] : memref<324x64xbf16, #tpu.memory_space<vmem>>, vector<8x64xbf16>
      %c55 = arith.constant 55 : index
      %c0_46 = arith.constant 0 : index
      %49 = vector.load %arg8[%c55, %c0_46] : memref<324x64xbf16, #tpu.memory_space<vmem>>, vector<8x64xbf16>
      %c64 = arith.constant 64 : index
      %c0_47 = arith.constant 0 : index
      %50 = vector.load %arg8[%c64, %c0_47] : memref<324x64xbf16, #tpu.memory_space<vmem>>, vector<8x64xbf16>
      %51 = tpu.concatenate %43, %44, %45, %46, %47, %48, %49, %50 in 0 : vector<8x64xbf16>, vector<8x64xbf16>, vector<8x64xbf16>, vector<8x64xbf16>, vector<8x64xbf16>, vector<8x64xbf16>, vector<8x64xbf16>, vector<8x64xbf16> -> vector<64x64xbf16>
      %c2 = arith.constant 2 : index
      %c0_48 = arith.constant 0 : index
      %c0_49 = arith.constant 0 : index
      %52 = vector.load %arg3[%c2, %c0_48, %c0_49] : memref<16x64x128xbf16, #tpu.memory_space<vmem>>, vector<1x64x128xbf16>
      %53 = vector.shape_cast %52 : vector<1x64x128xbf16> to vector<64x128xbf16>
      %cst_50 = arith.constant dense<0.000000e+00> : vector<64x128xf32>
      %54 = tpu.matmul %51, %53, %cst_50 {dimension_numbers = #tpu.dot_dimension_numbers<[1], [0], [0], [1], [0, 0, 1, 1], [], []>} : vector<64x64xbf16>, vector<64x128xbf16>, vector<64x128xf32> -> vector<64x128xf32>
      %55 = arith.addf %42, %54 : vector<64x128xf32>
      %c82 = arith.constant 82 : index
      %c0_51 = arith.constant 0 : index
      %56 = vector.load %arg8[%c82, %c0_51] : memref<324x64xbf16, #tpu.memory_space<vmem>>, vector<8x64xbf16>
      %c91 = arith.constant 91 : index
      %c0_52 = arith.constant 0 : index
      %57 = vector.load %arg8[%c91, %c0_52] : memref<324x64xbf16, #tpu.memory_space<vmem>>, vector<8x64xbf16>
      %c100 = arith.constant 100 : index
      %c0_53 = arith.constant 0 : index
      %58 = vector.load %arg8[%c100, %c0_53] : memref<324x64xbf16, #tpu.memory_space<vmem>>, vector<8x64xbf16>
      %c109 = arith.constant 109 : index
      %c0_54 = arith.constant 0 : index
      %59 = vector.load %arg8[%c109, %c0_54] : memref<324x64xbf16, #tpu.memory_space<vmem>>, vector<8x64xbf16>
      %c118 = arith.constant 118 : index
      %c0_55 = arith.constant 0 : index
      %60 = vector.load %arg8[%c118, %c0_55] : memref<324x64xbf16, #tpu.memory_space<vmem>>, vector<8x64xbf16>
      %c127 = arith.constant 127 : index
      %c0_56 = arith.constant 0 : index
      %61 = vector.load %arg8[%c127, %c0_56] : memref<324x64xbf16, #tpu.memory_space<vmem>>, vector<8x64xbf16>
      %c136 = arith.constant 136 : index
      %c0_57 = arith.constant 0 : index
      %62 = vector.load %arg8[%c136, %c0_57] : memref<324x64xbf16, #tpu.memory_space<vmem>>, vector<8x64xbf16>
      %c145 = arith.constant 145 : index
      %c0_58 = arith.constant 0 : index
      %63 = vector.load %arg8[%c145, %c0_58] : memref<324x64xbf16, #tpu.memory_space<vmem>>, vector<8x64xbf16>
      %64 = tpu.concatenate %56, %57, %58, %59, %60, %61, %62, %63 in 0 : vector<8x64xbf16>, vector<8x64xbf16>, vector<8x64xbf16>, vector<8x64xbf16>, vector<8x64xbf16>, vector<8x64xbf16>, vector<8x64xbf16>, vector<8x64xbf16> -> vector<64x64xbf16>
      %c3 = arith.constant 3 : index
      %c0_59 = arith.constant 0 : index
      %c0_60 = arith.constant 0 : index
      %65 = vector.load %arg3[%c3, %c0_59, %c0_60] : memref<16x64x128xbf16, #tpu.memory_space<vmem>>, vector<1x64x128xbf16>
      %66 = vector.shape_cast %65 : vector<1x64x128xbf16> to vector<64x128xbf16>
      %cst_61 = arith.constant dense<0.000000e+00> : vector<64x128xf32>
      %67 = tpu.matmul %64, %66, %cst_61 {dimension_numbers = #tpu.dot_dimension_numbers<[1], [0], [0], [1], [0, 0, 1, 1], [], []>} : vector<64x64xbf16>, vector<64x128xbf16>, vector<64x128xf32> -> vector<64x128xf32>
      %68 = arith.addf %55, %67 : vector<64x128xf32>
      %c162 = arith.constant 162 : index
      %c0_62 = arith.constant 0 : index
      %69 = vector.load %arg8[%c162, %c0_62] : memref<324x64xbf16, #tpu.memory_space<vmem>>, vector<8x64xbf16>
      %c171 = arith.constant 171 : index
      %c0_63 = arith.constant 0 : index
      %70 = vector.load %arg8[%c171, %c0_63] : memref<324x64xbf16, #tpu.memory_space<vmem>>, vector<8x64xbf16>
      %c180 = arith.constant 180 : index
      %c0_64 = arith.constant 0 : index
      %71 = vector.load %arg8[%c180, %c0_64] : memref<324x64xbf16, #tpu.memory_space<vmem>>, vector<8x64xbf16>
      %c189 = arith.constant 189 : index
      %c0_65 = arith.constant 0 : index
      %72 = vector.load %arg8[%c189, %c0_65] : memref<324x64xbf16, #tpu.memory_space<vmem>>, vector<8x64xbf16>
      %c198 = arith.constant 198 : index
      %c0_66 = arith.constant 0 : index
      %73 = vector.load %arg8[%c198, %c0_66] : memref<324x64xbf16, #tpu.memory_space<vmem>>, vector<8x64xbf16>
      %c207 = arith.constant 207 : index
      %c0_67 = arith.constant 0 : index
      %74 = vector.load %arg8[%c207, %c0_67] : memref<324x64xbf16, #tpu.memory_space<vmem>>, vector<8x64xbf16>
      %c216 = arith.constant 216 : index
      %c0_68 = arith.constant 0 : index
      %75 = vector.load %arg8[%c216, %c0_68] : memref<324x64xbf16, #tpu.memory_space<vmem>>, vector<8x64xbf16>
      %c225 = arith.constant 225 : index
      %c0_69 = arith.constant 0 : index
      %76 = vector.load %arg8[%c225, %c0_69] : memref<324x64xbf16, #tpu.memory_space<vmem>>, vector<8x64xbf16>
      %77 = tpu.concatenate %69, %70, %71, %72, %73, %74, %75, %76 in 0 : vector<8x64xbf16>, vector<8x64xbf16>, vector<8x64xbf16>, vector<8x64xbf16>, vector<8x64xbf16>, vector<8x64xbf16>, vector<8x64xbf16>, vector<8x64xbf16> -> vector<64x64xbf16>
      %c4 = arith.constant 4 : index
      %c0_70 = arith.constant 0 : index
      %c0_71 = arith.constant 0 : index
      %78 = vector.load %arg3[%c4, %c0_70, %c0_71] : memref<16x64x128xbf16, #tpu.memory_space<vmem>>, vector<1x64x128xbf16>
      %79 = vector.shape_cast %78 : vector<1x64x128xbf16> to vector<64x128xbf16>
      %cst_72 = arith.constant dense<0.000000e+00> : vector<64x128xf32>
      %80 = tpu.matmul %77, %79, %cst_72 {dimension_numbers = #tpu.dot_dimension_numbers<[1], [0], [0], [1], [0, 0, 1, 1], [], []>} : vector<64x64xbf16>, vector<64x128xbf16>, vector<64x128xf32> -> vector<64x128xf32>
      %81 = arith.addf %68, %80 : vector<64x128xf32>
      %c243 = arith.constant 243 : index
      %c0_73 = arith.constant 0 : index
      %82 = vector.load %arg8[%c243, %c0_73] : memref<324x64xbf16, #tpu.memory_space<vmem>>, vector<8x64xbf16>
      %c252 = arith.constant 252 : index
      %c0_74 = arith.constant 0 : index
      %83 = vector.load %arg8[%c252, %c0_74] : memref<324x64xbf16, #tpu.memory_space<vmem>>, vector<8x64xbf16>
      %c261 = arith.constant 261 : index
      %c0_75 = arith.constant 0 : index
      %84 = vector.load %arg8[%c261, %c0_75] : memref<324x64xbf16, #tpu.memory_space<vmem>>, vector<8x64xbf16>
      %c270 = arith.constant 270 : index
      %c0_76 = arith.constant 0 : index
      %85 = vector.load %arg8[%c270, %c0_76] : memref<324x64xbf16, #tpu.memory_space<vmem>>, vector<8x64xbf16>
      %c279 = arith.constant 279 : index
      %c0_77 = arith.constant 0 : index
      %86 = vector.load %arg8[%c279, %c0_77] : memref<324x64xbf16, #tpu.memory_space<vmem>>, vector<8x64xbf16>
      %c288 = arith.constant 288 : index
      %c0_78 = arith.constant 0 : index
      %87 = vector.load %arg8[%c288, %c0_78] : memref<324x64xbf16, #tpu.memory_space<vmem>>, vector<8x64xbf16>
      %c297 = arith.constant 297 : index
      %c0_79 = arith.constant 0 : index
      %88 = vector.load %arg8[%c297, %c0_79] : memref<324x64xbf16, #tpu.memory_space<vmem>>, vector<8x64xbf16>
      %c306 = arith.constant 306 : index
      %c0_80 = arith.constant 0 : index
      %89 = vector.load %arg8[%c306, %c0_80] : memref<324x64xbf16, #tpu.memory_space<vmem>>, vector<8x64xbf16>
      %90 = tpu.concatenate %82, %83, %84, %85, %86, %87, %88, %89 in 0 : vector<8x64xbf16>, vector<8x64xbf16>, vector<8x64xbf16>, vector<8x64xbf16>, vector<8x64xbf16>, vector<8x64xbf16>, vector<8x64xbf16>, vector<8x64xbf16> -> vector<64x64xbf16>
      %c5 = arith.constant 5 : index
      %c0_81 = arith.constant 0 : index
      %c0_82 = arith.constant 0 : index
      %91 = vector.load %arg3[%c5, %c0_81, %c0_82] : memref<16x64x128xbf16, #tpu.memory_space<vmem>>, vector<1x64x128xbf16>
      %92 = vector.shape_cast %91 : vector<1x64x128xbf16> to vector<64x128xbf16>
      %cst_83 = arith.constant dense<0.000000e+00> : vector<64x128xf32>
      %93 = tpu.matmul %90, %92, %cst_83 {dimension_numbers = #tpu.dot_dimension_numbers<[1], [0], [0], [1], [0, 0, 1, 1], [], []>} : vector<64x64xbf16>, vector<64x128xbf16>, vector<64x128xf32> -> vector<64x128xf32>
      %94 = arith.addf %81, %93 : vector<64x128xf32>
      %c163 = arith.constant 163 : index
      %c0_84 = arith.constant 0 : index
      %95 = vector.load %arg8[%c163, %c0_84] : memref<324x64xbf16, #tpu.memory_space<vmem>>, vector<8x64xbf16>
      %c172 = arith.constant 172 : index
      %c0_85 = arith.constant 0 : index
      %96 = vector.load %arg8[%c172, %c0_85] : memref<324x64xbf16, #tpu.memory_space<vmem>>, vector<8x64xbf16>
      %c181 = arith.constant 181 : index
      %c0_86 = arith.constant 0 : index
      %97 = vector.load %arg8[%c181, %c0_86] : memref<324x64xbf16, #tpu.memory_space<vmem>>, vector<8x64xbf16>
      %c190 = arith.constant 190 : index
      %c0_87 = arith.constant 0 : index
      %98 = vector.load %arg8[%c190, %c0_87] : memref<324x64xbf16, #tpu.memory_space<vmem>>, vector<8x64xbf16>
      %c199 = arith.constant 199 : index
      %c0_88 = arith.constant 0 : index
      %99 = vector.load %arg8[%c199, %c0_88] : memref<324x64xbf16, #tpu.memory_space<vmem>>, vector<8x64xbf16>
      %c208 = arith.constant 208 : index
      %c0_89 = arith.constant 0 : index
      %100 = vector.load %arg8[%c208, %c0_89] : memref<324x64xbf16, #tpu.memory_space<vmem>>, vector<8x64xbf16>
      %c217 = arith.constant 217 : index
      %c0_90 = arith.constant 0 : index
      %101 = vector.load %arg8[%c217, %c0_90] : memref<324x64xbf16, #tpu.memory_space<vmem>>, vector<8x64xbf16>
      %c226 = arith.constant 226 : index
      %c0_91 = arith.constant 0 : index
      %102 = vector.load %arg8[%c226, %c0_91] : memref<324x64xbf16, #tpu.memory_space<vmem>>, vector<8x64xbf16>
      %103 = tpu.concatenate %95, %96, %97, %98, %99, %100, %101, %102 in 0 : vector<8x64xbf16>, vector<8x64xbf16>, vector<8x64xbf16>, vector<8x64xbf16>, vector<8x64xbf16>, vector<8x64xbf16>, vector<8x64xbf16>, vector<8x64xbf16> -> vector<64x64xbf16>
      %c6 = arith.constant 6 : index
      %c0_92 = arith.constant 0 : index
      %c0_93 = arith.constant 0 : index
      %104 = vector.load %arg3[%c6, %c0_92, %c0_93] : memref<16x64x128xbf16, #tpu.memory_space<vmem>>, vector<1x64x128xbf16>
      %105 = vector.shape_cast %104 : vector<1x64x128xbf16> to vector<64x128xbf16>
      %cst_94 = arith.constant dense<0.000000e+00> : vector<64x128xf32>
      %106 = tpu.matmul %103, %105, %cst_94 {dimension_numbers = #tpu.dot_dimension_numbers<[1], [0], [0], [1], [0, 0, 1, 1], [], []>} : vector<64x64xbf16>, vector<64x128xbf16>, vector<64x128xf32> -> vector<64x128xf32>
      %107 = arith.addf %94, %106 : vector<64x128xf32>
      %c244 = arith.constant 244 : index
      %c0_95 = arith.constant 0 : index
      %108 = vector.load %arg8[%c244, %c0_95] : memref<324x64xbf16, #tpu.memory_space<vmem>>, vector<8x64xbf16>
      %c253 = arith.constant 253 : index
      %c0_96 = arith.constant 0 : index
      %109 = vector.load %arg8[%c253, %c0_96] : memref<324x64xbf16, #tpu.memory_space<vmem>>, vector<8x64xbf16>
      %c262 = arith.constant 262 : index
      %c0_97 = arith.constant 0 : index
      %110 = vector.load %arg8[%c262, %c0_97] : memref<324x64xbf16, #tpu.memory_space<vmem>>, vector<8x64xbf16>
      %c271 = arith.constant 271 : index
      %c0_98 = arith.constant 0 : index
      %111 = vector.load %arg8[%c271, %c0_98] : memref<324x64xbf16, #tpu.memory_space<vmem>>, vector<8x64xbf16>
      %c280 = arith.constant 280 : index
      %c0_99 = arith.constant 0 : index
      %112 = vector.load %arg8[%c280, %c0_99] : memref<324x64xbf16, #tpu.memory_space<vmem>>, vector<8x64xbf16>
      %c289 = arith.constant 289 : index
      %c0_100 = arith.constant 0 : index
      %113 = vector.load %arg8[%c289, %c0_100] : memref<324x64xbf16, #tpu.memory_space<vmem>>, vector<8x64xbf16>
      %c298 = arith.constant 298 : index
      %c0_101 = arith.constant 0 : index
      %114 = vector.load %arg8[%c298, %c0_101] : memref<324x64xbf16, #tpu.memory_space<vmem>>, vector<8x64xbf16>
      %c307 = arith.constant 307 : index
      %c0_102 = arith.constant 0 : index
      %115 = vector.load %arg8[%c307, %c0_102] : memref<324x64xbf16, #tpu.memory_space<vmem>>, vector<8x64xbf16>
      %116 = tpu.concatenate %108, %109, %110, %111, %112, %113, %114, %115 in 0 : vector<8x64xbf16>, vector<8x64xbf16>, vector<8x64xbf16>, vector<8x64xbf16>, vector<8x64xbf16>, vector<8x64xbf16>, vector<8x64xbf16>, vector<8x64xbf16> -> vector<64x64xbf16>
      %c7 = arith.constant 7 : index
      %c0_103 = arith.constant 0 : index
      %c0_104 = arith.constant 0 : index
      %117 = vector.load %arg3[%c7, %c0_103, %c0_104] : memref<16x64x128xbf16, #tpu.memory_space<vmem>>, vector<1x64x128xbf16>
      %118 = vector.shape_cast %117 : vector<1x64x128xbf16> to vector<64x128xbf16>
      %cst_105 = arith.constant dense<0.000000e+00> : vector<64x128xf32>
      %119 = tpu.matmul %116, %118, %cst_105 {dimension_numbers = #tpu.dot_dimension_numbers<[1], [0], [0], [1], [0, 0, 1, 1], [], []>} : vector<64x64xbf16>, vector<64x128xbf16>, vector<64x128xf32> -> vector<64x128xf32>
      %120 = arith.addf %107, %119 : vector<64x128xf32>
      %c9_106 = arith.constant 9 : index
      %c0_107 = arith.constant 0 : index
      %121 = vector.load %arg8[%c9_106, %c0_107] : memref<324x64xbf16, #tpu.memory_space<vmem>>, vector<8x64xbf16>
      %c18_108 = arith.constant 18 : index
      %c0_109 = arith.constant 0 : index
      %122 = vector.load %arg8[%c18_108, %c0_109] : memref<324x64xbf16, #tpu.memory_space<vmem>>, vector<8x64xbf16>
      %c27_110 = arith.constant 27 : index
      %c0_111 = arith.constant 0 : index
      %123 = vector.load %arg8[%c27_110, %c0_111] : memref<324x64xbf16, #tpu.memory_space<vmem>>, vector<8x64xbf16>
      %c36_112 = arith.constant 36 : index
      %c0_113 = arith.constant 0 : index
      %124 = vector.load %arg8[%c36_112, %c0_113] : memref<324x64xbf16, #tpu.memory_space<vmem>>, vector<8x64xbf16>
      %c45_114 = arith.constant 45 : index
      %c0_115 = arith.constant 0 : index
      %125 = vector.load %arg8[%c45_114, %c0_115] : memref<324x64xbf16, #tpu.memory_space<vmem>>, vector<8x64xbf16>
      %c54_116 = arith.constant 54 : index
      %c0_117 = arith.constant 0 : index
      %126 = vector.load %arg8[%c54_116, %c0_117] : memref<324x64xbf16, #tpu.memory_space<vmem>>, vector<8x64xbf16>
      %c63_118 = arith.constant 63 : index
      %c0_119 = arith.constant 0 : index
      %127 = vector.load %arg8[%c63_118, %c0_119] : memref<324x64xbf16, #tpu.memory_space<vmem>>, vector<8x64xbf16>
      %c72 = arith.constant 72 : index
      %c0_120 = arith.constant 0 : index
      %128 = vector.load %arg8[%c72, %c0_120] : memref<324x64xbf16, #tpu.memory_space<vmem>>, vector<8x64xbf16>
      %129 = tpu.concatenate %121, %122, %123, %124, %125, %126, %127, %128 in 0 : vector<8x64xbf16>, vector<8x64xbf16>, vector<8x64xbf16>, vector<8x64xbf16>, vector<8x64xbf16>, vector<8x64xbf16>, vector<8x64xbf16>, vector<8x64xbf16> -> vector<64x64xbf16>
      %c8 = arith.constant 8 : index
      %c0_121 = arith.constant 0 : index
      %c0_122 = arith.constant 0 : index
      %130 = vector.load %arg3[%c8, %c0_121, %c0_122] : memref<16x64x128xbf16, #tpu.memory_space<vmem>>, vector<1x64x128xbf16>
      %131 = vector.shape_cast %130 : vector<1x64x128xbf16> to vector<64x128xbf16>
      %cst_123 = arith.constant dense<0.000000e+00> : vector<64x128xf32>
      %132 = tpu.matmul %129, %131, %cst_123 {dimension_numbers = #tpu.dot_dimension_numbers<[1], [0], [0], [1], [0, 0, 1, 1], [], []>} : vector<64x64xbf16>, vector<64x128xbf16>, vector<64x128xf32> -> vector<64x128xf32>
      %133 = arith.addf %120, %132 : vector<64x128xf32>
      %c90_124 = arith.constant 90 : index
      %c0_125 = arith.constant 0 : index
      %134 = vector.load %arg8[%c90_124, %c0_125] : memref<324x64xbf16, #tpu.memory_space<vmem>>, vector<8x64xbf16>
      %c99_126 = arith.constant 99 : index
      %c0_127 = arith.constant 0 : index
      %135 = vector.load %arg8[%c99_126, %c0_127] : memref<324x64xbf16, #tpu.memory_space<vmem>>, vector<8x64xbf16>
      %c108_128 = arith.constant 108 : index
      %c0_129 = arith.constant 0 : index
      %136 = vector.load %arg8[%c108_128, %c0_129] : memref<324x64xbf16, #tpu.memory_space<vmem>>, vector<8x64xbf16>
      %c117_130 = arith.constant 117 : index
      %c0_131 = arith.constant 0 : index
      %137 = vector.load %arg8[%c117_130, %c0_131] : memref<324x64xbf16, #tpu.memory_space<vmem>>, vector<8x64xbf16>
      %c126_132 = arith.constant 126 : index
      %c0_133 = arith.constant 0 : index
      %138 = vector.load %arg8[%c126_132, %c0_133] : memref<324x64xbf16, #tpu.memory_space<vmem>>, vector<8x64xbf16>
      %c135_134 = arith.constant 135 : index
      %c0_135 = arith.constant 0 : index
      %139 = vector.load %arg8[%c135_134, %c0_135] : memref<324x64xbf16, #tpu.memory_space<vmem>>, vector<8x64xbf16>
      %c144_136 = arith.constant 144 : index
      %c0_137 = arith.constant 0 : index
      %140 = vector.load %arg8[%c144_136, %c0_137] : memref<324x64xbf16, #tpu.memory_space<vmem>>, vector<8x64xbf16>
      %c153 = arith.constant 153 : index
      %c0_138 = arith.constant 0 : index
      %141 = vector.load %arg8[%c153, %c0_138] : memref<324x64xbf16, #tpu.memory_space<vmem>>, vector<8x64xbf16>
      %142 = tpu.concatenate %134, %135, %136, %137, %138, %139, %140, %141 in 0 : vector<8x64xbf16>, vector<8x64xbf16>, vector<8x64xbf16>, vector<8x64xbf16>, vector<8x64xbf16>, vector<8x64xbf16>, vector<8x64xbf16>, vector<8x64xbf16> -> vector<64x64xbf16>
      %c9_139 = arith.constant 9 : index
      %c0_140 = arith.constant 0 : index
      %c0_141 = arith.constant 0 : index
      %143 = vector.load %arg3[%c9_139, %c0_140, %c0_141] : memref<16x64x128xbf16, #tpu.memory_space<vmem>>, vector<1x64x128xbf16>
      %144 = vector.shape_cast %143 : vector<1x64x128xbf16> to vector<64x128xbf16>
      %cst_142 = arith.constant dense<0.000000e+00> : vector<64x128xf32>
      %145 = tpu.matmul %142, %144, %cst_142 {dimension_numbers = #tpu.dot_dimension_numbers<[1], [0], [0], [1], [0, 0, 1, 1], [], []>} : vector<64x64xbf16>, vector<64x128xbf16>, vector<64x128xf32> -> vector<64x128xf32>
      %146 = arith.addf %133, %145 : vector<64x128xf32>
      %c10_143 = arith.constant 10 : index
      %c0_144 = arith.constant 0 : index
      %147 = vector.load %arg8[%c10_143, %c0_144] : memref<324x64xbf16, #tpu.memory_space<vmem>>, vector<8x64xbf16>
      %c19_145 = arith.constant 19 : index
      %c0_146 = arith.constant 0 : index
      %148 = vector.load %arg8[%c19_145, %c0_146] : memref<324x64xbf16, #tpu.memory_space<vmem>>, vector<8x64xbf16>
      %c28_147 = arith.constant 28 : index
      %c0_148 = arith.constant 0 : index
      %149 = vector.load %arg8[%c28_147, %c0_148] : memref<324x64xbf16, #tpu.memory_space<vmem>>, vector<8x64xbf16>
      %c37_149 = arith.constant 37 : index
      %c0_150 = arith.constant 0 : index
      %150 = vector.load %arg8[%c37_149, %c0_150] : memref<324x64xbf16, #tpu.memory_space<vmem>>, vector<8x64xbf16>
      %c46_151 = arith.constant 46 : index
      %c0_152 = arith.constant 0 : index
      %151 = vector.load %arg8[%c46_151, %c0_152] : memref<324x64xbf16, #tpu.memory_space<vmem>>, vector<8x64xbf16>
      %c55_153 = arith.constant 55 : index
      %c0_154 = arith.constant 0 : index
      %152 = vector.load %arg8[%c55_153, %c0_154] : memref<324x64xbf16, #tpu.memory_space<vmem>>, vector<8x64xbf16>
      %c64_155 = arith.constant 64 : index
      %c0_156 = arith.constant 0 : index
      %153 = vector.load %arg8[%c64_155, %c0_156] : memref<324x64xbf16, #tpu.memory_space<vmem>>, vector<8x64xbf16>
      %c73 = arith.constant 73 : index
      %c0_157 = arith.constant 0 : index
      %154 = vector.load %arg8[%c73, %c0_157] : memref<324x64xbf16, #tpu.memory_space<vmem>>, vector<8x64xbf16>
      %155 = tpu.concatenate %147, %148, %149, %150, %151, %152, %153, %154 in 0 : vector<8x64xbf16>, vector<8x64xbf16>, vector<8x64xbf16>, vector<8x64xbf16>, vector<8x64xbf16>, vector<8x64xbf16>, vector<8x64xbf16>, vector<8x64xbf16> -> vector<64x64xbf16>
      %c10_158 = arith.constant 10 : index
      %c0_159 = arith.constant 0 : index
      %c0_160 = arith.constant 0 : index
      %156 = vector.load %arg3[%c10_158, %c0_159, %c0_160] : memref<16x64x128xbf16, #tpu.memory_space<vmem>>, vector<1x64x128xbf16>
      %157 = vector.shape_cast %156 : vector<1x64x128xbf16> to vector<64x128xbf16>
      %cst_161 = arith.constant dense<0.000000e+00> : vector<64x128xf32>
      %158 = tpu.matmul %155, %157, %cst_161 {dimension_numbers = #tpu.dot_dimension_numbers<[1], [0], [0], [1], [0, 0, 1, 1], [], []>} : vector<64x64xbf16>, vector<64x128xbf16>, vector<64x128xf32> -> vector<64x128xf32>
      %159 = arith.addf %146, %158 : vector<64x128xf32>
      %c91_162 = arith.constant 91 : index
      %c0_163 = arith.constant 0 : index
      %160 = vector.load %arg8[%c91_162, %c0_163] : memref<324x64xbf16, #tpu.memory_space<vmem>>, vector<8x64xbf16>
      %c100_164 = arith.constant 100 : index
      %c0_165 = arith.constant 0 : index
      %161 = vector.load %arg8[%c100_164, %c0_165] : memref<324x64xbf16, #tpu.memory_space<vmem>>, vector<8x64xbf16>
      %c109_166 = arith.constant 109 : index
      %c0_167 = arith.constant 0 : index
      %162 = vector.load %arg8[%c109_166, %c0_167] : memref<324x64xbf16, #tpu.memory_space<vmem>>, vector<8x64xbf16>
      %c118_168 = arith.constant 118 : index
      %c0_169 = arith.constant 0 : index
      %163 = vector.load %arg8[%c118_168, %c0_169] : memref<324x64xbf16, #tpu.memory_space<vmem>>, vector<8x64xbf16>
      %c127_170 = arith.constant 127 : index
      %c0_171 = arith.constant 0 : index
      %164 = vector.load %arg8[%c127_170, %c0_171] : memref<324x64xbf16, #tpu.memory_space<vmem>>, vector<8x64xbf16>
      %c136_172 = arith.constant 136 : index
      %c0_173 = arith.constant 0 : index
      %165 = vector.load %arg8[%c136_172, %c0_173] : memref<324x64xbf16, #tpu.memory_space<vmem>>, vector<8x64xbf16>
      %c145_174 = arith.constant 145 : index
      %c0_175 = arith.constant 0 : index
      %166 = vector.load %arg8[%c145_174, %c0_175] : memref<324x64xbf16, #tpu.memory_space<vmem>>, vector<8x64xbf16>
      %c154 = arith.constant 154 : index
      %c0_176 = arith.constant 0 : index
      %167 = vector.load %arg8[%c154, %c0_176] : memref<324x64xbf16, #tpu.memory_space<vmem>>, vector<8x64xbf16>
      %168 = tpu.concatenate %160, %161, %162, %163, %164, %165, %166, %167 in 0 : vector<8x64xbf16>, vector<8x64xbf16>, vector<8x64xbf16>, vector<8x64xbf16>, vector<8x64xbf16>, vector<8x64xbf16>, vector<8x64xbf16>, vector<8x64xbf16> -> vector<64x64xbf16>
      %c11 = arith.constant 11 : index
      %c0_177 = arith.constant 0 : index
      %c0_178 = arith.constant 0 : index
      %169 = vector.load %arg3[%c11, %c0_177, %c0_178] : memref<16x64x128xbf16, #tpu.memory_space<vmem>>, vector<1x64x128xbf16>
      %170 = vector.shape_cast %169 : vector<1x64x128xbf16> to vector<64x128xbf16>
      %cst_179 = arith.constant dense<0.000000e+00> : vector<64x128xf32>
      %171 = tpu.matmul %168, %170, %cst_179 {dimension_numbers = #tpu.dot_dimension_numbers<[1], [0], [0], [1], [0, 0, 1, 1], [], []>} : vector<64x64xbf16>, vector<64x128xbf16>, vector<64x128xf32> -> vector<64x128xf32>
      %172 = arith.addf %159, %171 : vector<64x128xf32>
      %c171_180 = arith.constant 171 : index
      %c0_181 = arith.constant 0 : index
      %173 = vector.load %arg8[%c171_180, %c0_181] : memref<324x64xbf16, #tpu.memory_space<vmem>>, vector<8x64xbf16>
      %c180_182 = arith.constant 180 : index
      %c0_183 = arith.constant 0 : index
      %174 = vector.load %arg8[%c180_182, %c0_183] : memref<324x64xbf16, #tpu.memory_space<vmem>>, vector<8x64xbf16>
      %c189_184 = arith.constant 189 : index
      %c0_185 = arith.constant 0 : index
      %175 = vector.load %arg8[%c189_184, %c0_185] : memref<324x64xbf16, #tpu.memory_space<vmem>>, vector<8x64xbf16>
      %c198_186 = arith.constant 198 : index
      %c0_187 = arith.constant 0 : index
      %176 = vector.load %arg8[%c198_186, %c0_187] : memref<324x64xbf16, #tpu.memory_space<vmem>>, vector<8x64xbf16>
      %c207_188 = arith.constant 207 : index
      %c0_189 = arith.constant 0 : index
      %177 = vector.load %arg8[%c207_188, %c0_189] : memref<324x64xbf16, #tpu.memory_space<vmem>>, vector<8x64xbf16>
      %c216_190 = arith.constant 216 : index
      %c0_191 = arith.constant 0 : index
      %178 = vector.load %arg8[%c216_190, %c0_191] : memref<324x64xbf16, #tpu.memory_space<vmem>>, vector<8x64xbf16>
      %c225_192 = arith.constant 225 : index
      %c0_193 = arith.constant 0 : index
      %179 = vector.load %arg8[%c225_192, %c0_193] : memref<324x64xbf16, #tpu.memory_space<vmem>>, vector<8x64xbf16>
      %c234 = arith.constant 234 : index
      %c0_194 = arith.constant 0 : index
      %180 = vector.load %arg8[%c234, %c0_194] : memref<324x64xbf16, #tpu.memory_space<vmem>>, vector<8x64xbf16>
      %181 = tpu.concatenate %173, %174, %175, %176, %177, %178, %179, %180 in 0 : vector<8x64xbf16>, vector<8x64xbf16>, vector<8x64xbf16>, vector<8x64xbf16>, vector<8x64xbf16>, vector<8x64xbf16>, vector<8x64xbf16>, vector<8x64xbf16> -> vector<64x64xbf16>
      %c12 = arith.constant 12 : index
      %c0_195 = arith.constant 0 : index
      %c0_196 = arith.constant 0 : index
      %182 = vector.load %arg3[%c12, %c0_195, %c0_196] : memref<16x64x128xbf16, #tpu.memory_space<vmem>>, vector<1x64x128xbf16>
      %183 = vector.shape_cast %182 : vector<1x64x128xbf16> to vector<64x128xbf16>
      %cst_197 = arith.constant dense<0.000000e+00> : vector<64x128xf32>
      %184 = tpu.matmul %181, %183, %cst_197 {dimension_numbers = #tpu.dot_dimension_numbers<[1], [0], [0], [1], [0, 0, 1, 1], [], []>} : vector<64x64xbf16>, vector<64x128xbf16>, vector<64x128xf32> -> vector<64x128xf32>
      %185 = arith.addf %172, %184 : vector<64x128xf32>
      %c252_198 = arith.constant 252 : index
      %c0_199 = arith.constant 0 : index
      %186 = vector.load %arg8[%c252_198, %c0_199] : memref<324x64xbf16, #tpu.memory_space<vmem>>, vector<8x64xbf16>
      %c261_200 = arith.constant 261 : index
      %c0_201 = arith.constant 0 : index
      %187 = vector.load %arg8[%c261_200, %c0_201] : memref<324x64xbf16, #tpu.memory_space<vmem>>, vector<8x64xbf16>
      %c270_202 = arith.constant 270 : index
      %c0_203 = arith.constant 0 : index
      %188 = vector.load %arg8[%c270_202, %c0_203] : memref<324x64xbf16, #tpu.memory_space<vmem>>, vector<8x64xbf16>
      %c279_204 = arith.constant 279 : index
      %c0_205 = arith.constant 0 : index
      %189 = vector.load %arg8[%c279_204, %c0_205] : memref<324x64xbf16, #tpu.memory_space<vmem>>, vector<8x64xbf16>
      %c288_206 = arith.constant 288 : index
      %c0_207 = arith.constant 0 : index
      %190 = vector.load %arg8[%c288_206, %c0_207] : memref<324x64xbf16, #tpu.memory_space<vmem>>, vector<8x64xbf16>
      %c297_208 = arith.constant 297 : index
      %c0_209 = arith.constant 0 : index
      %191 = vector.load %arg8[%c297_208, %c0_209] : memref<324x64xbf16, #tpu.memory_space<vmem>>, vector<8x64xbf16>
      %c306_210 = arith.constant 306 : index
      %c0_211 = arith.constant 0 : index
      %192 = vector.load %arg8[%c306_210, %c0_211] : memref<324x64xbf16, #tpu.memory_space<vmem>>, vector<8x64xbf16>
      %c315 = arith.constant 315 : index
      %c0_212 = arith.constant 0 : index
      %193 = vector.load %arg8[%c315, %c0_212] : memref<324x64xbf16, #tpu.memory_space<vmem>>, vector<8x64xbf16>
      %194 = tpu.concatenate %186, %187, %188, %189, %190, %191, %192, %193 in 0 : vector<8x64xbf16>, vector<8x64xbf16>, vector<8x64xbf16>, vector<8x64xbf16>, vector<8x64xbf16>, vector<8x64xbf16>, vector<8x64xbf16>, vector<8x64xbf16> -> vector<64x64xbf16>
      %c13 = arith.constant 13 : index
      %c0_213 = arith.constant 0 : index
      %c0_214 = arith.constant 0 : index
      %195 = vector.load %arg3[%c13, %c0_213, %c0_214] : memref<16x64x128xbf16, #tpu.memory_space<vmem>>, vector<1x64x128xbf16>
      %196 = vector.shape_cast %195 : vector<1x64x128xbf16> to vector<64x128xbf16>
      %cst_215 = arith.constant dense<0.000000e+00> : vector<64x128xf32>
      %197 = tpu.matmul %194, %196, %cst_215 {dimension_numbers = #tpu.dot_dimension_numbers<[1], [0], [0], [1], [0, 0, 1, 1], [], []>} : vector<64x64xbf16>, vector<64x128xbf16>, vector<64x128xf32> -> vector<64x128xf32>
      %198 = arith.addf %185, %197 : vector<64x128xf32>
      %c172_216 = arith.constant 172 : index
      %c0_217 = arith.constant 0 : index
      %199 = vector.load %arg8[%c172_216, %c0_217] : memref<324x64xbf16, #tpu.memory_space<vmem>>, vector<8x64xbf16>
      %c181_218 = arith.constant 181 : index
      %c0_219 = arith.constant 0 : index
      %200 = vector.load %arg8[%c181_218, %c0_219] : memref<324x64xbf16, #tpu.memory_space<vmem>>, vector<8x64xbf16>
      %c190_220 = arith.constant 190 : index
      %c0_221 = arith.constant 0 : index
      %201 = vector.load %arg8[%c190_220, %c0_221] : memref<324x64xbf16, #tpu.memory_space<vmem>>, vector<8x64xbf16>
      %c199_222 = arith.constant 199 : index
      %c0_223 = arith.constant 0 : index
      %202 = vector.load %arg8[%c199_222, %c0_223] : memref<324x64xbf16, #tpu.memory_space<vmem>>, vector<8x64xbf16>
      %c208_224 = arith.constant 208 : index
      %c0_225 = arith.constant 0 : index
      %203 = vector.load %arg8[%c208_224, %c0_225] : memref<324x64xbf16, #tpu.memory_space<vmem>>, vector<8x64xbf16>
      %c217_226 = arith.constant 217 : index
      %c0_227 = arith.constant 0 : index
      %204 = vector.load %arg8[%c217_226, %c0_227] : memref<324x64xbf16, #tpu.memory_space<vmem>>, vector<8x64xbf16>
      %c226_228 = arith.constant 226 : index
      %c0_229 = arith.constant 0 : index
      %205 = vector.load %arg8[%c226_228, %c0_229] : memref<324x64xbf16, #tpu.memory_space<vmem>>, vector<8x64xbf16>
      %c235 = arith.constant 235 : index
      %c0_230 = arith.constant 0 : index
      %206 = vector.load %arg8[%c235, %c0_230] : memref<324x64xbf16, #tpu.memory_space<vmem>>, vector<8x64xbf16>
      %207 = tpu.concatenate %199, %200, %201, %202, %203, %204, %205, %206 in 0 : vector<8x64xbf16>, vector<8x64xbf16>, vector<8x64xbf16>, vector<8x64xbf16>, vector<8x64xbf16>, vector<8x64xbf16>, vector<8x64xbf16>, vector<8x64xbf16> -> vector<64x64xbf16>
      %c14 = arith.constant 14 : index
      %c0_231 = arith.constant 0 : index
      %c0_232 = arith.constant 0 : index
      %208 = vector.load %arg3[%c14, %c0_231, %c0_232] : memref<16x64x128xbf16, #tpu.memory_space<vmem>>, vector<1x64x128xbf16>
      %209 = vector.shape_cast %208 : vector<1x64x128xbf16> to vector<64x128xbf16>
      %cst_233 = arith.constant dense<0.000000e+00> : vector<64x128xf32>
      %210 = tpu.matmul %207, %209, %cst_233 {dimension_numbers = #tpu.dot_dimension_numbers<[1], [0], [0], [1], [0, 0, 1, 1], [], []>} : vector<64x64xbf16>, vector<64x128xbf16>, vector<64x128xf32> -> vector<64x128xf32>
      %211 = arith.addf %198, %210 : vector<64x128xf32>
      %c253_234 = arith.constant 253 : index
      %c0_235 = arith.constant 0 : index
      %212 = vector.load %arg8[%c253_234, %c0_235] : memref<324x64xbf16, #tpu.memory_space<vmem>>, vector<8x64xbf16>
      %c262_236 = arith.constant 262 : index
      %c0_237 = arith.constant 0 : index
      %213 = vector.load %arg8[%c262_236, %c0_237] : memref<324x64xbf16, #tpu.memory_space<vmem>>, vector<8x64xbf16>
      %c271_238 = arith.constant 271 : index
      %c0_239 = arith.constant 0 : index
      %214 = vector.load %arg8[%c271_238, %c0_239] : memref<324x64xbf16, #tpu.memory_space<vmem>>, vector<8x64xbf16>
      %c280_240 = arith.constant 280 : index
      %c0_241 = arith.constant 0 : index
      %215 = vector.load %arg8[%c280_240, %c0_241] : memref<324x64xbf16, #tpu.memory_space<vmem>>, vector<8x64xbf16>
      %c289_242 = arith.constant 289 : index
      %c0_243 = arith.constant 0 : index
      %216 = vector.load %arg8[%c289_242, %c0_243] : memref<324x64xbf16, #tpu.memory_space<vmem>>, vector<8x64xbf16>
      %c298_244 = arith.constant 298 : index
      %c0_245 = arith.constant 0 : index
      %217 = vector.load %arg8[%c298_244, %c0_245] : memref<324x64xbf16, #tpu.memory_space<vmem>>, vector<8x64xbf16>
      %c307_246 = arith.constant 307 : index
      %c0_247 = arith.constant 0 : index
      %218 = vector.load %arg8[%c307_246, %c0_247] : memref<324x64xbf16, #tpu.memory_space<vmem>>, vector<8x64xbf16>
      %c316 = arith.constant 316 : index
      %c0_248 = arith.constant 0 : index
      %219 = vector.load %arg8[%c316, %c0_248] : memref<324x64xbf16, #tpu.memory_space<vmem>>, vector<8x64xbf16>
      %220 = tpu.concatenate %212, %213, %214, %215, %216, %217, %218, %219 in 0 : vector<8x64xbf16>, vector<8x64xbf16>, vector<8x64xbf16>, vector<8x64xbf16>, vector<8x64xbf16>, vector<8x64xbf16>, vector<8x64xbf16>, vector<8x64xbf16> -> vector<64x64xbf16>
      %c15 = arith.constant 15 : index
      %c0_249 = arith.constant 0 : index
      %c0_250 = arith.constant 0 : index
      %221 = vector.load %arg3[%c15, %c0_249, %c0_250] : memref<16x64x128xbf16, #tpu.memory_space<vmem>>, vector<1x64x128xbf16>
      %222 = vector.shape_cast %221 : vector<1x64x128xbf16> to vector<64x128xbf16>
      %cst_251 = arith.constant dense<0.000000e+00> : vector<64x128xf32>
      %223 = tpu.matmul %220, %222, %cst_251 {dimension_numbers = #tpu.dot_dimension_numbers<[1], [0], [0], [1], [0, 0, 1, 1], [], []>} : vector<64x64xbf16>, vector<64x128xbf16>, vector<64x128xf32> -> vector<64x128xf32>
      %224 = arith.addf %211, %223 : vector<64x128xf32>
      %225 = vector.broadcast %1 : vector<1x128xf32> to vector<64x128xf32>
      %226 = arith.addf %224, %225 : vector<64x128xf32>
      %cst_252 = arith.constant 0.000000e+00 : f32
      %227 = vector.broadcast %cst_252 : f32 to vector<64x128xf32>
      %228 = arith.cmpf oge, %226, %227 : vector<64x128xf32>
      %cst_253 = arith.constant 2.000000e-01 : f32
      %229 = vector.broadcast %cst_253 : f32 to vector<64x128xf32>
      %230 = arith.mulf %229, %226 : vector<64x128xf32>
      %231 = arith.select %228, %226, %230 : vector<64x128xi1>, vector<64x128xf32>
      %232 = arith.mulf %231, %2 : vector<64x128xf32>
      %233 = vector.shape_cast %232 : vector<64x128xf32> to vector<1x64x128xf32>
      %cst_254 = arith.constant dense<0.000000e+00> : vector<1xf32>
      %234 = vector.multi_reduction <add>, %233, %cst_254 [1, 2] : vector<1x64x128xf32> to vector<1xf32>
      %235 = vector.shape_cast %234 : vector<1xf32> to vector<1x1x1xf32>
      %236 = vector.extract %235[0, 0, 0] : f32 from vector<1x1x1xf32>
      %237 = vector.broadcast %236 : f32 to vector<1x1xf32>
      %238 = arith.addf %237, %3 : vector<1x1xf32>
      %239 = math.absf %238 : vector<1x1xf32>
      %cst_255 = arith.constant 0.000000e+00 : f32
      %240 = vector.broadcast %cst_255 : f32 to vector<1x1xf32>
      %241 = arith.subf %240, %239 : vector<1x1xf32>
      %242 = math.exp %241 : vector<1x1xf32>
      %cst_256 = arith.constant 0.000000e+00 : f32
      %243 = vector.broadcast %cst_256 : f32 to vector<1x1xf32>
      %244 = arith.cmpf oge, %238, %243 : vector<1x1xf32>
      %cst_257 = arith.constant 1.000000e+00 : f32
      %245 = vector.broadcast %cst_257 : f32 to vector<1x1xf32>
      %246 = arith.addf %245, %242 : vector<1x1xf32>
      %cst_258 = arith.constant 1.000000e+00 : f32
      %247 = vector.broadcast %cst_258 : f32 to vector<1x1xf32>
      %248 = arith.divf %247, %246 : vector<1x1xf32>
      %cst_259 = arith.constant 1.000000e+00 : f32
      %249 = vector.broadcast %cst_259 : f32 to vector<1x1xf32>
      %250 = arith.addf %249, %242 : vector<1x1xf32>
      %251 = arith.divf %242, %250 : vector<1x1xf32>
      %252 = arith.select %244, %248, %251 : vector<1x1xi1>, vector<1x1xf32>
      %253 = arith.index_cast %arg9 : i32 to index
      %c0_260 = arith.constant 0 : index
      %254 = vector.load %arg7[%253, %c0_260] : memref<2x1xf32, #tpu.memory_space<vmem>>, vector<1x1xf32>
      tpu.vector_store %arg7[%253, %c0_260], %252 {strides = array<i32>} : memref<2x1xf32, #tpu.memory_space<vmem>>, vector<1x1xf32>,
    }
    %c2_i32_7 = arith.constant 2 : i32
    return
  }
  func.func @transform_0(%arg0: i32) -> (i32, i32, i32) {
    %c0_i32 = arith.constant 0 : i32
    %c0_i32_0 = arith.constant 0 : i32
    %c0_i32_1 = arith.constant 0 : i32
    return %arg0, %c0_i32, %c0_i32_0 : i32, i32, i32
  }
  func.func @transform_1(%arg0: i32) -> (i32, i32) {
    %c0_i32 = arith.constant 0 : i32
    %c0_i32_0 = arith.constant 0 : i32
    %c0_i32_1 = arith.constant 0 : i32
    return %c0_i32, %c0_i32_0 : i32, i32
  }
  func.func @transform_2(%arg0: i32) -> (i32, i32, i32) {
    %c0_i32 = arith.constant 0 : i32
    %c0_i32_0 = arith.constant 0 : i32
    %c0_i32_1 = arith.constant 0 : i32
    %c0_i32_2 = arith.constant 0 : i32
    return %c0_i32, %c0_i32_0, %c0_i32_1 : i32, i32, i32
  }
  func.func @transform_3(%arg0: i32) -> (i32, i32) {
    %c0_i32 = arith.constant 0 : i32
    %c0_i32_0 = arith.constant 0 : i32
    %c0_i32_1 = arith.constant 0 : i32
    return %c0_i32, %c0_i32_0 : i32, i32
  }
  func.func @transform_4(%arg0: i32) -> (i32, i32) {
    %c0_i32 = arith.constant 0 : i32
    %c0_i32_0 = arith.constant 0 : i32
    %c0_i32_1 = arith.constant 0 : i32
    return %c0_i32, %c0_i32_0 : i32, i32
  }
  func.func @transform_5(%arg0: i32) -> (i32, i32) {
    %c0_i32 = arith.constant 0 : i32
    %c0_i32_0 = arith.constant 0 : i32
    %c0_i32_1 = arith.constant 0 : i32
    return %c0_i32, %c0_i32_0 : i32, i32
  }
  func.func @transform_6(%arg0: i32) -> (i32, i32) {
    %c0_i32 = arith.constant 0 : i32
    %c0_i32_0 = arith.constant 0 : i32
    return %arg0, %c0_i32 : i32, i32
  }
}

</mosaic_0001>

<bundles_post_ra>
// kernel: discriminator_forward.1
= control target key start
LH: loop header
LB: loop body
LE: loop exit
PB: predicated region body
PF: predicated region fallthrough
CT: control target
= control target key end

     0   :  { %s3742_s30 = smov 0   ;;  %s4666_s0 = inlined_call_operand.vmem [shape: bf16[2,324,64], index: 0, kind: input, shape index: {}]   ;;  %s4667_s1 = inlined_call_operand.vmem [shape: bf16[64,64], index: 1, kind: input, shape index: {}]   ;;  %s4668_s2 = inlined_call_operand.vmem [shape: bf16[16,64,128], index: 2, kind: input, shape index: {}]   ;;  %s4669_s5 = inlined_call_operand.<no memory space> [shape: f32[1,1], index: 5, kind: input, shape index: {}]   ;;  %s4670_s6 = inlined_call_operand.vmem [shape: f32[2,1], index: 6, kind: output, shape index: {}]   ;;  %s4671_s3 = inlined_call_operand.vmem [shape: f32[1,128], index: 3, kind: input, shape index: {}]   ;;  %s4672_s4 = inlined_call_operand.vmem [shape: f32[64,128], index: 4, kind: input, shape index: {}]  }
   0x1   :  { %v11_v0 = vstv %s4669_s5  ;;  %v3658_v1 = vld [vmem:[%s4667_s1] sm:$0xf]  ;;  %v3663_v2 = vld [vmem:[%s4667_s1] sm:$0xf0]  ;;  %v3668_v3 = vld [vmem:[%s4667_s1 + $0x8] sm:$0xf] }
   0x2   :  { %4690 = vst [vmem:[#allocation4_spill] sm:$0xff] %v3658_v1  ;;  %v3673_v4 = vld [vmem:[%s4667_s1 + $0x8] sm:$0xf0]  ;;  %v3678_v5 = vld [vmem:[%s4667_s1 + $0x10] sm:$0xf]  ;;  %v3703_v10 = vld [vmem:[%s4672_s4] sm:$0xff] }
   0x3   :  { %4691 = vst [vmem:[#allocation5_spill] sm:$0xff] %v3663_v2  ;;  %v3683_v6 = vld [vmem:[%s4667_s1 + $0x10] sm:$0xf0]  ;;  %v3688_v7 = vld [vmem:[%s4667_s1 + $0x18] sm:$0xf]  ;;  %v3708_v11 = vld [vmem:[%s4672_s4 + $0x8] sm:$0xff] }
   0x4   :  { %4692 = vst [vmem:[#allocation6_spill] sm:$0xff] %v3668_v3  ;;  %v3693_v8 = vld [vmem:[%s4667_s1 + $0x18] sm:$0xf0]  ;;  %v3698_v9 = vld [vmem:[%s4671_s3] sm:$0x1]  ;;  %v3713_v12 = vld [vmem:[%s4672_s4 + $0x10] sm:$0xff] }
   0x5   :  { %12 = vst [vmem:[#allocation3] sm:$0x1] %v11_v0  ;;  %v3718_v13 = vld [vmem:[%s4672_s4 + $0x18] sm:$0xff]  ;;  %v3723_v14 = vld [vmem:[%s4672_s4 + $0x20] sm:$0xff]  ;;  %v3728_v15 = vld [vmem:[%s4672_s4 + $0x28] sm:$0xff] }
   0x6   :  { %4693 = vst [vmem:[#allocation7_spill] sm:$0xff] %v3673_v4  ;;  %v3733_v16 = vld [vmem:[%s4672_s4 + $0x30] sm:$0xff]  ;;  %v3738_v17 = vld [vmem:[%s4672_s4 + $0x38] sm:$0xff] }
   0x7   :  { %4694 = vst [vmem:[#allocation8_spill] sm:$0xff] %v3678_v5 }
   0x8   :  { %4695 = vst [vmem:[#allocation9_spill] sm:$0xff] %v3683_v6 }
   0x9   :  { %4696 = vst [vmem:[#allocation10_spill] sm:$0xff] %v3688_v7 }
   0xa   :  { %4697 = vst [vmem:[#allocation11_spill] sm:$0xff] %v3693_v8 }
   0xb   :  { %4698 = vst [vmem:[#allocation12_spill] sm:$0xff] %v3708_v11 }
   0xc   :  { %4699 = vst [vmem:[#allocation13_spill] sm:$0xff] %v3713_v12  ;;  %v3740_v18 = vld [vmem:[#allocation3] sm:$0x1] }
   0xd   :  { %4700 = vst [vmem:[#allocation14_spill] sm:$0xff] %v3718_v13 }
   0xe   :  { %4701 = vst [vmem:[#allocation15_spill] sm:$0xff] %v3723_v14 }
   0xf   :  { %4702 = vst [vmem:[#allocation16_spill] sm:$0xff] %v3728_v15 }
  0x10   :  { %4703 = vst [vmem:[#allocation17_spill] sm:$0xff] %v3733_v16 }
  0x11   :  { %4704 = vst [vmem:[#allocation18_spill] sm:$0xff] %v3738_v17 }
  0x12   :  { %4705 = vst [vmem:[#allocation19_spill] sm:$0xff] %v3740_v18 }
  0x13 LB: > { %v4706_v7 = vld [vmem:[#allocation10_spill] sm:$0xff]  ;;  %v4707_v8 = vld [vmem:[#allocation11_spill] sm:$0xff]  ;;  %v4708_v5 = vld [vmem:[#allocation8_spill] sm:$0xff]  ;;  %s3495_s4 = smul.u32 164, %s3615_s30  ;;  %vm221_vm0 = vcmask 523264   ;;  %vm562_vm2 = vcmask 519168   ;;  %s3615_s30 = sphi %s3742_s30, %s49_s30  }
  0x14   : > { %v3009_v19 = vor.u32 %v4707_v8, %v4706_v7  ;;  %v4709_v6 = vld [vmem:[#allocation9_spill] sm:$0xff]  ;;  %v4710_v3 = vld [vmem:[#allocation6_spill] sm:$0xff]  ;;  %v4711_v4 = vld [vmem:[#allocation7_spill] sm:$0xff]  ;;  %vm689_vm8 = vcmask 1043456  }
  0x15   : > { %v3005_v20 = vor.u32 %v4709_v6, %v4708_v5  ;;  %v3001_v21 = vor.u32 %v4711_v4, %v4710_v3  ;;  %v4712_v1 = vld [vmem:[#allocation4_spill] sm:$0xff]  ;;  %v4713_v2 = vld [vmem:[#allocation5_spill] sm:$0xff]  ;;  %s3759_s8 = scalar_lea.vmem %s4666_s0, %s3495_s4  ;;  %s2898_s4 = scalar_lea.vmem %s4670_s6, %s3615_s30 }
  0x16   : > { %289 = vmatpush.bf16.msra.mxu0 %v3009_v19  ;;  %v2997_v22 = vor.u32 %v4713_v2, %v4712_v1  ;;  %v3496_v23 = vld [vmem:[%s3759_s8] sm:$0xff]  ;;  %v3497_v24 = vld [vmem:[%s3759_s8 + $0x8] sm:$0xff]  ;;  %v3498_v25 = vld [vmem:[%s3759_s8 + $0x10] sm:$0xff]  ;;  %s49_s30 = sadd.s32 1, %s3615_s30  }
  0x17   : > { %v3499_v26 = vld [vmem:[%s3759_s8 + $0x18] sm:$0xff]  ;;  %v3500_v27 = vld [vmem:[%s3759_s8 + $0x20] sm:$0xff]  ;;  %v3501_v28 = vld [vmem:[%s3759_s8 + $0x28] sm:$0xff]  ;;  %p46_p0 = scmp.ge.s32.totalorder %s49_s30, 2  }
  0x18   : > { %v3502_v29 = vld [vmem:[%s3759_s8 + $0x30] sm:$0xff]  ;;  %v3503_v30 = vld [vmem:[%s3759_s8 + $0x38] sm:$0xff]  ;;  %v3504_v31 = vld [vmem:[%s3759_s8 + $0x40] sm:$0xff] }
  0x19   : > { %v3505_v40 = vld [vmem:[%s3759_s8 + $0x48] sm:$0xff]  ;;  %v3506_v53 = vld [vmem:[%s3759_s8 + $0x50] sm:$0xff] }
  0x1a   : > { %290 = vmatpush.bf16.msra.mxu0 %v3005_v20 }
  0x1e   : > { %291 = vmatpush.bf16.msra.mxu0 %v3001_v21 }
  0x22   : > { %292 = vmatpush.bf16.msra.mxu0 %v2997_v22 }
  0x25   : > { %3010 = vmatmul.msk.bf16.vlgmr.msra.gmra.mxu0 %vm221_vm0, %v3496_v23 }
  0x35   : > { %3011 = vmatmul.msk.bf16.gmra.mxu0 %vm221_vm0, %v3497_v24 }
  0x45   : > { %3012 = vmatmul.msk.bf16.gmra.mxu0 %vm221_vm0, %v3498_v25 }
  0x55   : > { %3013 = vmatmul.msk.bf16.gmra.mxu0 %vm221_vm0, %v3499_v26 }
  0x65   : > { %3014 = vmatmul.msk.bf16.gmra.mxu0 %vm221_vm0, %v3500_v27 }
  0x75   : > { %3015 = vmatmul.msk.bf16.gmra.mxu0 %vm221_vm0, %v3501_v28 }
  0x85   : > { %3016 = vmatmul.msk.bf16.gmra.mxu0 %vm221_vm0, %v3502_v29 }
  0x95   : > { %3017 = vmatmul.msk.bf16.gmra.mxu0 %vm221_vm0, %v3503_v30 }
  0xa2   : > { %v294_v32 = vpop.f32.mrf.mxu0 }
  0xa3   : > { %vm398_vm1 = vcmp.ge.f32.partialorder %v294_v32, 0.0  ;;  %v439_v33 = vmul.f32 0.2, %v294_v32 }
  0xa5   : > { %v480_v34 = vsel %vm398_vm1, %v294_v32, %v439_v33  ;;  %3018 = vmatmul.msk.bf16.gmra.mxu0 %vm221_vm0, %v3504_v31 }
  0xa6   : > { %v521_v35 = vpack.c.bf16 %v480_v34, %v480_v34 }
  0xa8   : > { %563 = vst.msk [vmem:[#allocation2] sm:$0xf] %vm562_vm2, %v521_v35 }
  0xaa   : > { %v296_v36 = vpop.f32.mrf.mxu0 }
  0xab   : > { %vm399_vm3 = vcmp.ge.f32.partialorder %v296_v36, 0.0  ;;  %v440_v37 = vmul.f32 0.2, %v296_v36 }
  0xad   : > { %v481_v38 = vsel %vm399_vm3, %v296_v36, %v440_v37 }
  0xae   : > { %v522_v39 = vpack.c.bf16 %v481_v38, %v481_v38 }
  0xb0   : > { %564 = vst.msk [vmem:[#allocation2 + $0x4] sm:$0xf] %vm562_vm2, %v522_v39 }
  0xb2   : > { %v299_v41 = vpop.f32.mrf.mxu0 }
  0xb3   : > { %vm400_vm4 = vcmp.ge.f32.partialorder %v299_v41, 0.0  ;;  %v441_v42 = vmul.f32 0.2, %v299_v41 }
  0xb5   : > { %v482_v43 = vsel %vm400_vm4, %v299_v41, %v441_v42  ;;  %3019 = vmatmul.msk.bf16.gmra.mxu0 %vm221_vm0, %v3505_v40  ;;  %v3507_v42 = vld [vmem:[%s3759_s8 + $0x58] sm:$0xff] }
  0xb6   : > { %v523_v44 = vpack.c.bf16 %v482_v43, %v482_v43 }
  0xb7   : > { %v606_v48 = vld [vmem:[#allocation2 + $0x4] sm:$0xf] }
  0xb8   : > { %565 = vst.msk [vmem:[#allocation2 + $0x8] sm:$0xf] %vm562_vm2, %v523_v44  ;;  %v622_v51 = vunpack.c.l.b16 %v606_v48  ;;  %v942_v63 = vld [vmem:[#allocation2 + $0x4] sm:$0xe] }
  0xb9   : > { %v961_v27 = vunpack.c.l.b16 %v942_v63 }
  0xba   : > { %v301_v45 = vpop.f32.mrf.mxu0 }
  0xbb   : > { %vm401_vm5 = vcmp.ge.f32.partialorder %v301_v45, 0.0  ;;  %v442_v46 = vmul.f32 0.2, %v301_v45 }
  0xbd   : > { %v483_v47 = vsel %vm401_vm5, %v301_v45, %v442_v46 }
  0xbe   : > { %v524_v49 = vpack.c.bf16 %v483_v47, %v483_v47 }
  0xbf   : > { %v607_v50 = vld [vmem:[#allocation2 + $0x8] sm:$0x1]  ;;  %v608_v59 = vld [vmem:[#allocation2 + $0x8] sm:$0xe] }
  0xc0   : > { %566 = vst.msk [vmem:[#allocation2 + $0xc] sm:$0xf] %vm562_vm2, %v524_v49  ;;  %v623_v52 = vunpack.c.l.b16 %v607_v50  ;;  %v635_v0 = vunpack.c.l.b16 %v608_v59 }
  0xc2   : > { %v304_v54 = vpop.f32.mrf.mxu0  ;;  %v3786_v55 = vpack.c.b16 %v623_v52, %v622_v51  ;;  %v3803_v33 = vpack.c.b16 %v623_v52, %v961_v27 }
  0xc3   : > { %vm402_vm6 = vcmp.ge.f32.partialorder %v304_v54, 0.0  ;;  %v443_v56 = vmul.f32 0.2, %v304_v54 }
  0xc4   : > { %v4685_v58 = vshll.u32 %v3786_v55, 16  ;;  %v4686_v21 = vshrl.u32 %v3786_v55, 16  ;;  %v2139_v43 = vrot.slane %v3803_v33, 1 }
  0xc5   : > { %v484_v57 = vsel %vm402_vm6, %v304_v54, %v443_v56  ;;  %3020 = vmatmul.msk.bf16.gmra.mxu0 %vm221_vm0, %v3506_v53 }
  0xc6   : > { %v525_v60 = vpack.c.bf16 %v484_v57, %v484_v57  ;;  %v1914_v22 = vrot.slane %v4685_v58, 1 }
  0xc7   : > { %v609_v61 = vld [vmem:[#allocation2 + $0xc] sm:$0x1]  ;;  %v610_v34 = vld [vmem:[#allocation2 + $0xc] sm:$0xe] }
  0xc8   : > { %v943_v62 = vld [vmem:[#allocation2 + $0xc] sm:$0x3]  ;;  %567 = vst.msk [vmem:[#allocation2 + $0x10] sm:$0xf] %vm562_vm2, %v525_v60  ;;  %v636_v19 = vunpack.c.l.b16 %v609_v61  ;;  %v1915_v28 = vor.u32 %v1914_v22, %v4686_v21  ;;  %v641_v40 = vunpack.c.l.b16 %v610_v34  ;;  %v944_v57 = vld [vmem:[#allocation2 + $0xc] sm:$0xc] }
  0xc9   : > { %v965_v20 = vunpack.c.l.b16 %v943_v62 }
  0xca   : > { %v306_v23 = vpop.f32.mrf.mxu0  ;;  %v3794_v24 = vpack.c.b16 %v636_v19, %v635_v0 }
  0xcb   : > { %v3796_v25 = vpack.c.b16 %v965_v20, %v635_v0  ;;  %vm403_vm7 = vcmp.ge.f32.partialorder %v306_v23, 0.0  ;;  %v444_v26 = vmul.f32 0.2, %v306_v23 }
  0xcc   : > { %v1916_v31 = vrot.slane %v3794_v24, 5 }
  0xcd   : > { %v4682_v29 = vshrl.u32 %v3796_v25, 16  ;;  %v4681_v30 = vshll.u32 %v3796_v25, 16  ;;  %v485_v32 = vsel %vm403_vm7, %v306_v23, %v444_v26  ;;  %v976_v23 = vunpack.c.l.b16 %v944_v57 }
  0xce   : > { %v526_v35 = vpack.c.bf16 %v485_v32, %v485_v32  ;;  %v3810_v39 = vsel %vm689_vm8, %v1915_v28, %v1916_v31 }
  0xcf   : > { %v2140_v36 = vrot.slane %v4682_v29, 5  ;;  %v611_v37 = vld [vmem:[#allocation2 + $0x10] sm:$0x3]  ;;  %v2141_v38 = vrot.slane %v4681_v30, 6  ;;  %v612_v52 = vld [vmem:[#allocation2 + $0x10] sm:$0xc] }
  0xd0   : > { %568 = vst.msk [vmem:[#allocation2 + $0x14] sm:$0xf] %vm562_vm2, %v526_v35  ;;  %v642_v41 = vunpack.c.l.b16 %v611_v37  ;;  %v654_v59 = vunpack.c.l.b16 %v612_v52 }
  0xd1   : > { %v2142_v44 = vor.u32 %v2141_v38, %v2140_v36 }
  0xd2   : > { %v309_v45 = vpop.f32.mrf.mxu0  ;;  %v3815_v46 = vpack.c.b16 %v642_v41, %v641_v40  ;;  %v3835_v34 = vpack.c.b16 %v642_v41, %v976_v23 }
  0xd3   : > { %vm404_vm9 = vcmp.ge.f32.partialorder %v309_v45, 0.0  ;;  %v445_v47 = vmul.f32 0.2, %v309_v45  ;;  %v3818_v48 = vsel %vm689_vm8, %v2139_v43, %v2142_v44 }
  0xd4   : > { %v4684_v50 = vshrl.u32 %v3815_v46, 16  ;;  %v4683_v51 = vshll.u32 %v3815_v46, 16  ;;  %v2143_v41 = vrot.slane %v3835_v34, 2 }
  0xd5   : > { %v486_v49 = vsel %vm404_vm9, %v309_v45, %v445_v47  ;;  %3021 = vmatmul.msk.bf16.gmra.mxu0 %vm221_vm0, %v3507_v42  ;;  %v3508_v45 = vld [vmem:[%s3759_s8 + $0x60] sm:$0xff] }
  0xd6   : > { %v527_v53 = vpack.c.bf16 %v486_v49, %v486_v49  ;;  %v1917_v62 = vrot.slane %v4684_v50, 1  ;;  %v1918_v63 = vrot.slane %v4683_v51, 2 }
  0xd7   : > { %v613_v54 = vld [vmem:[#allocation2 + $0x14] sm:$0x3]  ;;  %v614_v35 = vld [vmem:[#allocation2 + $0x14] sm:$0xc] }
  0xd8   : > { %v945_v56 = vld [vmem:[#allocation2 + $0x14] sm:$0x7]  ;;  %569 = vst.msk [vmem:[#allocation2 + $0x18] sm:$0xf] %vm562_vm2, %v527_v53  ;;  %v655_v60 = vunpack.c.l.b16 %v613_v54  ;;  %v1919_v26 = vor.u32 %v1918_v63, %v1917_v62  ;;  %v660_v43 = vunpack.c.l.b16 %v614_v35  ;;  %v3523_v62 = vld [vmem:[%s4668_s2 + $0x38] sm:$0xff] }
  0xd9   : > { %v980_v61 = vunpack.c.l.b16 %v945_v56  ;;  %854 = vmatpush.bf16.msra.mxu1 %v3523_v62  ;;  %3585 = vmatpush.bf16.msra.mxu2 %v3523_v62 }
  0xda   : > { %v311_v0 = vpop.f32.mrf.mxu0  ;;  %v3828_v19 = vpack.c.b16 %v655_v60, %v654_v59  ;;  %3586 = vmatpush.bf16.msra.mxu3 %v3523_v62  ;;  %v3521_v62 = vld [vmem:[%s4668_s2 + $0x28] sm:$0xff] }
  0xdb   : > { %v3830_v20 = vpack.c.b16 %v980_v61, %v654_v59  ;;  %vm405_vm10 = vcmp.ge.f32.partialorder %v311_v0, 0.0  ;;  %v446_v22 = vmul.f32 0.2, %v311_v0 }
  0xdc   : > { %v1920_v31 = vrot.slane %v3828_v19, 6 }
  0xdd   : > { %v4678_v27 = vshrl.u32 %v3830_v20, 16  ;;  %v4677_v28 = vshll.u32 %v3830_v20, 16  ;;  %v487_v32 = vsel %vm405_vm10, %v311_v0, %v446_v22  ;;  %v946_v22 = vld [vmem:[#allocation2 + $0x14] sm:$0x8] }
  0xde   : > { %v528_v36 = vpack.c.bf16 %v487_v32, %v487_v32  ;;  %v3838_v37 = vsel %vm689_vm8, %v1919_v26, %v1920_v31 }
  0xdf   : > { %v615_v38 = vld [vmem:[#allocation2 + $0x18] sm:$0x7]  ;;  %v2144_v40 = vrot.slane %v4678_v27, 6  ;;  %v2145_v42 = vrot.slane %v4677_v28, 7  ;;  %v616_v60 = vld [vmem:[#allocation2 + $0x18] sm:$0x8] }
  0xe0   : > { %570 = vst.msk [vmem:[#allocation2 + $0x1c] sm:$0xf] %vm562_vm2, %v528_v36  ;;  %v661_v44 = vunpack.c.l.b16 %v615_v38  ;;  %v673_v23 = vunpack.c.l.b16 %v616_v60  ;;  %v3522_v38 = vld [vmem:[%s4668_s2 + $0x30] sm:$0xff] }
  0xe1   : > { %v2146_v47 = vor.u32 %v2145_v42, %v2144_v40  ;;  %855 = vmatpush.bf16.msra.mxu1 %v3522_v38  ;;  %3587 = vmatpush.bf16.msra.mxu2 %v3522_v38 }
  0xe2   : > { %v314_v49 = vpop.f32.mrf.mxu0  ;;  %v3847_v52 = vpack.c.b16 %v661_v44, %v660_v43  ;;  %3588 = vmatpush.bf16.msra.mxu3 %v3522_v38  ;;  %v3520_v38 = vld [vmem:[%s4668_s2 + $0x20] sm:$0xff] }
  0xe3   : > { %vm406_vm11 = vcmp.ge.f32.partialorder %v314_v49, 0.0  ;;  %v447_v53 = vmul.f32 0.2, %v314_v49  ;;  %v3850_v54 = vsel %vm689_vm8, %v2143_v41, %v2146_v47 }
  0xe4   : > { %v4680_v57 = vshrl.u32 %v3847_v52, 16  ;;  %v4679_v59 = vshll.u32 %v3847_v52, 16 }
  0xe5   : > { %v488_v56 = vsel %vm406_vm11, %v314_v49, %v447_v53  ;;  %3022 = vmatmul.msk.bf16.gmra.mxu0 %vm221_vm0, %v3508_v45  ;;  %v991_v45 = vunpack.c.l.b16 %v946_v22  ;;  %856 = vmatpush.bf16.msra.mxu1 %v3521_v62 }
  0xe6   : > { %v529_v61 = vpack.c.bf16 %v488_v56, %v488_v56  ;;  %v1921_v32 = vrot.slane %v4680_v57, 2  ;;  %v1922_v35 = vrot.slane %v4679_v59, 3  ;;  %3589 = vmatpush.bf16.msra.mxu2 %v3521_v62  ;;  %3590 = vmatpush.bf16.msra.mxu3 %v3521_v62  ;;  %v3533_v62 = vld [vmem:[%s4668_s2 + $0x78] sm:$0xff] }
  0xe7   : > { %v617_v63 = vld [vmem:[#allocation2 + $0x1c] sm:$0x7]  ;;  %v3872_v56 = vpack.c.b16 %v661_v44, %v991_v45  ;;  %v618_v60 = vld [vmem:[#allocation2 + $0x1c] sm:$0x8] }
  0xe8   : > { %v947_v0 = vld [vmem:[#allocation2 + $0x1c] sm:$0xf]  ;;  %571 = vst.msk [vmem:[#allocation2 + $0x20] sm:$0xf] %vm562_vm2, %v529_v61  ;;  %v674_v26 = vunpack.c.l.b16 %v617_v63  ;;  %v1923_v41 = vor.u32 %v1922_v35, %v1921_v32  ;;  %v679_v44 = vunpack.c.l.b16 %v618_v60 }
  0xe9   : > { %v995_v31 = vunpack.c.l.b16 %v947_v0  ;;  %v2147_v32 = vrot.slane %v3872_v56, 3  ;;  %857 = vmatpush.bf16.msra.mxu1 %v3520_v38 }
  0xea   : > { %v316_v36 = vpop.f32.mrf.mxu0  ;;  %v3866_v40 = vpack.c.b16 %v674_v26, %v673_v23  ;;  %3591 = vmatpush.bf16.msra.mxu2 %v3520_v38  ;;  %3592 = vmatpush.bf16.msra.mxu3 %v3520_v38 }
  0xeb   : > { %v3868_v42 = vpack.c.b16 %v995_v31, %v673_v23  ;;  %vm407_vm12 = vcmp.ge.f32.partialorder %v316_v36, 0.0  ;;  %v448_v43 = vmul.f32 0.2, %v316_v36  ;;  %v3509_v31 = vld [vmem:[%s3759_s8 + $0x68] sm:$0xff] }
  0xec   : > { %v1924_v49 = vrot.slane %v3866_v40, 7 }
  0xed   : > { %v4674_v47 = vshrl.u32 %v3868_v42, 16  ;;  %v489_v53 = vsel %vm407_vm12, %v316_v36, %v448_v43  ;;  %v4673_v22 = vshll.u32 %v3868_v42, 16  ;;  %1218 = vmatpush.bf16.msrb.mxu1 %v3533_v62  ;;  %v3530_v62 = vld [vmem:[%s4668_s2 + $0x60] sm:$0xff] }
  0xee   : > { %v530_v61 = vpack.c.bf16 %v489_v53, %v489_v53  ;;  %v3878_v63 = vsel %vm689_vm8, %v1923_v41, %v1924_v49 }
  0xef   : > { %v619_v0 = vld [vmem:[#allocation2 + $0x20] sm:$0xf]  ;;  %v2148_v23 = vrot.slane %v4674_v47, 7 }
  0xf0   : > { %572 = vst.msk [vmem:[#allocation2 + $0x24] sm:$0xf] %vm562_vm2, %v530_v61  ;;  %v3884_v26 = vunpack.c.l.b16 %v619_v0 }
  0xf1   : > { %v2149_v35 = vor.u32 %v2148_v23, %v4673_v22 }
  0xf2   : > { %v319_v36 = vpop.f32.mrf.mxu0  ;;  %v3894_v43 = vpack.c.b16 %v3884_v26, %v679_v44 }
  0xf3   : > { %vm408_vm13 = vcmp.ge.f32.partialorder %v319_v36, 0.0  ;;  %v449_v45 = vmul.f32 0.2, %v319_v36  ;;  %v3897_v41 = vsel %vm689_vm8, %v2147_v32, %v2149_v35  ;;  %v3532_v32 = vld [vmem:[%s4668_s2 + $0x70] sm:$0xff] }
  0xf4   : > { %v4676_v49 = vshrl.u32 %v3894_v43, 16  ;;  %v4675_v53 = vshll.u32 %v3894_v43, 16  ;;  %1219 = vmatpush.bf16.msrb.mxu1 %v3532_v32 }
  0xf5   : > { %v490_v60 = vsel %vm408_vm13, %v319_v36, %v449_v45  ;;  %3023 = vmatmul.msk.bf16.gmra.mxu0 %vm221_vm0, %v3509_v31  ;;  %v3531_v45 = vld [vmem:[%s4668_s2 + $0x68] sm:$0xff] }
  0xf6   : > { %v531_v61 = vpack.c.bf16 %v490_v60, %v490_v60  ;;  %v3907_v0 = vrot.slane %v4676_v49, 3  ;;  %v3911_v23 = vrot.slane %v4675_v53, 4  ;;  %v3510_v60 = vld [vmem:[%s3759_s8 + $0x70] sm:$0xff] }
  0xf8   : > { %573 = vst.msk [vmem:[#allocation2 + $0x28] sm:$0xf] %vm562_vm2, %v531_v61  ;;  %1220 = vmatpush.bf16.msrb.mxu1 %v3531_v45 }
  0xfa   : > { %v321_v31 = vpop.f32.mrf.mxu0 }
  0xfb   : > { %vm409_vm14 = vcmp.ge.f32.partialorder %v321_v31, 0.0  ;;  %v450_v35 = vmul.f32 0.2, %v321_v31 }
  0xfc   : > { %1221 = vmatpush.bf16.msrb.mxu1 %v3530_v62 }
  0xfd   : > { %v491_v36 = vsel %vm409_vm14, %v321_v31, %v450_v35 }
  0xfe   : > { %v532_v38 = vpack.c.bf16 %v491_v36, %v491_v36 }
  0xff   : > { %v710_v31 = vld [vmem:[#allocation2 + $0x28] sm:$0xf] }
 0x100   : > { %574 = vst.msk [vmem:[#allocation2 + $0x2c] sm:$0xf] %vm562_vm2, %v532_v38  ;;  %v727_v36 = vunpack.c.l.b16 %v710_v31 }
 0x102   : > { %v324_v61 = vpop.f32.mrf.mxu0 }
 0x103   : > { %vm410_vm15 = vcmp.ge.f32.partialorder %v324_v61, 0.0  ;;  %v451_v44 = vmul.f32 0.2, %v324_v61 }
 0x105   : > { %v492_v22 = vsel %vm410_vm15, %v324_v61, %v451_v44  ;;  %3024 = vmatmul.msk.bf16.gmra.mxu0 %vm221_vm0, %v3510_v60 }
 0x106   : > { %v533_v32 = vpack.c.bf16 %v492_v22, %v492_v22 }
 0x107   : > { %v711_v35 = vld [vmem:[#allocation2 + $0x2c] sm:$0x1]  ;;  %v712_v27 = vld [vmem:[#allocation2 + $0x2c] sm:$0xe] }
 0x108   : > { %575 = vst.msk [vmem:[#allocation2 + $0x30] sm:$0xf] %vm562_vm2, %v533_v32  ;;  %v728_v38 = vunpack.c.l.b16 %v711_v35  ;;  %v739_v22 = vunpack.c.l.b16 %v712_v27  ;;  %v3511_v32 = vld [vmem:[%s3759_s8 + $0x78] sm:$0xff] }
 0x10a   : > { %v326_v45 = vpop.f32.mrf.mxu0  ;;  %v729_v47 = vpack.c.b16 %v728_v38, %v727_v36 }
 0x10b   : > { %vm411_vm1 = vcmp.ge.f32.partialorder %v326_v45, 0.0  ;;  %v452_v53 = vmul.f32 0.2, %v326_v45 }
 0x10c   : > { %v733_v49 = vshll.u32 %v729_v47, 16  ;;  %v731_v35 = vshrl.u32 %v729_v47, 16 }
 0x10d   : > { %v493_v28 = vsel %vm411_vm1, %v326_v45, %v452_v53 }
 0x10e   : > { %v534_v59 = vpack.c.bf16 %v493_v28, %v493_v28  ;;  %v735_v60 = vrot.slane %v733_v49, 1 }
 0x10f   : > { %v713_v62 = vld [vmem:[#allocation2 + $0x30] sm:$0x1]  ;;  %v1098_v27 = vld [vmem:[#allocation2 + $0x30] sm:$0xc] }
 0x110   : > { %v1097_v44 = vld [vmem:[#allocation2 + $0x30] sm:$0x3]  ;;  %576 = vst.msk [vmem:[#allocation2 + $0x34] sm:$0xf] %vm562_vm2, %v534_v59  ;;  %v740_v61 = vunpack.c.l.b16 %v713_v62  ;;  %v736_v51 = vor.u32 %v735_v60, %v731_v35 }
 0x111   : > { %v1109_v57 = vunpack.c.l.b16 %v1097_v44  ;;  %v714_v59 = vld [vmem:[#allocation2 + $0x30] sm:$0xe] }
 0x112   : > { %v329_v31 = vpop.f32.mrf.mxu0  ;;  %v3931_v30 = vpack.c.b16 %v740_v61, %v739_v22  ;;  %v745_v60 = vunpack.c.l.b16 %v714_v59  ;;  %v1120_v61 = vunpack.c.l.b16 %v1098_v27 }
 0x113   : > { %v1110_v36 = vpack.c.b16 %v1109_v57, %v739_v22  ;;  %vm412_vm3 = vcmp.ge.f32.partialorder %v329_v31, 0.0  ;;  %v453_v29 = vmul.f32 0.2, %v329_v31 }
 0x114   : > { %v742_v53 = vrot.slane %v3931_v30, 5 }
 0x115   : > { %v1112_v28 = vshrl.u32 %v1110_v36, 16  ;;  %v1115_v45 = vshll.u32 %v1110_v36, 16  ;;  %v494_v50 = vsel %vm412_vm3, %v329_v31, %v453_v29  ;;  %3025 = vmatmul.msk.bf16.gmra.mxu0 %vm221_vm0, %v3511_v32  ;;  %v3519_v29 = vld [vmem:[%s4668_s2 + $0x18] sm:$0xff]  ;;  %v1096_v32 = vld [vmem:[#allocation2 + $0x28] sm:$0xe] }
 0x116   : > { %v535_v49 = vpack.c.bf16 %v494_v50, %v494_v50  ;;  %v799_v62 = vsel %vm689_vm8, %v736_v51, %v742_v53  ;;  %915 = vmatpush.bf16.msrb.mxu2 %v3519_v29  ;;  %v3518_v53 = vld [vmem:[%s4668_s2 + $0x10] sm:$0xff] }
 0x117   : > { %3055 = vmatmul.msk.bf16.vlgmr.msra.gmra.mxu1 %vm221_vm0, %v799_v62  ;;  %v715_v47 = vld [vmem:[#allocation2 + $0x34] sm:$0x3]  ;;  %v2254_v44 = vrot.slane %v1112_v28, 1  ;;  %v2255_v57 = vrot.slane %v1115_v45, 2  ;;  %v716_v59 = vld [vmem:[#allocation2 + $0x34] sm:$0xc]  ;;  %v1105_v62 = vunpack.c.l.b16 %v1096_v32 }
 0x118   : > { %577 = vst.msk [vmem:[#allocation2 + $0x38] sm:$0xf] %vm562_vm2, %v535_v49  ;;  %v746_v22 = vunpack.c.l.b16 %v715_v47 }
 0x119   : > { %v2256_v31 = vor.u32 %v2255_v57, %v2254_v44  ;;  %v1106_v44 = vpack.c.b16 %v728_v38, %v1105_v62  ;;  %v1114_v57 = vrot.slane %v1112_v28, 5  ;;  %v3512_v38 = vld [vmem:[%s3759_s8 + $0x80] sm:$0xff] }
 0x11a   : > { %v331_v35 = vpop.f32.mrf.mxu0  ;;  %v747_v50 = vpack.c.b16 %v746_v22, %v745_v60  ;;  %v3941_v36 = vpack.c.b16 %v746_v22, %v1120_v61  ;;  %v1117_v60 = vrot.slane %v1115_v45, 6  ;;  %916 = vmatpush.bf16.msrb.mxu2 %v3518_v53  ;;  %v758_v61 = vunpack.c.l.b16 %v716_v59 }
 0x11b   : > { %vm413_vm4 = vcmp.ge.f32.partialorder %v331_v35, 0.0  ;;  %v454_v51 = vmul.f32 0.2, %v331_v35 }
 0x11c   : > { %v749_v49 = vshrl.u32 %v747_v50, 16  ;;  %v752_v27 = vshll.u32 %v747_v50, 16  ;;  %v2257_v47 = vrot.slane %v3941_v36, 6  ;;  %v1118_v53 = vor.u32 %v1117_v60, %v1114_v57 }
 0x11d   : > { %v495_v58 = vsel %vm413_vm4, %v331_v35, %v454_v51  ;;  %v1107_v51 = vrot.slane %v1106_v44, 1 }
 0x11e   : > { %v536_v21 = vpack.c.bf16 %v495_v58, %v495_v58  ;;  %v2024_v1 = vrot.slane %v749_v49, 5  ;;  %v3948_v2 = vsel %vm689_vm8, %v2256_v31, %v2257_v47  ;;  %v751_v50 = vrot.slane %v749_v49, 1  ;;  %v3517_v58 = vld [vmem:[%s4668_s2 + $0x8] sm:$0xff] }
 0x11f   : > { %v717_v22 = vld [vmem:[#allocation2 + $0x38] sm:$0x3]  ;;  %v754_v32 = vrot.slane %v752_v27, 2  ;;  %v2025_v28 = vrot.slane %v752_v27, 6  ;;  %917 = vmatpush.bf16.msrb.mxu2 %v3517_v58  ;;  %v2023_v49 = vrot.slane %v3931_v30, 1  ;;  %v1163_v30 = vsel %vm689_vm8, %v1107_v51, %v1118_v53 }
 0x120   : > { %v1099_v29 = vld [vmem:[#allocation2 + $0x38] sm:$0x7]  ;;  %578 = vst.msk [vmem:[#allocation2 + $0x3c] sm:$0xf] %vm562_vm2, %v536_v21  ;;  %v759_v3 = vunpack.c.l.b16 %v717_v22  ;;  %v3516_v21 = vld [vmem:[%s4668_s2] sm:$0xff] }
 0x121   : > { %v1124_v4 = vunpack.c.l.b16 %v1099_v29  ;;  %v2026_v62 = vor.u32 %v2025_v28, %v2024_v1  ;;  %v755_v47 = vor.u32 %v754_v32, %v751_v50  ;;  %v718_v44 = vld [vmem:[#allocation2 + $0x38] sm:$0xc] }
 0x122   : > { %v334_v45 = vpop.f32.mrf.mxu0  ;;  %v3955_v35 = vpack.c.b16 %v759_v3, %v758_v61  ;;  %v1100_v57 = vld [vmem:[#allocation2 + $0x38] sm:$0x8] }
 0x123   : > { %v1125_v59 = vpack.c.b16 %v1124_v4, %v758_v61  ;;  %vm414_vm5 = vcmp.ge.f32.partialorder %v334_v45, 0.0  ;;  %v455_v31 = vmul.f32 0.2, %v334_v45  ;;  %v3528_v4 = vld [vmem:[%s4668_s2 + $0x58] sm:$0xff]  ;;  %v3967_v60 = vsel %vm689_vm8, %v2023_v49, %v2026_v62  ;;  %918 = vmatpush.bf16.msrb.mxu2 %v3516_v21 }
 0x124   : > { %v761_v22 = vrot.slane %v3955_v35, 6  ;;  %1063 = vmatpush.bf16.msrb.mxu3 %v3528_v4  ;;  %v3526_v4 = vld [vmem:[%s4668_s2 + $0x48] sm:$0xff] }
 0x125   : > { %v1127_v27 = vshrl.u32 %v1125_v59, 16  ;;  %v1130_v29 = vshll.u32 %v1125_v59, 16  ;;  %v496_v3 = vsel %vm414_vm5, %v334_v45, %v455_v31  ;;  %3026 = vmatmul.msk.bf16.gmra.mxu0 %vm221_vm0, %v3512_v38  ;;  %v764_v38 = vunpack.c.l.b16 %v718_v44  ;;  %v3527_v59 = vld [vmem:[%s4668_s2 + $0x50] sm:$0xff] }
 0x126   : > { %v537_v61 = vpack.c.bf16 %v496_v3, %v496_v3  ;;  %v802_v1 = vsel %vm689_vm8, %v755_v47, %v761_v22  ;;  %v1135_v45 = vunpack.c.l.b16 %v1100_v57 }
 0x127   : > { %3056 = vmatmul.msk.bf16.vlgmr.msra.gmra.mxu2 %vm221_vm0, %v802_v1  ;;  %3139 = vmatmul.msk.bf16.vlgmr.msrb.gmra.mxu1 %vm221_vm0, %v1163_v30  ;;  %v719_v50 = vld [vmem:[#allocation2 + $0x3c] sm:$0x7]  ;;  %v2258_v32 = vrot.slane %v1127_v27, 2  ;;  %v2259_v58 = vrot.slane %v1130_v29, 3  ;;  %v720_v62 = vld [vmem:[#allocation2 + $0x3c] sm:$0x8] }
 0x128   : > { %579 = vst.msk [vmem:[#allocation2 + $0x40] sm:$0xf] %vm562_vm2, %v537_v61  ;;  %v765_v28 = vunpack.c.l.b16 %v719_v50  ;;  %1064 = vmatpush.bf16.msrb.mxu3 %v3527_v59  ;;  %v1129_v61 = vrot.slane %v1127_v27, 6  ;;  %v1132_v1 = vrot.slane %v1130_v29, 7  ;;  %v777_v50 = vunpack.c.l.b16 %v720_v62  ;;  %v3525_v27 = vld [vmem:[%s4668_s2 + $0x40] sm:$0xff] }
 0x129   : > { %v2260_v31 = vor.u32 %v2259_v58, %v2258_v32 }
 0x12a   : > { %v336_v51 = vpop.f32.mrf.mxu0  ;;  %v766_v53 = vpack.c.b16 %v765_v28, %v764_v38  ;;  %v3977_v21 = vpack.c.b16 %v765_v28, %v1135_v45 }
 0x12b   : > { %vm415_vm6 = vcmp.ge.f32.partialorder %v336_v51, 0.0  ;;  %v456_v49 = vmul.f32 0.2, %v336_v51 }
 0x12c   : > { %v768_v47 = vshrl.u32 %v766_v53, 16  ;;  %v771_v22 = vshll.u32 %v766_v53, 16  ;;  %v2261_v3 = vrot.slane %v3977_v21, 7  ;;  %1065 = vmatpush.bf16.msrb.mxu3 %v3526_v4  ;;  %v3513_v53 = vld [vmem:[%s3759_s8 + $0x88] sm:$0xff] }
 0x12d   : > { %v497_v44 = vsel %vm415_vm6, %v336_v51, %v456_v49 }
 0x12e   : > { %v538_v57 = vpack.c.bf16 %v497_v44, %v497_v44  ;;  %v2028_v58 = vrot.slane %v768_v47, 6  ;;  %v3984_v38 = vsel %vm689_vm8, %v2260_v31, %v2261_v3  ;;  %v770_v28 = vrot.slane %v768_v47, 2 }
 0x12f   : > { %v721_v30 = vld [vmem:[#allocation2 + $0x40] sm:$0x7]  ;;  %v773_v45 = vrot.slane %v771_v22, 3  ;;  %v2029_v29 = vrot.slane %v771_v22, 7  ;;  %v1122_v44 = vrot.slane %v3941_v36, 2  ;;  %v1133_v31 = vor.u32 %v1132_v1, %v1129_v61 }
 0x130   : > { %v1101_v32 = vld [vmem:[#allocation2 + $0x40] sm:$0xf]  ;;  %580 = vst.msk [vmem:[#allocation2 + $0x44] sm:$0xf] %vm562_vm2, %v538_v57  ;;  %v778_v59 = vunpack.c.l.b16 %v721_v30  ;;  %v2027_v47 = vrot.slane %v3955_v35, 2  ;;  %1066 = vmatpush.bf16.msrb.mxu3 %v3525_v27 }
 0x131   : > { %v1139_v51 = vunpack.c.l.b16 %v1101_v32  ;;  %v2030_v30 = vor.u32 %v2029_v29, %v2028_v58  ;;  %v774_v32 = vor.u32 %v773_v45, %v770_v28  ;;  %v722_v22 = vld [vmem:[#allocation2 + $0x40] sm:$0x8]  ;;  %v1166_v1 = vsel %vm689_vm8, %v1122_v44, %v1133_v31  ;;  %v3546_v58 = vld [vmem:[%s4668_s2 + $0xd8] sm:$0xff]  ;;  %v3545_v44 = vld [vmem:[%s4668_s2 + $0xd0] sm:$0xff] }
 0x132   : > { %v339_v49 = vpop.f32.mrf.mxu0  ;;  %v3991_v62 = vpack.c.b16 %v778_v59, %v777_v50  ;;  %v783_v45 = vunpack.c.l.b16 %v722_v22  ;;  %1725 = vmatpush.bf16.msra.mxu1 %v3546_v58 }
 0x133   : > { %v1140_v3 = vpack.c.b16 %v1139_v51, %v777_v50  ;;  %vm416_vm7 = vcmp.ge.f32.partialorder %v339_v49, 0.0  ;;  %v457_v57 = vmul.f32 0.2, %v339_v49  ;;  %v3998_v59 = vsel %vm689_vm8, %v2027_v47, %v2030_v30 }
 0x134   : > { %v780_v4 = vrot.slane %v3991_v62, 7  ;;  %v4714_v30 = vshrl.u32 %v3786_v55, 16 }
 0x135   : > { %v1142_v5 = vshrl.u32 %v1140_v3, 16  ;;  %v1145_v6 = vshll.u32 %v1140_v3, 16  ;;  %v498_v7 = vsel %vm416_vm7, %v339_v49, %v457_v57  ;;  %3027 = vmatmul.msk.bf16.gmra.mxu0 %vm221_vm0, %v3513_v53 }
 0x136   : > { %v539_v36 = vpack.c.bf16 %v498_v7, %v498_v7  ;;  %v805_v61 = vsel %vm689_vm8, %v774_v32, %v780_v4  ;;  %v628_v32 = vrot.slane %v4714_v30, 4  ;;  %v4715_v4 = vshll.u32 %v3786_v55, 16  ;;  %1726 = vmatpush.bf16.msra.mxu1 %v3545_v44 }
 0x137   : > { %v2262_v35 = vrot.slane %v1142_v5, 3  ;;  %3057 = vmatmul.msk.bf16.gmra.mxu2 %vm221_vm0, %v805_v61  ;;  %3140 = vmatmul.msk.bf16.gmra.mxu1 %vm221_vm0, %v1166_v1  ;;  %v4004_v50 = vld [vmem:[#allocation2 + $0x44] sm:$0xf]  ;;  %v2263_v28 = vrot.slane %v1145_v6, 4 }
 0x138   : > { %581 = vst.msk [vmem:[#allocation2 + $0x48] sm:$0xf] %vm562_vm2, %v539_v36  ;;  %v784_v7 = vunpack.c.l.b16 %v4004_v50  ;;  %v631_v22 = vrot.slane %v4715_v4, 5  ;;  %v1144_v36 = vrot.slane %v1142_v5, 7  ;;  %v3543_v4 = vld [vmem:[%s4668_s2 + $0xc0] sm:$0xff] }
 0x139   : > { %v2264_v51 = vor.u32 %v2263_v28, %v2262_v35 }
 0x13a   : > { %v341_v53 = vpop.f32.mrf.mxu0  ;;  %v785_v27 = vpack.c.b16 %v784_v7, %v783_v45  ;;  %v2265_v29 = vpack.c.b16 %v784_v7, %v784_v7  ;;  %v3544_v45 = vld [vmem:[%s4668_s2 + $0xc8] sm:$0xff]  ;;  %v632_v55 = vor.u32 %v631_v22, %v628_v32  ;;  %v1147_v44 = vor.u32 %v1145_v6, %v1144_v36  ;;  %v3081_v32 = vld [vmem:[#allocation2] sm:$0xf] }
 0x13b   : > { %vm417_vm9 = vcmp.ge.f32.partialorder %v341_v53, 0.0  ;;  %v458_v49 = vmul.f32 0.2, %v341_v53  ;;  %1727 = vmatpush.bf16.msra.mxu1 %v3544_v45  ;;  %v605_v6 = vld [vmem:[#allocation2] sm:$0xf] }
 0x13c   : > { %v787_v31 = vshrl.u32 %v785_v27, 16  ;;  %v790_v3 = vshll.u32 %v785_v27, 16  ;;  %v4015_v57 = vsel %vm689_vm8, %v2264_v51, %v2265_v29  ;;  %v2031_v51 = vrot.slane %v3991_v62, 3  ;;  %v3514_v27 = vld [vmem:[%s3759_s8 + $0x90] sm:$0xff] }
 0x13d   : > { %v499_v47 = vsel %vm417_vm9, %v341_v53, %v458_v49 }
 0x13e   : > { %v540_v61 = vpack.c.bf16 %v499_v47, %v499_v47  ;;  %v789_v1 = vrot.slane %v787_v31, 3  ;;  %v792_v35 = vrot.slane %v790_v3, 4  ;;  %v2032_v58 = vrot.slane %v787_v31, 7  ;;  %v3524_v47 = vld [vmem:[#allocation2] sm:$0x10] }
 0x13f   : > { %v724_v28 = vld [vmem:[#allocation2 + $0x48] sm:$0xf]  ;;  %v3082_v36 = vor.u32 %v3524_v47, %v3081_v32  ;;  %1728 = vmatpush.bf16.msra.mxu1 %v3543_v4  ;;  %v4717_v47 = vshll.u32 %v3815_v46, 16 }
 0x140   : > { %582 = vst.msk [vmem:[#allocation2 + $0x4c] sm:$0xf] %vm562_vm2, %v540_v61  ;;  %v795_v7 = vunpack.c.l.b16 %v724_v28  ;;  %v2033_v53 = vor.u32 %v2032_v58, %v790_v3  ;;  %v793_v29 = vor.u32 %v792_v35, %v789_v1  ;;  %v1137_v3 = vrot.slane %v3977_v21, 3  ;;  %v3113_v58 = vld [vmem:[#allocation2 + $0x48] sm:$0xf] }
 0x141   : > { %v692_v1 = vsel %vm689_vm8, %v605_v6, %v632_v55  ;;  %v956_v45 = vshll.u32 %v3082_v36, 16 }
 0x142   : > { %v344_v5 = vpop.f32.mrf.mxu0  ;;  %v796_v49 = vpack.c.b16 %v795_v7, %v795_v7  ;;  %v4028_v31 = vsel %vm689_vm8, %v2031_v51, %v2033_v53  ;;  %v1169_v35 = vsel %vm689_vm8, %v1137_v3, %v1147_v44 }
 0x143   : > { %vm418_vm10 = vcmp.ge.f32.partialorder %v344_v5, 0.0  ;;  %v459_v30 = vmul.f32 0.2, %v344_v5 }
 0x144   : > { %v808_v62 = vsel %vm689_vm8, %v793_v29, %v796_v49  ;;  %v958_v29 = vrot.slane %v956_v45, 1  ;;  %v4716_v49 = vshrl.u32 %v3815_v46, 16 }
 0x145   : > { %v500_v22 = vsel %vm418_vm10, %v344_v5, %v459_v30  ;;  %3028 = vmatmul.msk.bf16.gmra.mxu0 %vm221_vm0, %v3514_v27  ;;  %3058 = vmatmul.msk.bf16.vlgmr.msra.gmra.mxu3 %vm221_vm0, %v808_v62  ;;  %v650_v30 = vrot.slane %v4717_v47, 6 }
 0x146   : > { %v541_v61 = vpack.c.bf16 %v500_v22, %v500_v22  ;;  %v647_v44 = vrot.slane %v4716_v49, 5 }
 0x147   : > { %3075 = vmatmul.msk.bf16.vlgmr.msrb.gmra.mxu2 %vm221_vm0, %v692_v1  ;;  %3141 = vmatmul.msk.bf16.gmra.mxu1 %vm221_vm0, %v1169_v35  ;;  %v3529_v21 = vld [vmem:[#allocation2 + $0x48] sm:$0x10]  ;;  %v2253_v4 = vld [vmem:[#allocation2 + $0x4c] sm:$0xe]  ;;  %v963_v1 = vrot.slane %v3803_v33, 5 }
 0x148   : > { %583 = vst.msk [vmem:[#allocation2 + $0x50] sm:$0xf] %vm562_vm2, %v541_v61  ;;  %v3114_v28 = vor.u32 %v3529_v21, %v3113_v58  ;;  %v954_v61 = vshrl.u32 %v3082_v36, 16  ;;  %v2269_v58 = vunpack.c.l.b16 %v2253_v4  ;;  %v3515_v21 = vld [vmem:[%s3759_s8 + $0x98] sm:$0xff]  ;;  %v651_v46 = vor.u32 %v650_v30, %v647_v44 }
 0x149   : > { %v3537_v30 = vld [vmem:[%s4668_s2 + $0x98] sm:$0xff] }
 0x14a   : > { %v346_v7 = vpop.f32.mrf.mxu0  ;;  %v1154_v51 = vshrl.u32 %v3114_v28, 16  ;;  %v1157_v53 = vshll.u32 %v3114_v28, 16  ;;  %v959_v45 = vor.u32 %v958_v29, %v954_v61  ;;  %1392 = vmatpush.bf16.msra.mxu2 %v3537_v30  ;;  %v3536_v61 = vld [vmem:[%s4668_s2 + $0x90] sm:$0xff] }
 0x14b   : > { %vm419_vm11 = vcmp.ge.f32.partialorder %v346_v7, 0.0  ;;  %v460_v27 = vmul.f32 0.2, %v346_v7 }
 0x14c   : > { %v2266_v5 = vrot.slane %v1157_v53, 1  ;;  %v1156_v3 = vrot.slane %v1154_v51, 4  ;;  %v1159_v32 = vrot.slane %v1157_v53, 5  ;;  %v1008_v53 = vsel %vm689_vm8, %v959_v45, %v963_v1 }
 0x14d   : > { %v501_v55 = vsel %vm419_vm11, %v346_v7, %v460_v27 }
 0x14e   : > { %v542_v62 = vpack.c.bf16 %v501_v55, %v501_v55  ;;  %v2267_v22 = vor.u32 %v2266_v5, %v1154_v51  ;;  %v1160_v7 = vor.u32 %v1159_v32, %v1156_v3  ;;  %v638_v5 = vrot.slane %v3794_v24, 1  ;;  %1393 = vmatpush.bf16.msra.mxu2 %v3536_v61 }
 0x14f   : > { %v4046_v6 = vld [vmem:[#allocation2 + $0x50] sm:$0x1]  ;;  %v4058_v33 = vld [vmem:[#allocation2 + $0x50] sm:$0xe] }
 0x150   : > { %584 = vst.msk [vmem:[#allocation2 + $0x54] sm:$0xf] %vm562_vm2, %v542_v62  ;;  %v4687_v35 = vunpack.c.l.b16 %v4046_v6  ;;  %v695_v49 = vsel %vm689_vm8, %v638_v5, %v651_v46  ;;  %v1172_v44 = vsel %vm689_vm8, %v4004_v50, %v1160_v7  ;;  %v1268_v4 = vunpack.c.l.b16 %v4058_v33  ;;  %v93_v50 = vld [vmem:[%s3759_s8 + $0xa0] sm:$0x3] }
 0x151   : > { %v175_v45 = vunpack.c.l.b16 %v93_v50  ;;  %v4718_v46 = vshrl.u32 %v3796_v25, 16 }
 0x152   : > { %v349_v28 = vpop.f32.mrf.mxu0  ;;  %v2270_v27 = vpack.c.b16 %v4687_v35, %v2269_v58 }
 0x153   : > { %vm420_vm12 = vcmp.ge.f32.partialorder %v349_v28, 0.0  ;;  %v461_v51 = vmul.f32 0.2, %v349_v28  ;;  %v970_v7 = vrot.slane %v4718_v46, 1 }
 0x154   : > { %v2271_v36 = vrot.slane %v2270_v27, 5 }
 0x155   : > { %v502_v55 = vsel %vm420_vm12, %v349_v28, %v461_v51  ;;  %3029 = vmatmul.msk.bf16.gmra.mxu0 %vm221_vm0, %v3515_v21  ;;  %3107 = vmatmul.msk.bf16.vlgmr.msrb.gmra.mxu3 %vm221_vm0, %v1008_v53  ;;  %v4719_v53 = vshll.u32 %v3796_v25, 16 }
 0x156   : > { %v543_v29 = vpack.c.bf16 %v502_v55, %v502_v55  ;;  %v4064_v47 = vsel %vm689_vm8, %v2267_v22, %v2271_v36  ;;  %v4720_v36 = vshrl.u32 %v3847_v52, 16 }
 0x157   : > { %3076 = vmatmul.msk.bf16.gmra.mxu2 %vm221_vm0, %v695_v49  ;;  %3142 = vmatmul.msk.bf16.gmra.mxu1 %vm221_vm0, %v1172_v44  ;;  %v1602_v24 = vld [vmem:[#allocation2 + $0x54] sm:$0x3]  ;;  %v1603_v1 = vld [vmem:[#allocation2 + $0x54] sm:$0xc]  ;;  %v973_v5 = vrot.slane %v4719_v53, 2  ;;  %v978_v44 = vrot.slane %v3835_v34, 6 }
 0x158   : > { %585 = vst.msk [vmem:[#allocation2 + $0x58] sm:$0xf] %vm562_vm2, %v543_v29  ;;  %v1611_v62 = vunpack.c.l.b16 %v1602_v24  ;;  %v1253_v27 = vld [vmem:[#allocation2 + $0x54] sm:$0xe]  ;;  %v666_v55 = vrot.slane %v4720_v36, 6  ;;  %v4721_v29 = vshll.u32 %v3847_v52, 16  ;;  %v1622_v30 = vunpack.c.l.b16 %v1603_v1 }
 0x159   : > { %v196_v52 = vpack.c.b16 %v175_v45, %v175_v45  ;;  %v974_v34 = vor.u32 %v973_v5, %v970_v7 }
 0x15a   : > { %v351_v3 = vpop.f32.mrf.mxu0  ;;  %v1612_v32 = vpack.c.b16 %v1611_v62, %v1268_v4  ;;  %v669_v49 = vrot.slane %v4721_v29, 7  ;;  %v3535_v62 = vld [vmem:[%s4668_s2 + $0x88] sm:$0xff] }
 0x15b   : > { %vm421_vm13 = vcmp.ge.f32.partialorder %v351_v3, 0.0  ;;  %v462_v22 = vmul.f32 0.2, %v351_v3  ;;  %1394 = vmatpush.bf16.msra.mxu2 %v3535_v62 }
 0x15c   : > { %v1614_v58 = vshrl.u32 %v1612_v32, 16  ;;  %v1617_v21 = vshll.u32 %v1612_v32, 16  ;;  %v3541_v32 = vld [vmem:[%s4668_s2 + $0xb8] sm:$0xff] }
 0x15d   : > { %v503_v28 = vsel %vm421_vm13, %v351_v3, %v462_v22  ;;  %v1274_v22 = vunpack.c.l.b16 %v1253_v27  ;;  %1569 = vmatpush.bf16.msra.mxu3 %v3541_v32  ;;  %v657_v27 = vrot.slane %v3828_v19, 2 }
 0x15e   : > { %v544_v51 = vpack.c.bf16 %v503_v28, %v503_v28  ;;  %v1616_v50 = vrot.slane %v1614_v58, 1  ;;  %v1619_v25 = vrot.slane %v1617_v21, 2  ;;  %v670_v28 = vor.u32 %v669_v49, %v666_v55  ;;  %v3534_v58 = vld [vmem:[%s4668_s2 + $0x80] sm:$0xff] }
 0x15f   : > { %v1254_v24 = vld [vmem:[#allocation2 + $0x58] sm:$0x3]  ;;  %v1011_v21 = vsel %vm689_vm8, %v974_v34, %v978_v44  ;;  %v1255_v5 = vld [vmem:[#allocation2 + $0x58] sm:$0xc]  ;;  %1395 = vmatpush.bf16.msra.mxu2 %v3534_v58 }
 0x160   : > { %586 = vst.msk [vmem:[#allocation2 + $0x5c] sm:$0xf] %vm562_vm2, %v544_v51  ;;  %v1275_v3 = vunpack.c.l.b16 %v1254_v24  ;;  %v1620_v45 = vor.u32 %v1619_v25, %v1616_v50  ;;  %v698_v49 = vsel %vm689_vm8, %v657_v27, %v670_v28 }
 0x162   : > { %v354_v61 = vpop.f32.mrf.mxu0  ;;  %v4095_v1 = vpack.c.b16 %v1275_v3, %v1622_v30  ;;  %v4097_v46 = vpack.c.b16 %v1275_v3, %v1274_v22  ;;  %v1287_v30 = vunpack.c.l.b16 %v1255_v5 }
 0x163   : > { %vm422_vm14 = vcmp.ge.f32.partialorder %v354_v61, 0.0  ;;  %v463_v51 = vmul.f32 0.2, %v354_v61 }
 0x164   : > { %v1624_v53 = vrot.slane %v4095_v1, 6  ;;  %v1278_v36 = vshrl.u32 %v4097_v46, 16  ;;  %v1281_v55 = vshll.u32 %v4097_v46, 16  ;;  %v3559_v46 = vld [vmem:[%s4668_s2 + $0x138] sm:$0xff] }
 0x165   : > { %v504_v7 = vsel %vm422_vm14, %v354_v61, %v463_v51  ;;  %3030 = vmatmul.msk.bf16.gmra.mxu0 %vm221_vm0, %v196_v52  ;;  %3108 = vmatmul.msk.bf16.gmra.mxu3 %vm221_vm0, %v1011_v21 }
 0x166   : > { %v545_v29 = vpack.c.bf16 %v504_v7, %v504_v7  ;;  %v1670_v44 = vsel %vm689_vm8, %v1620_v45, %v1624_v53  ;;  %v2364_v50 = vrot.slane %v1278_v36, 1  ;;  %v2365_v25 = vrot.slane %v1281_v55, 2  ;;  %2104 = vmatpush.bf16.msrb.mxu1 %v3559_v46  ;;  %v3557_v46 = vld [vmem:[%s4668_s2 + $0x128] sm:$0xff] }
 0x167   : > { %3077 = vmatmul.msk.bf16.gmra.mxu2 %vm221_vm0, %v698_v49  ;;  %3227 = vmatmul.msk.bf16.vlgmr.msra.gmra.mxu1 %vm221_vm0, %v1670_v44  ;;  %v1604_v19 = vld [vmem:[#allocation2 + $0x5c] sm:$0x7]  ;;  %v1605_v28 = vld [vmem:[#allocation2 + $0x5c] sm:$0x8]  ;;  %v4722_v45 = vshrl.u32 %v3830_v20, 16  ;;  %v4724_v44 = vshrl.u32 %v3894_v43, 16 }
 0x168   : > { %v1256_v24 = vld [vmem:[#allocation2 + $0x5c] sm:$0x3]  ;;  %587 = vst.msk [vmem:[#allocation2 + $0x60] sm:$0xf] %vm562_vm2, %v545_v29  ;;  %v1626_v62 = vunpack.c.l.b16 %v1604_v19  ;;  %v2366_v34 = vor.u32 %v2365_v25, %v2364_v50  ;;  %v1257_v7 = vld [vmem:[#allocation2 + $0x5c] sm:$0xc] }
 0x169   : > { %v1288_v3 = vunpack.c.l.b16 %v1256_v24  ;;  %v985_v53 = vrot.slane %v4722_v45, 2  ;;  %v4723_v29 = vshll.u32 %v3830_v20, 16  ;;  %v685_v19 = vrot.slane %v4724_v44, 7  ;;  %v3540_v20 = vld [vmem:[%s4668_s2 + $0xb0] sm:$0xff] }
 0x16a   : > { %v356_v32 = vpop.f32.mrf.mxu0  ;;  %v1627_v22 = vpack.c.b16 %v1626_v62, %v1287_v30  ;;  %v2593_v45 = vrot.slane %v4095_v1, 2  ;;  %1570 = vmatpush.bf16.msra.mxu3 %v3540_v20  ;;  %v676_v1 = vrot.slane %v3866_v40, 3 }
 0x16b   : > { %v4118_v52 = vpack.c.b16 %v1288_v3, %v1287_v30  ;;  %vm423_vm15 = vcmp.ge.f32.partialorder %v356_v32, 0.0  ;;  %v464_v61 = vmul.f32 0.2, %v356_v32  ;;  %v988_v49 = vrot.slane %v4723_v29, 3 }
 0x16c   : > { %v1629_v51 = vshrl.u32 %v1627_v22, 16  ;;  %v1632_v58 = vshll.u32 %v1627_v22, 16  ;;  %v993_v30 = vrot.slane %v3872_v56, 7  ;;  %v1637_v3 = vunpack.c.l.b16 %v1605_v28 }
 0x16d   : > { %v2367_v21 = vrot.slane %v4118_v52, 6  ;;  %v505_v27 = vsel %vm423_vm15, %v356_v32, %v464_v61  ;;  %v989_v44 = vor.u32 %v988_v49, %v985_v53  ;;  %v4725_v28 = vshll.u32 %v3894_v43, 16 }
 0x16e   : > { %v546_v5 = vpack.c.bf16 %v505_v27, %v505_v27  ;;  %v2594_v24 = vrot.slane %v1629_v51, 6  ;;  %v2595_v50 = vrot.slane %v1632_v58, 7  ;;  %v1631_v22 = vrot.slane %v1629_v51, 2 }
 0x16f   : > { %v1258_v62 = vld [vmem:[#allocation2 + $0x60] sm:$0x7]  ;;  %v4129_v25 = vsel %vm689_vm8, %v2366_v34, %v2367_v21  ;;  %v1634_v61 = vrot.slane %v1632_v58, 3  ;;  %v1293_v27 = vunpack.c.l.b16 %v1257_v7  ;;  %v688_v35 = vor.u32 %v4725_v28, %v685_v19  ;;  %v1259_v43 = vld [vmem:[#allocation2 + $0x60] sm:$0x8] }
 0x170   : > { %588 = vst.msk [vmem:[#allocation2 + $0x64] sm:$0xf] %vm562_vm2, %v546_v5  ;;  %v1294_v32 = vunpack.c.l.b16 %v1258_v62  ;;  %v2596_v29 = vor.u32 %v2595_v50, %v2594_v24  ;;  %v1014_v7 = vsel %vm689_vm8, %v989_v44, %v993_v30 }
 0x171   : > { %v1635_v5 = vor.u32 %v1634_v61, %v1631_v22  ;;  %v1306_v22 = vunpack.c.l.b16 %v1259_v43  ;;  %v1283_v43 = vrot.slane %v1281_v55, 6 }
 0x172   : > { %v359_v56 = vpop.f32.mrf.mxu0  ;;  %v4138_v34 = vpack.c.b16 %v1294_v32, %v1637_v3  ;;  %v4140_v21 = vpack.c.b16 %v1294_v32, %v1293_v27  ;;  %v4143_v58 = vsel %vm689_vm8, %v2593_v45, %v2596_v29  ;;  %v701_v3 = vsel %vm689_vm8, %v676_v1, %v688_v35  ;;  %v1252_v32 = vld [vmem:[#allocation2 + $0x54] sm:$0x1] }
 0x173   : > { %vm424_vm1 = vcmp.ge.f32.partialorder %v359_v56, 0.0  ;;  %v465_v51 = vmul.f32 0.2, %v359_v56  ;;  %v1269_v28 = vunpack.c.l.b16 %v1252_v32 }
 0x174   : > { %v1639_v53 = vrot.slane %v4138_v34, 7  ;;  %v1297_v19 = vshrl.u32 %v4140_v21, 16  ;;  %v1300_v24 = vshll.u32 %v4140_v21, 16 }
 0x175   : > { %v506_v49 = vsel %vm424_vm1, %v359_v56, %v465_v51  ;;  %3109 = vmatmul.msk.bf16.gmra.mxu3 %vm221_vm0, %v1014_v7 }
 0x176   : > { %v547_v62 = vpack.c.bf16 %v506_v49, %v506_v49  ;;  %v1673_v50 = vsel %vm689_vm8, %v1635_v5, %v1639_v53  ;;  %v2368_v27 = vrot.slane %v1297_v19, 2  ;;  %v2369_v35 = vrot.slane %v1300_v24, 3 }
 0x177   : > { %3078 = vmatmul.msk.bf16.gmra.mxu2 %vm221_vm0, %v701_v3  ;;  %3228 = vmatmul.msk.bf16.gmra.mxu1 %vm221_vm0, %v1673_v50  ;;  %v1606_v40 = vld [vmem:[#allocation2 + $0x64] sm:$0xf]  ;;  %v1280_v49 = vrot.slane %v1278_v36, 5  ;;  %v4726_v50 = vshrl.u32 %v3868_v42, 16  ;;  %v1270_v36 = vpack.c.b16 %v1269_v28, %v1268_v4  ;;  %v2597_v4 = vrot.slane %v4138_v34, 3 }
 0x178   : > { %v1260_v30 = vld [vmem:[#allocation2 + $0x64] sm:$0x7]  ;;  %589 = vst.msk [vmem:[#allocation2 + $0x68] sm:$0xf] %vm562_vm2, %v547_v62  ;;  %v1641_v61 = vunpack.c.l.b16 %v1606_v40  ;;  %v2370_v51 = vor.u32 %v2369_v35, %v2368_v27  ;;  %v1261_v62 = vld [vmem:[#allocation2 + $0x64] sm:$0x8] }
 0x179   : > { %v1307_v20 = vunpack.c.l.b16 %v1260_v30  ;;  %v1000_v40 = vrot.slane %v4726_v50, 3  ;;  %v4727_v30 = vshll.u32 %v3868_v42, 16  ;;  %v1284_v33 = vor.u32 %v1283_v43, %v1280_v49 }
 0x17a   : > { %v361_v45 = vpop.f32.mrf.mxu0  ;;  %v1642_v29 = vpack.c.b16 %v1641_v61, %v1306_v22  ;;  %v1005_v61 = vpack.c.b16 %v3884_v26, %v3884_v26  ;;  %v3539_v26 = vld [vmem:[%s4668_s2 + $0xa8] sm:$0xff] }
 0x17b   : > { %v4160_v56 = vpack.c.b16 %v1307_v20, %v1306_v22  ;;  %vm425_vm3 = vcmp.ge.f32.partialorder %v361_v45, 0.0  ;;  %v466_v44 = vmul.f32 0.2, %v361_v45  ;;  %v1003_v32 = vrot.slane %v4727_v30, 4  ;;  %1571 = vmatpush.bf16.msra.mxu3 %v3539_v26 }
 0x17c   : > { %v1644_v7 = vshrl.u32 %v1642_v29, 16  ;;  %v1647_v1 = vshll.u32 %v1642_v29, 16 }
 0x17d   : > { %v2371_v5 = vrot.slane %v4160_v56, 7  ;;  %v507_v53 = vsel %vm425_vm3, %v361_v45, %v466_v44  ;;  %v1312_v45 = vunpack.c.l.b16 %v1261_v62  ;;  %v1004_v28 = vor.u32 %v1003_v32, %v1000_v40 }
 0x17e   : > { %v548_v3 = vpack.c.bf16 %v507_v53, %v507_v53  ;;  %v2598_v55 = vrot.slane %v1644_v7, 7  ;;  %v1646_v27 = vrot.slane %v1644_v7, 3  ;;  %v1649_v35 = vrot.slane %v1647_v1, 4 }
 0x17f   : > { %v4172_v22 = vsel %vm689_vm8, %v2370_v51, %v2371_v5  ;;  %v4178_v20 = vld [vmem:[#allocation2 + $0x68] sm:$0xf]  ;;  %v1271_v7 = vrot.slane %v1270_v36, 1  ;;  %v1017_v49 = vsel %vm689_vm8, %v1004_v28, %v1005_v61  ;;  %v1299_v28 = vrot.slane %v1297_v19, 6 }
 0x180   : > { %590 = vst.msk [vmem:[#allocation2 + $0x6c] sm:$0xf] %vm562_vm2, %v548_v3  ;;  %v1313_v42 = vunpack.c.l.b16 %v4178_v20  ;;  %v2599_v29 = vor.u32 %v2598_v55, %v1647_v1  ;;  %v3558_v3 = vld [vmem:[%s4668_s2 + $0x130] sm:$0xff]  ;;  %v1650_v34 = vor.u32 %v1649_v35, %v1646_v27  ;;  %v1290_v19 = vrot.slane %v4118_v52, 2  ;;  %v3551_v52 = vld [vmem:[%s4668_s2 + $0xf8] sm:$0xff] }
 0x181   : > { %v1337_v40 = vsel %vm689_vm8, %v1271_v7, %v1284_v33  ;;  %2105 = vmatpush.bf16.msrb.mxu1 %v3558_v3  ;;  %v3556_v33 = vld [vmem:[%s4668_s2 + $0x120] sm:$0xff]  ;;  %1880 = vmatpush.bf16.msrb.mxu2 %v3551_v52 }
 0x182   : > { %v364_v44 = vpop.f32.mrf.mxu0  ;;  %v1651_v51 = vpack.c.b16 %v1313_v42, %v1313_v42  ;;  %v4189_v5 = vpack.c.b16 %v1313_v42, %v1312_v45  ;;  %v4195_v62 = vsel %vm689_vm8, %v2597_v4, %v2599_v29 }
 0x183   : > { %vm426_vm4 = vcmp.ge.f32.partialorder %v364_v44, 0.0  ;;  %v467_v53 = vmul.f32 0.2, %v364_v44 }
 0x184   : > { %v1316_v1 = vshrl.u32 %v4189_v5, 16  ;;  %v1319_v43 = vshll.u32 %v4189_v5, 16  ;;  %v1676_v32 = vsel %vm689_vm8, %v1650_v34, %v1651_v51  ;;  %v1302_v51 = vrot.slane %v1300_v24, 7  ;;  %v3548_v5 = vld [vmem:[%s4668_s2 + $0xe0] sm:$0xff] }
 0x185   : > { %v508_v50 = vsel %vm426_vm4, %v364_v44, %v467_v53  ;;  %3110 = vmatmul.msk.bf16.gmra.mxu3 %vm221_vm0, %v1017_v49  ;;  %2106 = vmatpush.bf16.msrb.mxu1 %v3557_v46  ;;  %v3538_v49 = vld [vmem:[%s4668_s2 + $0xa0] sm:$0xff] }
 0x186   : > { %v549_v30 = vpack.c.bf16 %v508_v50, %v508_v50  ;;  %v2372_v36 = vrot.slane %v1316_v1, 3  ;;  %v2373_v61 = vrot.slane %v1319_v43, 4  ;;  %v1303_v50 = vor.u32 %v1302_v51, %v1299_v28  ;;  %1572 = vmatpush.bf16.msra.mxu3 %v3538_v49 }
 0x187   : > { %3167 = vmatmul.msk.bf16.vlgmr.msra.gmra.mxu2 %vm221_vm0, %v1337_v40  ;;  %3229 = vmatmul.msk.bf16.gmra.mxu1 %vm221_vm0, %v1676_v32  ;;  %v4212_v55 = vld [vmem:[#allocation2 + $0x6c] sm:$0xf] }
 0x188   : > { %591 = vst.msk [vmem:[#allocation2 + $0x70] sm:$0xf] %vm562_vm2, %v549_v30  ;;  %v2376_v42 = vunpack.c.l.b16 %v4212_v55  ;;  %v2374_v27 = vor.u32 %v2373_v61, %v2372_v36  ;;  %v3201_v53 = vld [vmem:[#allocation2 + $0x6c] sm:$0xf] }
 0x189   : > { %2107 = vmatpush.bf16.msrb.mxu1 %v3556_v33 }
 0x18a   : > { %v366_v35 = vpop.f32.mrf.mxu0  ;;  %v2377_v26 = vpack.c.b16 %v2376_v42, %v2376_v42 }
 0x18b   : > { %vm427_vm5 = vcmp.ge.f32.partialorder %v366_v35, 0.0  ;;  %v468_v45 = vmul.f32 0.2, %v366_v35 }
 0x18c   : > { %v4220_v4 = vsel %vm689_vm8, %v2374_v27, %v2377_v26  ;;  %v1340_v27 = vsel %vm689_vm8, %v1290_v19, %v1303_v50 }
 0x18d   : > { %v509_v29 = vsel %vm427_vm5, %v366_v35, %v468_v45 }
 0x18e   : > { %v550_v44 = vpack.c.bf16 %v509_v29, %v509_v29 }
 0x18f   : > { %v3542_v7 = vld [vmem:[#allocation2 + $0x6c] sm:$0x10]  ;;  %v1609_v21 = vld [vmem:[#allocation2 + $0x70] sm:$0xe] }
 0x190   : > { %592 = vst.msk [vmem:[#allocation2 + $0x74] sm:$0xf] %vm562_vm2, %v550_v44  ;;  %v3202_v3 = vor.u32 %v3542_v7, %v3201_v53  ;;  %v1264_v46 = vld [vmem:[#allocation2 + $0x70] sm:$0xf]  ;;  %v1665_v45 = vunpack.c.l.b16 %v1609_v21  ;;  %v1318_v21 = vrot.slane %v1316_v1, 7 }
 0x191   : > { %v1324_v44 = vunpack.c.l.b16 %v1264_v46 }
 0x192   : > { %v369_v34 = vpop.f32.mrf.mxu0  ;;  %v1658_v40 = vshrl.u32 %v3202_v3, 16  ;;  %v1660_v30 = vshll.u32 %v3202_v3, 16 }
 0x193   : > { %vm428_vm6 = vcmp.ge.f32.partialorder %v369_v34, 0.0  ;;  %v469_v32 = vmul.f32 0.2, %v369_v34 }
 0x194   : > { %v2600_v24 = vrot.slane %v1658_v40, 4  ;;  %v2601_v36 = vrot.slane %v1660_v30, 5  ;;  %v1662_v29 = vrot.slane %v1660_v30, 1 }
 0x195   : > { %v510_v61 = vsel %vm428_vm6, %v369_v34, %v469_v32  ;;  %v3550_v32 = vld [vmem:[%s4668_s2 + $0xf0] sm:$0xff] }
 0x196   : > { %v551_v42 = vpack.c.bf16 %v510_v61, %v510_v61  ;;  %v2602_v35 = vor.u32 %v2601_v36, %v2600_v24  ;;  %v1663_v49 = vor.u32 %v1662_v29, %v1658_v40  ;;  %1881 = vmatpush.bf16.msrb.mxu2 %v3550_v32  ;;  %v3555_v36 = vld [vmem:[%s4668_s2 + $0x118] sm:$0xff]  ;;  %v3549_v61 = vld [vmem:[%s4668_s2 + $0xe8] sm:$0xff] }
 0x197   : > { %3168 = vmatmul.msk.bf16.gmra.mxu2 %vm221_vm0, %v1340_v27  ;;  %v1265_v26 = vld [vmem:[#allocation2 + $0x74] sm:$0x1]  ;;  %v4251_v24 = vld [vmem:[#allocation2 + $0x74] sm:$0xe]  ;;  %v1321_v27 = vor.u32 %v1319_v43, %v1318_v21  ;;  %1988 = vmatpush.bf16.msrb.mxu3 %v3555_v36 }
 0x198   : > { %593 = vst.msk [vmem:[#allocation2 + $0x78] sm:$0xf] %vm562_vm2, %v551_v42  ;;  %v1325_v33 = vunpack.c.l.b16 %v1265_v26  ;;  %v4239_v28 = vsel %vm689_vm8, %v4178_v20, %v2602_v35  ;;  %v4688_v26 = vunpack.c.l.b16 %v4251_v24 }
 0x19a   : > { %v371_v51 = vpop.f32.mrf.mxu0  ;;  %v1666_v53 = vpack.c.b16 %v1325_v33, %v1665_v45  ;;  %v4241_v7 = vpack.c.b16 %v1325_v33, %v1324_v44  ;;  %v4266_v33 = vpop.f32.mrf.mxu1  ;;  %1882 = vmatpush.bf16.msrb.mxu2 %v3549_v61  ;;  %v1309_v44 = vrot.slane %v4160_v56, 3 }
 0x19b   : > { %vm429_vm7 = vcmp.ge.f32.partialorder %v371_v51, 0.0  ;;  %v470_v3 = vmul.f32 0.2, %v371_v51 }
 0x19c   : > { %v1667_v34 = vrot.slane %v1666_v53, 5  ;;  %v1331_v50 = vshll.u32 %v4241_v7, 16  ;;  %v1328_v40 = vshrl.u32 %v4241_v7, 16 }
 0x19d   : > { %v511_v30 = vsel %vm429_vm7, %v371_v51, %v470_v3  ;;  %v1343_v3 = vsel %vm689_vm8, %v1309_v44, %v1321_v27 }
 0x19e   : > { %v552_v19 = vpack.c.bf16 %v511_v30, %v511_v30  ;;  %v1679_v20 = vsel %vm689_vm8, %v1663_v49, %v1667_v34  ;;  %v2378_v46 = vrot.slane %v1331_v50, 1  ;;  %1883 = vmatpush.bf16.msrb.mxu2 %v3548_v5  ;;  %v1330_v5 = vrot.slane %v1328_v40, 4 }
 0x19f   : > { %3230 = vmatmul.msk.bf16.gmra.mxu1 %vm221_vm0, %v1679_v20  ;;  %v2592_v42 = vld [vmem:[#allocation2 + $0x78] sm:$0x3] }
 0x1a0   : > { %594 = vst.msk [vmem:[#allocation2 + $0x7c] sm:$0xf] %vm562_vm2, %v552_v19  ;;  %v4263_v35 = vor.u32 %v2378_v46, %v1328_v40  ;;  %v2605_v45 = vunpack.c.l.b16 %v2592_v42  ;;  %v1425_v7 = vld [vmem:[#allocation2 + $0x78] sm:$0xe]  ;;  %v2603_v46 = vrot.slane %v1666_v53, 1 }
 0x1a1   : > { %v1442_v56 = vunpack.c.l.b16 %v1425_v7 }
 0x1a2   : > { %v374_v1 = vpop.f32.mrf.mxu0  ;;  %v2606_v52 = vpack.c.b16 %v2605_v45, %v4688_v26 }
 0x1a3   : > { %vm430_vm9 = vcmp.ge.f32.partialorder %v374_v1, 0.0  ;;  %v471_v29 = vmul.f32 0.2, %v374_v1 }
 0x1a4   : > { %v2608_v49 = vshrl.u32 %v2606_v52, 16  ;;  %v2611_v34 = vshll.u32 %v2606_v52, 16  ;;  %v4287_v52 = vpop.f32.mrf.mxu1 }
 0x1a5   : > { %v512_v51 = vsel %vm430_vm9, %v374_v1, %v471_v29 }
 0x1a6   : > { %v553_v43 = vpack.c.bf16 %v512_v51, %v512_v51  ;;  %v2610_v19 = vrot.slane %v2608_v49, 5  ;;  %v2613_v20 = vrot.slane %v2611_v34, 6 }
 0x1a7   : > { %3169 = vmatmul.msk.bf16.gmra.mxu2 %vm221_vm0, %v1343_v3  ;;  %v4276_v30 = vld [vmem:[#allocation2 + $0x7c] sm:$0x3]  ;;  %v1427_v27 = vld [vmem:[#allocation2 + $0x7c] sm:$0xc] }
 0x1a8   : > { %595 = vst.msk [vmem:[#allocation2 + $0x80] sm:$0xf] %vm562_vm2, %v553_v43  ;;  %v4689_v32 = vunpack.c.l.b16 %v4276_v30  ;;  %v2614_v42 = vor.u32 %v2613_v20, %v2610_v19  ;;  %v1333_v43 = vrot.slane %v1331_v50, 5  ;;  %v1455_v53 = vunpack.c.l.b16 %v1427_v27 }
 0x1aa   : > { %v376_v21 = vpop.f32.mrf.mxu0  ;;  %v4280_v36 = vpop.f32.mrf.mxu2  ;;  %v1444_v61 = vpack.c.b16 %v4689_v32, %v1442_v56  ;;  %v4285_v44 = vsel %vm689_vm8, %v2603_v46, %v2614_v42  ;;  %v1334_v50 = vor.u32 %v1333_v43, %v1330_v5 }
 0x1ab   : > { %vm431_vm10 = vcmp.ge.f32.partialorder %v376_v21, 0.0  ;;  %v472_v1 = vmul.f32 0.2, %v376_v21 }
 0x1ac   : > { %v1446_v45 = vshrl.u32 %v1444_v61, 16  ;;  %v1449_v29 = vshll.u32 %v1444_v61, 16  ;;  %v3554_v61 = vld [vmem:[%s4668_s2 + $0x110] sm:$0xff]  ;;  %v1346_v26 = vsel %vm689_vm8, %v4212_v55, %v1334_v50  ;;  %v4303_v43 = vpop.f32.mrf.mxu1  ;;  %v1758_v50 = vld [vmem:[#allocation2 + $0x78] sm:$0xc] }
 0x1ad   : > { %v513_v51 = vsel %vm431_vm10, %v376_v21, %v472_v1  ;;  %1989 = vmatpush.bf16.msrb.mxu3 %v3554_v61 }
 0x1ae   : > { %v554_v7 = vpack.c.bf16 %v513_v51, %v513_v51  ;;  %v1448_v34 = vrot.slane %v1446_v45, 1  ;;  %v1451_v56 = vrot.slane %v1449_v29, 2 }
 0x1af   : > { %3315 = vmatmul.msk.bf16.vlgmr.msrb.gmra.mxu1 %vm221_vm0, %v3967_v60  ;;  %v1428_v3 = vld [vmem:[#allocation2 + $0x80] sm:$0x3] }
 0x1b0   : > { %v1759_v49 = vld [vmem:[#allocation2 + $0x80] sm:$0x7]  ;;  %596 = vst.msk [vmem:[#allocation2 + $0x84] sm:$0xf] %vm562_vm2, %v554_v7  ;;  %v1456_v19 = vunpack.c.l.b16 %v1428_v3  ;;  %v1452_v1 = vor.u32 %v1451_v56, %v1448_v34  ;;  %v1760_v3 = vld [vmem:[#allocation2 + $0x80] sm:$0x8] }
 0x1b1   : > { %v1771_v20 = vunpack.c.l.b16 %v1759_v49  ;;  %v1429_v7 = vld [vmem:[#allocation2 + $0x80] sm:$0xc]  ;;  %v1782_v61 = vunpack.c.l.b16 %v1760_v3 }
 0x1b2   : > { %v379_v21 = vpop.f32.mrf.mxu0  ;;  %v4295_v46 = vpop.f32.mrf.mxu2  ;;  %v4297_v40 = vpack.c.b16 %v1456_v19, %v1455_v53  ;;  %v1461_v19 = vunpack.c.l.b16 %v1429_v7 }
 0x1b3   : > { %v1772_v60 = vpack.c.b16 %v1771_v20, %v1455_v53  ;;  %vm432_vm11 = vcmp.ge.f32.partialorder %v379_v21, 0.0  ;;  %v473_v42 = vmul.f32 0.2, %v379_v21 }
 0x1b4   : > { %v1458_v27 = vrot.slane %v4297_v40, 6 }
 0x1b5   : > { %v1774_v45 = vshrl.u32 %v1772_v60, 16  ;;  %v1777_v29 = vshll.u32 %v1772_v60, 16  ;;  %v514_v51 = vsel %vm432_vm11, %v379_v21, %v473_v42 }
 0x1b6   : > { %v555_v49 = vpack.c.bf16 %v514_v51, %v514_v51  ;;  %v1514_v5 = vsel %vm689_vm8, %v1452_v1, %v1458_v27 }
 0x1b7   : > { %3170 = vmatmul.msk.bf16.gmra.mxu2 %vm221_vm0, %v1346_v26  ;;  %3195 = vmatmul.msk.bf16.vlgmr.msra.gmra.mxu3 %vm221_vm0, %v1514_v5  ;;  %v1430_v53 = vld [vmem:[#allocation2 + $0x84] sm:$0x7]  ;;  %v2706_v34 = vrot.slane %v1774_v45, 2  ;;  %v2707_v56 = vrot.slane %v1777_v29, 3  ;;  %v1431_v8 = vld [vmem:[#allocation2 + $0x84] sm:$0x8] }
 0x1b8   : > { %597 = vst.msk [vmem:[#allocation2 + $0x88] sm:$0xf] %vm562_vm2, %v555_v49  ;;  %v1462_v20 = vunpack.c.l.b16 %v1430_v53  ;;  %v1767_v49 = vunpack.c.l.b16 %v1758_v50  ;;  %v1776_v3 = vrot.slane %v1774_v45, 6  ;;  %v1474_v18 = vunpack.c.l.b16 %v1431_v8  ;;  %v3553_v45 = vld [vmem:[%s4668_s2 + $0x108] sm:$0xff] }
 0x1b9   : > { %v2708_v21 = vor.u32 %v2707_v56, %v2706_v34  ;;  %v1779_v34 = vrot.slane %v1777_v29, 7  ;;  %v4728_v50 = vunpack.c.l.b16 %v4276_v30  ;;  %1990 = vmatpush.bf16.msrb.mxu3 %v3553_v45 }
 0x1ba   : > { %v381_v60 = vpop.f32.mrf.mxu0  ;;  %v4308_v42 = vpop.f32.mrf.mxu2  ;;  %v1463_v55 = vpack.c.b16 %v1462_v20, %v1461_v19  ;;  %v4310_v1 = vpack.c.b16 %v1462_v20, %v1782_v61 }
 0x1bb   : > { %vm433_vm12 = vcmp.ge.f32.partialorder %v381_v60, 0.0  ;;  %v474_v26 = vmul.f32 0.2, %v381_v60 }
 0x1bc   : > { %v1465_v27 = vshrl.u32 %v1463_v55, 16  ;;  %v1468_v51 = vshll.u32 %v1463_v55, 16  ;;  %v2709_v5 = vrot.slane %v4310_v1, 7  ;;  %v1784_v12 = vrot.slane %v4310_v1, 3 }
 0x1bd   : > { %v515_v32 = vsel %vm433_vm12, %v381_v60, %v474_v26 }
 0x1be   : > { %v556_v7 = vpack.c.bf16 %v515_v32, %v515_v32  ;;  %v2479_v53 = vrot.slane %v1465_v27, 6  ;;  %v1467_v19 = vrot.slane %v1465_v27, 2  ;;  %v2480_v20 = vrot.slane %v1468_v51, 7 }
 0x1bf   : > { %3316 = vmatmul.msk.bf16.gmra.mxu1 %vm221_vm0, %v3998_v59  ;;  %v1432_v56 = vld [vmem:[#allocation2 + $0x88] sm:$0x7]  ;;  %v4316_v61 = vsel %vm689_vm8, %v2708_v21, %v2709_v5  ;;  %v1470_v55 = vrot.slane %v1468_v51, 3  ;;  %v1768_v32 = vpack.c.b16 %v4728_v50, %v1767_v49  ;;  %v4324_v59 = vpop.f32.mrf.mxu1  ;;  %v3572_v21 = vld [vmem:[%s4668_s2 + $0x198] sm:$0xff]  ;;  %v2478_v27 = vrot.slane %v4297_v40, 2 }
 0x1c0   : > { %598 = vst.msk [vmem:[#allocation2 + $0x8c] sm:$0xf] %vm562_vm2, %v556_v7  ;;  %v1475_v60 = vunpack.c.l.b16 %v1432_v56  ;;  %v1761_v26 = vld [vmem:[#allocation2 + $0x88] sm:$0xf]  ;;  %v2481_v51 = vor.u32 %v2480_v20, %v2479_v53  ;;  %v1780_v49 = vor.u32 %v1779_v34, %v1776_v3  ;;  %2443 = vmatpush.bf16.msra.mxu1 %v3572_v21  ;;  %v3571_v3 = vld [vmem:[%s4668_s2 + $0x190] sm:$0xff] }
 0x1c1   : > { %v1786_v29 = vunpack.c.l.b16 %v1761_v26  ;;  %v1471_v26 = vor.u32 %v1470_v55, %v1467_v19  ;;  %v1769_v40 = vrot.slane %v1768_v32, 2  ;;  %v1433_v20 = vld [vmem:[#allocation2 + $0x88] sm:$0x8] }
 0x1c2   : > { %v384_v8 = vpop.f32.mrf.mxu0  ;;  %v4330_v5 = vpop.f32.mrf.mxu2  ;;  %v4332_v30 = vpack.c.b16 %v1475_v60, %v1474_v18  ;;  %v4337_v50 = vsel %vm689_vm8, %v2478_v27, %v2481_v51  ;;  %v1480_v21 = vunpack.c.l.b16 %v1433_v20  ;;  %v2021_v51 = vld [vmem:[#allocation2 + $0x4c] sm:$0xf] }
 0x1c3   : > { %vm434_vm13 = vcmp.ge.f32.partialorder %v384_v8, 0.0  ;;  %v475_v7 = vmul.f32 0.2, %v384_v8  ;;  %v4334_v56 = vpack.c.b16 %v1786_v29, %v1474_v18  ;;  %v1825_v45 = vsel %vm689_vm8, %v1769_v40, %v1780_v49 }
 0x1c4   : > { %v1477_v17 = vrot.slane %v4332_v30, 7  ;;  %2444 = vmatpush.bf16.msra.mxu1 %v3571_v3  ;;  %v2036_v20 = vunpack.c.l.b16 %v2021_v51  ;;  %v3569_v3 = vld [vmem:[%s4668_s2 + $0x180] sm:$0xff] }
 0x1c5   : > { %v516_v53 = vsel %vm434_vm13, %v384_v8, %v475_v7  ;;  %v1789_v16 = vshrl.u32 %v4334_v56, 16  ;;  %v1792_v60 = vshll.u32 %v4334_v56, 16  ;;  %v3552_v51 = vld [vmem:[%s4668_s2 + $0x100] sm:$0xff] }
 0x1c6   : > { %v557_v18 = vpack.c.bf16 %v516_v53, %v516_v53  ;;  %v1517_v34 = vsel %vm689_vm8, %v1471_v26, %v1477_v17  ;;  %v3570_v17 = vld [vmem:[%s4668_s2 + $0x188] sm:$0xff]  ;;  %1991 = vmatpush.bf16.msrb.mxu3 %v3552_v51 }
 0x1c7   : > { %3196 = vmatmul.msk.bf16.gmra.mxu3 %vm221_vm0, %v1517_v34  ;;  %3259 = vmatmul.msk.bf16.vlgmr.msrb.gmra.mxu2 %vm221_vm0, %v1825_v45  ;;  %v4349_v19 = vld [vmem:[#allocation2 + $0x8c] sm:$0xf]  ;;  %v2710_v55 = vrot.slane %v1789_v16, 3  ;;  %v2711_v32 = vrot.slane %v1792_v60, 4  ;;  %v4358_v40 = vpop.f32.mrf.mxu1  ;;  %v1791_v14 = vrot.slane %v1789_v16, 7 }
 0x1c8   : > { %599 = vst.msk [vmem:[#allocation2 + $0x90] sm:$0xf] %vm562_vm2, %v557_v18  ;;  %v4352_v29 = vpop.f32.mrf.mxu3  ;;  %v1481_v27 = vunpack.c.l.b16 %v4349_v19  ;;  %2445 = vmatpush.bf16.msra.mxu1 %v3570_v17  ;;  %v2482_v17 = vrot.slane %v4332_v30, 3 }
 0x1c9   : > { %v2712_v8 = vor.u32 %v2711_v32, %v2710_v55 }
 0x1ca   : > { %v386_v49 = vpop.f32.mrf.mxu0  ;;  %v920_v7 = vpop.f32.mrf.mxu2  ;;  %v1482_v56 = vpack.c.b16 %v1481_v27, %v1480_v21  ;;  %v2713_v26 = vpack.c.b16 %v1481_v27, %v1481_v27  ;;  %v4729_v21 = vunpack.c.l.b16 %v4046_v6 }
 0x1cb   : > { %vm435_vm14 = vcmp.ge.f32.partialorder %v386_v49, 0.0  ;;  %v476_v53 = vmul.f32 0.2, %v386_v49  ;;  %v921_v18 = vadd.f32 %v920_v7, %v4266_v33 }
 0x1cc   : > { %v1484_v34 = vshrl.u32 %v1482_v56, 16  ;;  %v1487_v45 = vshll.u32 %v1482_v56, 16  ;;  %v4365_v55 = vsel %vm689_vm8, %v2712_v8, %v2713_v26  ;;  %v2038_v27 = vpack.c.b16 %v4729_v21, %v2036_v20  ;;  %2446 = vmatpush.bf16.msra.mxu1 %v3569_v3 }
 0x1cd   : > { %v517_v32 = vsel %vm435_vm14, %v386_v49, %v476_v53 }
 0x1ce   : > { %v558_v15 = vpack.c.bf16 %v517_v32, %v517_v32  ;;  %v2483_v13 = vrot.slane %v1484_v34, 7  ;;  %v1486_v6 = vrot.slane %v1484_v34, 3  ;;  %v1489_v49 = vrot.slane %v1487_v45, 4 }
 0x1cf   : > { %3317 = vmatmul.msk.bf16.gmra.mxu1 %vm221_vm0, %v4028_v31  ;;  %v4371_v33 = vld [vmem:[#allocation2 + $0x90] sm:$0xf]  ;;  %v2040_v56 = vshrl.u32 %v2038_v27, 16  ;;  %v2043_v31 = vshll.u32 %v2038_v27, 16  ;;  %v1794_v32 = vor.u32 %v1792_v60, %v1791_v14  ;;  %v4386_v11 = vpop.f32.mrf.mxu1 }
 0x1d0   : > { %600 = vst.msk [vmem:[#allocation2 + $0x94] sm:$0xf] %vm562_vm2, %v558_v15  ;;  %v4378_v8 = vpop.f32.mrf.mxu3  ;;  %v1492_v16 = vunpack.c.l.b16 %v4371_v33  ;;  %v2484_v7 = vor.u32 %v2483_v13, %v1487_v45  ;;  %v1490_v34 = vor.u32 %v1489_v49, %v1486_v6  ;;  %v3233_v60 = vld [vmem:[#allocation2 + $0x90] sm:$0xf] }
 0x1d1   : > { %v2042_v45 = vrot.slane %v2040_v56, 4  ;;  %v2045_v3 = vrot.slane %v2043_v31, 5  ;;  %v1828_v14 = vsel %vm689_vm8, %v1784_v12, %v1794_v32 }
 0x1d2   : > { %v389_v26 = vpop.f32.mrf.mxu0  ;;  %v922_v53 = vpop.f32.mrf.mxu2  ;;  %v1493_v20 = vpack.c.b16 %v1492_v16, %v1492_v16  ;;  %v4382_v21 = vsel %vm689_vm8, %v2482_v17, %v2484_v7  ;;  %v3564_v16 = vld [vmem:[%s4668_s2 + $0x158] sm:$0xff] }
 0x1d3   : > { %vm436_vm15 = vcmp.ge.f32.partialorder %v389_v26, 0.0  ;;  %v477_v15 = vmul.f32 0.2, %v389_v26  ;;  %v923_v30 = vadd.f32 %v922_v53, %v4287_v52  ;;  %v2046_v49 = vor.u32 %v2045_v3, %v2042_v45  ;;  %2220 = vmatpush.bf16.msra.mxu2 %v3564_v16 }
 0x1d4   : > { %v1520_v51 = vsel %vm689_vm8, %v1490_v34, %v1493_v20  ;;  %v3607_v34 = vld [vmem:[#allocation2 + $0x48] sm:$0xf] }
 0x1d5   : > { %v518_v13 = vsel %vm436_vm15, %v389_v26, %v477_v15  ;;  %vm2899_vm15 = vcmask 0  }
 0x1d6   : > { %v559_v27 = vpack.c.bf16 %v518_v13, %v518_v13  ;;  %v2058_v13 = vsel %vm689_vm8, %v3607_v34, %v2046_v49 }
 0x1d7   : > { %3197 = vmatmul.msk.bf16.gmra.mxu3 %vm221_vm0, %v1520_v51  ;;  %3260 = vmatmul.msk.bf16.gmra.mxu2 %vm221_vm0, %v1828_v14  ;;  %v3547_v17 = vld [vmem:[#allocation2 + $0x90] sm:$0x10]  ;;  %v1764_v3 = vld [vmem:[#allocation2 + $0x94] sm:$0xe] }
 0x1d8   : > { %601 = vst.msk [vmem:[#allocation2 + $0x98] sm:$0xf] %vm562_vm2, %v559_v27  ;;  %v1068_v52 = vpop.f32.mrf.mxu3  ;;  %v3234_v1 = vor.u32 %v3547_v17, %v3233_v60  ;;  %v1436_v45 = vld [vmem:[#allocation2 + $0x94] sm:$0xf]  ;;  %v3568_v17 = vld [vmem:[%s4668_s2 + $0x178] sm:$0xff]  ;;  %v1809_v49 = vunpack.c.l.b16 %v1764_v3 }
 0x1d9   : > { %v1088_v6 = vadd.f32 %v1068_v52, %v921_v18  ;;  %v3563_v18 = vld [vmem:[%s4668_s2 + $0x150] sm:$0xff]  ;;  %2329 = vmatpush.bf16.msra.mxu3 %v3568_v17 }
 0x1da   : > { %v391_v7 = vpop.f32.mrf.mxu0  ;;  %v925_v56 = vpop.f32.mrf.mxu2  ;;  %v1801_v31 = vshrl.u32 %v3234_v1, 16  ;;  %v1804_v12 = vshll.u32 %v3234_v1, 16  ;;  %2221 = vmatpush.bf16.msra.mxu2 %v3563_v18  ;;  %v1496_v1 = vunpack.c.l.b16 %v1436_v45  ;;  %v3561_v45 = vld [vmem:[%s4668_s2 + $0x140] sm:$0xff] }
 0x1db   : > { %vm437_vm1 = vcmp.ge.f32.partialorder %v391_v7, 0.0  ;;  %v478_v26 = vmul.f32 0.2, %v391_v7  ;;  %v926_v53 = vadd.f32 %v925_v56, %v4280_v36  ;;  %v4398_v20 = vadd.f32 %v4303_v43, %v1088_v6  ;;  %v4404_v36 = vpop.f32.mrf.mxu1 }
 0x1dc   : > { %v2714_v32 = vrot.slane %v1804_v12, 1  ;;  %v1803_v51 = vrot.slane %v1801_v31, 4  ;;  %v1806_v14 = vrot.slane %v1804_v12, 5 }
 0x1dd   : > { %v519_v15 = vsel %vm437_vm1, %v391_v7, %v478_v26  ;;  %v3562_v7 = vld [vmem:[%s4668_s2 + $0x148] sm:$0xff] }
 0x1de   : > { %v560_v27 = vpack.c.bf16 %v519_v15, %v519_v15  ;;  %v2715_v60 = vor.u32 %v2714_v32, %v1801_v31  ;;  %v1807_v12 = vor.u32 %v1806_v14, %v1803_v51  ;;  %2222 = vmatpush.bf16.msra.mxu2 %v3562_v7 }
 0x1df   : > { %3318 = vmatmul.msk.bf16.gmra.mxu1 %vm221_vm0, %v2058_v13  ;;  %v1437_v43 = vld [vmem:[#allocation2 + $0x98] sm:$0x1]  ;;  %v1438_v51 = vld [vmem:[#allocation2 + $0x98] sm:$0xe] }
 0x1e0   : > { %602 = vst.msk [vmem:[#allocation2 + $0x9c] sm:$0xf] %vm562_vm2, %v560_v27  ;;  %v1070_v52 = vpop.f32.mrf.mxu3  ;;  %v1497_v6 = vunpack.c.l.b16 %v1437_v43  ;;  %vm603_vm2 = vcmask 517120   ;;  %v1831_v43 = vsel %vm689_vm8, %v4349_v19, %v1807_v12 }
 0x1e1   : > { %v1089_v16 = vadd.f32 %v1070_v52, %v923_v30 }
 0x1e2   : > { %v394_v56 = vpop.f32.mrf.mxu0  ;;  %v927_v31 = vpop.f32.mrf.mxu2  ;;  %v1498_v26 = vpack.c.b16 %v1497_v6, %v1496_v1  ;;  %v1810_v18 = vpack.c.b16 %v1497_v6, %v1809_v49  ;;  %v1508_v49 = vunpack.c.l.b16 %v1438_v51  ;;  %2223 = vmatpush.bf16.msra.mxu2 %v3561_v45 }
 0x1e3   : > { %vm438_vm3 = vcmp.ge.f32.partialorder %v394_v56, 0.0  ;;  %v479_v32 = vmul.f32 0.2, %v394_v56  ;;  %v928_v15 = vadd.f32 %v927_v31, %v4295_v46  ;;  %v4416_v34 = vadd.f32 %v4324_v59, %v1089_v16 }
 0x1e4   : > { %v1500_v13 = vshrl.u32 %v1498_v26, 16  ;;  %v1502_v30 = vshll.u32 %v1498_v26, 16  ;;  %v2716_v3 = vrot.slane %v1810_v18, 5 }
 0x1e5   : > { %v520_v27 = vsel %vm438_vm3, %v394_v56, %v479_v32  ;;  %v1235_v56 = vpop.f32.mrf.mxu1 }
 0x1e6   : > { %v561_v14 = vpack.c.bf16 %v520_v27, %v520_v27  ;;  %v4424_v46 = vsel %vm689_vm8, %v2715_v60, %v2716_v3  ;;  %v2485_v52 = vrot.slane %v1500_v13, 4  ;;  %v1504_v6 = vrot.slane %v1502_v30, 1 }
 0x1e7   : > { %3261 = vmatmul.msk.bf16.gmra.mxu2 %vm221_vm0, %v1831_v43  ;;  %v1439_v59 = vld [vmem:[#allocation2 + $0x9c] sm:$0x1]  ;;  %v2486_v26 = vrot.slane %v1502_v30, 5 }
 0x1e8   : > { %v1765_v17 = vld [vmem:[#allocation2 + $0x9c] sm:$0x3]  ;;  %604 = vst.msk [vmem:[#allocation2 + $0xa0] sm:$0x3] %vm603_vm2, %v561_v14  ;;  %v1073_v1 = vpop.f32.mrf.mxu3  ;;  %v1509_v16 = vunpack.c.l.b16 %v1439_v59  ;;  %v1505_v43 = vor.u32 %v1504_v6, %v1500_v13 }
 0x1e9   : > { %v1813_v7 = vunpack.c.l.b16 %v1765_v17  ;;  %v1090_v31 = vadd.f32 %v1073_v1, %v926_v53  ;;  %v2487_v14 = vor.u32 %v2486_v26, %v2485_v52 }
 0x1ea   : > { %v930_v32 = vpop.f32.mrf.mxu2  ;;  %v4427_v19 = vpack.c.b16 %v1509_v16, %v1508_v49  ;;  %v396_v12 = vpop.f32.mrf.mxu0 }
 0x1eb   : > { %v1814_v60 = vpack.c.b16 %v1813_v7, %v1508_v49  ;;  %v931_v3 = vadd.f32 %v930_v32, %v4308_v42  ;;  %v4431_v27 = vadd.f32 %v4358_v40, %v1090_v31  ;;  %v4436_v53 = vsel %vm689_vm8, %v4371_v33, %v2487_v14  ;;  %v3567_v42 = vld [vmem:[%s4668_s2 + $0x170] sm:$0xff] }
 0x1ec   : > { %v1511_v51 = vrot.slane %v4427_v19, 5  ;;  %2330 = vmatpush.bf16.msra.mxu3 %v3567_v42  ;;  %v3581_v42 = vld [vmem:[%s4668_s2 + $0x1e0] sm:$0xff] }
 0x1ed   : > { %v1816_v59 = vshrl.u32 %v1814_v60, 16  ;;  %v1819_v17 = vshll.u32 %v1814_v60, 16  ;;  %v1238_v7 = vpop.f32.mrf.mxu1 }
 0x1ee   : > { %v1523_v30 = vsel %vm689_vm8, %v1505_v43, %v1511_v51 }
 0x1ef   : > { %v1818_v45 = vrot.slane %v1816_v59, 5  ;;  %v1821_v1 = vrot.slane %v1819_v17, 6  ;;  %v4439_v49 = vrot.slane %v1816_v59, 1  ;;  %3198 = vmatmul.msk.bf16.gmra.mxu3 %vm221_vm0, %v1523_v30  ;;  %3403 = vmatmul.msk.bf16.vlgmr.msra.gmra.mxu1 %vm221_vm0, %v4129_v25  ;;  %v4447_v40 = vrot.slane %v1819_v17, 2  ;;  %v3582_v59 = vld [vmem:[%s4668_s2 + $0x1e8] sm:$0xff] }
 0x1f0   : > { %v1075_v13 = vpop.f32.mrf.mxu3  ;;  %v1811_v25 = vrot.slane %v1810_v18, 1 }
 0x1f1   : > { %v1091_v33 = vadd.f32 %v1075_v13, %v928_v15  ;;  %v2719_v52 = vor.u32 %v4447_v40, %v4439_v49  ;;  %v1822_v16 = vor.u32 %v1821_v1, %v1818_v45  ;;  %v2363_v13 = vld [vmem:[#allocation2 + $0x78] sm:$0x1] }
 0x1f2   : > { %v932_v6 = vpop.f32.mrf.mxu2 }
 0x1f3   : > { %v933_v31 = vadd.f32 %v932_v6, %v4330_v5  ;;  %v4453_v26 = vadd.f32 %v4386_v11, %v1091_v33  ;;  %v1834_v32 = vsel %vm689_vm8, %v1811_v25, %v1822_v16  ;;  %v3566_v11 = vld [vmem:[%s4668_s2 + $0x168] sm:$0xff]  ;;  %v3584_v5 = vld [vmem:[%s4668_s2 + $0x1f8] sm:$0xff] }
 0x1f4   : > { %2331 = vmatpush.bf16.msra.mxu3 %v3566_v11  ;;  %2781 = vmatpush.bf16.msrb.mxu1 %v3584_v5  ;;  %v3560_v5 = vld [vmem:[#allocation2 + $0x24] sm:$0x10] }
 0x1f5   : > { %v1240_v51 = vpop.f32.mrf.mxu1 }
 0x1f7   : > { %3262 = vmatmul.msk.bf16.gmra.mxu2 %vm221_vm0, %v1834_v32 }
 0x1f8   : > { %v1078_v60 = vpop.f32.mrf.mxu3 }
 0x1f9   : > { %v1092_v12 = vadd.f32 %v1078_v60, %v931_v3 }
 0x1fa   : > { %v935_v15 = vpop.f32.mrf.mxu2 }
 0x1fb   : > { %v936_v14 = vadd.f32 %v935_v15, %v4352_v29  ;;  %v4459_v43 = vadd.f32 %v4404_v36, %v1092_v12 }
 0x1ff   : > { %3287 = vmatmul.msk.bf16.vlgmr.msrb.gmra.mxu3 %vm221_vm0, %v3810_v39  ;;  %3404 = vmatmul.msk.bf16.gmra.mxu1 %vm221_vm0, %v4172_v22  ;;  %v3583_v39 = vld [vmem:[%s4668_s2 + $0x1f0] sm:$0xff]  ;;  %v4476_v22 = vpop.f32.mrf.mxu1 }
 0x200   : > { %v1080_v18 = vpop.f32.mrf.mxu3  ;;  %2782 = vmatpush.bf16.msrb.mxu1 %v3583_v39 }
 0x201   : > { %v1093_v29 = vadd.f32 %v1080_v18, %v933_v31  ;;  %v2383_v31 = vunpack.c.l.b16 %v2363_v13 }
 0x202   : > { %v937_v36 = vpop.f32.mrf.mxu2 }
 0x203   : > { %v4471_v3 = vadd.f32 %v1235_v56, %v1093_v29  ;;  %v3321_v29 = vld [vmem:[#allocation2 + $0x24] sm:$0xf] }
 0x204   : > { %2783 = vmatpush.bf16.msrb.mxu1 %v3582_v59  ;;  %v3322_v39 = vor.u32 %v3560_v5, %v3321_v29 }
 0x207   : > { %3347 = vmatmul.msk.bf16.vlgmr.msra.gmra.mxu2 %vm221_vm0, %v3818_v48  ;;  %v938_v48 = vadd.f32 %v937_v36, %v4378_v8  ;;  %v4499_v6 = vpop.f32.mrf.mxu1 }
 0x208   : > { %v1083_v17 = vpop.f32.mrf.mxu3  ;;  %2784 = vmatpush.bf16.msrb.mxu1 %v3581_v42  ;;  %v4731_v42 = vor.u32 %v3911_v23, %v3907_v0  ;;  %v3608_v23 = vld [vmem:[#allocation2 + $0x20] sm:$0xf] }
 0x209   : > { %v1094_v30 = vadd.f32 %v1083_v17, %v936_v14 }
 0x20a   : > { %v1397_v45 = vpop.f32.mrf.mxu2 }
 0x20b   : > { %v4484_v56 = vadd.f32 %v1397_v45, %v4398_v20  ;;  %v4486_v1 = vadd.f32 %v1238_v7, %v1094_v30  ;;  %v3565_v20 = vld [vmem:[%s4668_s2 + $0x160] sm:$0xff]  ;;  %v2156_v30 = vshrl.u32 %v3322_v39, 16  ;;  %v2159_v45 = vshll.u32 %v3322_v39, 16 }
 0x20c   : > { %2332 = vmatpush.bf16.msra.mxu3 %v3565_v20 }
 0x20d   : > { %v2158_v13 = vrot.slane %v2156_v30, 4  ;;  %v2161_v20 = vrot.slane %v2159_v45, 5 }
 0x20f   : > { %3288 = vmatmul.msk.bf16.gmra.mxu3 %vm221_vm0, %v3838_v37  ;;  %3405 = vmatmul.msk.bf16.gmra.mxu1 %vm221_vm0, %v4220_v4  ;;  %v4730_v37 = vunpack.c.l.b16 %v4251_v24  ;;  %v3576_v4 = vld [vmem:[%s4668_s2 + $0x1b8] sm:$0xff]  ;;  %v4509_v15 = vpop.f32.mrf.mxu1 }
 0x210   : > { %v1085_v33 = vpop.f32.mrf.mxu3  ;;  %2559 = vmatpush.bf16.msrb.mxu2 %v3576_v4 }
 0x211   : > { %v1095_v16 = vadd.f32 %v1085_v33, %v938_v48  ;;  %v2384_v32 = vpack.c.b16 %v2383_v31, %v4730_v37 }
 0x212   : > { %v1399_v7 = vpop.f32.mrf.mxu2 }
 0x213   : > { %v1418_v8 = vadd.f32 %v1399_v7, %v4416_v34  ;;  %v1250_v25 = vadd.f32 %v1240_v51, %v1095_v16  ;;  %v2385_v12 = vrot.slane %v2384_v32, 5  ;;  %v3575_v34 = vld [vmem:[%s4668_s2 + $0x1b0] sm:$0xff]  ;;  %v2162_v16 = vor.u32 %v2161_v20, %v2158_v13 }
 0x214   : > { %2560 = vmatpush.bf16.msrb.mxu2 %v3575_v34 }
 0x215   : > { %v2397_v24 = vsel %vm689_vm8, %v4263_v35, %v2385_v12  ;;  %v1913_v35 = vld [vmem:[#allocation2 + $0x24] sm:$0xf]  ;;  %v2174_v7 = vsel %vm689_vm8, %v3608_v23, %v2162_v16 }
 0x216   : > { %v1929_v36 = vunpack.c.l.b16 %v1913_v35 }
 0x217   : > { %3348 = vmatmul.msk.bf16.gmra.mxu2 %vm221_vm0, %v3850_v54  ;;  %v3580_v54 = vld [vmem:[%s4668_s2 + $0x1d8] sm:$0xff]  ;;  %v4530_v18 = vpop.f32.mrf.mxu1 }
 0x218   : > { %2672 = vmatpush.bf16.msrb.mxu3 %v3580_v54  ;;  %v1930_v17 = vpack.c.b16 %v1929_v36, %v1929_v36 }
 0x21a   : > { %v1402_v60 = vpop.f32.mrf.mxu2  ;;  %v1942_v48 = vsel %vm689_vm8, %v4731_v42, %v1930_v17 }
 0x21b   : > { %v1419_v14 = vadd.f32 %v1402_v60, %v4431_v27  ;;  %v3574_v27 = vld [vmem:[%s4668_s2 + $0x1a8] sm:$0xff] }
 0x21c   : > { %2561 = vmatpush.bf16.msrb.mxu2 %v3574_v27 }
 0x21f   : > { %3289 = vmatmul.msk.bf16.gmra.mxu3 %vm221_vm0, %v3878_v63  ;;  %3406 = vmatmul.msk.bf16.gmra.mxu1 %vm221_vm0, %v2397_v24  ;;  %v3573_v63 = vld [vmem:[%s4668_s2 + $0x1a0] sm:$0xff]  ;;  %v4539_v33 = vpop.f32.mrf.mxu1 }
 0x220   : > { %2562 = vmatpush.bf16.msrb.mxu2 %v3573_v63 }
 0x222   : > { %v1404_v51 = vpop.f32.mrf.mxu2 }
 0x223   : > { %v1420_v11 = vadd.f32 %v1404_v51, %v4453_v26 }
 0x227   : > { %3349 = vmatmul.msk.bf16.gmra.mxu2 %vm221_vm0, %v3897_v41  ;;  %v3579_v41 = vld [vmem:[%s4668_s2 + $0x1d0] sm:$0xff]  ;;  %v4550_v31 = vpop.f32.mrf.mxu1 }
 0x228   : > { %2673 = vmatpush.bf16.msrb.mxu3 %v3579_v41 }
 0x22a   : > { %v1407_v59 = vpop.f32.mrf.mxu2 }
 0x22b   : > { %v1421_v26 = vadd.f32 %v1407_v59, %v4459_v43 }
 0x22f   : > { %3290 = vmatmul.msk.bf16.gmra.mxu3 %vm221_vm0, %v1942_v48  ;;  %3487 = vmatmul.msk.bf16.vlgmr.msrb.gmra.mxu1 %vm221_vm0, %v4316_v61  ;;  %v4563_v60 = vpop.f32.mrf.mxu1  ;;  %v2476_v48 = vld [vmem:[#allocation2 + $0x9c] sm:$0xe] }
 0x232   : > { %v1409_v43 = vpop.f32.mrf.mxu2 }
 0x233   : > { %v1422_v0 = vadd.f32 %v1409_v43, %v4471_v3  ;;  %v3578_v3 = vld [vmem:[%s4668_s2 + $0x1c8] sm:$0xff] }
 0x234   : > { %2674 = vmatpush.bf16.msrb.mxu3 %v3578_v3 }
 0x237   : > { %3350 = vmatmul.msk.bf16.gmra.mxu2 %vm221_vm0, %v2174_v7 }
 0x23a   : > { %v1412_v37 = vpop.f32.mrf.mxu2  ;;  %v1574_v32 = vpop.f32.mrf.mxu3 }
 0x23b   : > { %v4553_v61 = vadd.f32 %v1412_v37, %v4486_v1  ;;  %v1594_v4 = vadd.f32 %v1574_v32, %v4484_v56 }
 0x23f   : > { %3375 = vmatmul.msk.bf16.vlgmr.msra.gmra.mxu3 %vm221_vm0, %v3948_v2  ;;  %3488 = vmatmul.msk.bf16.gmra.mxu1 %vm221_vm0, %v4365_v55  ;;  %v1750_v2 = vadd.f32 %v4476_v22, %v1594_v4  ;;  %v4570_v55 = vpop.f32.mrf.mxu1 }
 0x242   : > { %v1414_v12 = vpop.f32.mrf.mxu2  ;;  %v1576_v34 = vpop.f32.mrf.mxu3 }
 0x243   : > { %v4565_v24 = vadd.f32 %v1414_v12, %v1250_v25  ;;  %v1595_v1 = vadd.f32 %v1576_v34, %v1418_v8  ;;  %v2477_v25 = vld [vmem:[#allocation2 + $0xa0] sm:$0x3]  ;;  %v2705_v8 = vld [vmem:[#allocation2 + $0x9c] sm:$0xc] }
 0x244   : > { %v2721_v36 = vunpack.c.l.b16 %v2705_v8 }
 0x245   : > { %v1751_v22 = vadd.f32 %v4499_v6, %v1595_v1 }
 0x247   : > { %3431 = vmatmul.msk.bf16.vlgmr.msrb.gmra.mxu2 %vm221_vm0, %v4337_v50  ;;  %v3577_v50 = vld [vmem:[%s4668_s2 + $0x1c0] sm:$0xff]  ;;  %v2109_v39 = vpop.f32.mrf.mxu1 }
 0x248   : > { %2675 = vmatpush.bf16.msrb.mxu3 %v3577_v50 }
 0x24a   : > { %v1579_v56 = vpop.f32.mrf.mxu3  ;;  %v1885_v54 = vpop.f32.mrf.mxu2 }
 0x24b   : > { %v1596_v27 = vadd.f32 %v1579_v56, %v1419_v14  ;;  %v4572_v51 = vadd.f32 %v1885_v54, %v1750_v2  ;;  %v2492_v14 = vunpack.c.l.b16 %v2477_v25 }
 0x24f   : > { %3376 = vmatmul.msk.bf16.gmra.mxu3 %vm221_vm0, %v3984_v38  ;;  %3489 = vmatmul.msk.bf16.gmra.mxu1 %vm221_vm0, %v4424_v46  ;;  %v2722_v38 = vpack.c.b16 %v2492_v14, %v2721_v36  ;;  %v1752_v46 = vadd.f32 %v4509_v15, %v1596_v27 }
 0x251   : > { %v2723_v30 = vrot.slane %v2722_v38, 6 }
 0x252   : > { %v1581_v35 = vpop.f32.mrf.mxu3  ;;  %v1887_v5 = vpop.f32.mrf.mxu2 }
 0x253   : > { %v1597_v63 = vadd.f32 %v1581_v35, %v1420_v11  ;;  %v1906_v29 = vadd.f32 %v1887_v5, %v1751_v22  ;;  %v2735_v42 = vsel %vm689_vm8, %v2719_v52, %v2723_v30  ;;  %v2111_v11 = vpop.f32.mrf.mxu1 }
 0x257   : > { %3432 = vmatmul.msk.bf16.gmra.mxu2 %vm221_vm0, %v4382_v21  ;;  %v1753_v21 = vadd.f32 %v4530_v18, %v1597_v63 }
 0x25a   : > { %v1584_v59 = vpop.f32.mrf.mxu3  ;;  %v1890_v17 = vpop.f32.mrf.mxu2 }
 0x25b   : > { %v1598_v45 = vadd.f32 %v1584_v59, %v1421_v26  ;;  %v1907_v6 = vadd.f32 %v1890_v17, %v1752_v46  ;;  %v2491_v26 = vunpack.c.l.b16 %v2476_v48  ;;  %v2114_v49 = vpop.f32.mrf.mxu1 }
 0x25d   : > { %v2493_v43 = vpack.c.b16 %v2492_v14, %v2491_v26  ;;  %v1754_v40 = vadd.f32 %v4539_v33, %v1598_v45  ;;  %v2488_v33 = vrot.slane %v4427_v19, 1 }
 0x25f   : > { %3377 = vmatmul.msk.bf16.gmra.mxu3 %vm221_vm0, %v4015_v57  ;;  %3490 = vmatmul.msk.bf16.gmra.mxu1 %vm221_vm0, %v2735_v42  ;;  %v2495_v16 = vshrl.u32 %v2493_v43, 16  ;;  %v2498_v57 = vshll.u32 %v2493_v43, 16 }
 0x261   : > { %v2497_v7 = vrot.slane %v2495_v16, 5  ;;  %v2500_v37 = vrot.slane %v2498_v57, 6 }
 0x262   : > { %v1586_v15 = vpop.f32.mrf.mxu3  ;;  %v1892_v13 = vpop.f32.mrf.mxu2 }
 0x263   : > { %v1599_v20 = vadd.f32 %v1586_v15, %v1422_v0  ;;  %v1908_v41 = vadd.f32 %v1892_v13, %v1753_v21  ;;  %v2501_v4 = vor.u32 %v2500_v37, %v2497_v7  ;;  %v2116_v3 = vpop.f32.mrf.mxu1 }
 0x265   : > { %v1755_v18 = vadd.f32 %v4550_v31, %v1599_v20  ;;  %v2513_v34 = vsel %vm689_vm8, %v2488_v33, %v2501_v4 }
 0x267   : > { %3433 = vmatmul.msk.bf16.gmra.mxu2 %vm221_vm0, %v4436_v53 }
 0x26a   : > { %v1895_v52 = vpop.f32.mrf.mxu2 }
 0x26b   : > { %v1909_v23 = vadd.f32 %v1895_v52, %v1754_v40  ;;  %v2119_v54 = vpop.f32.mrf.mxu1 }
 0x26f   : > { %3378 = vmatmul.msk.bf16.gmra.mxu3 %vm221_vm0, %v4064_v47 }
 0x272   : > { %v1589_v0 = vpop.f32.mrf.mxu3  ;;  %v1897_v32 = vpop.f32.mrf.mxu2 }
 0x273   : > { %v1600_v53 = vadd.f32 %v1589_v0, %v4553_v61  ;;  %v1910_v12 = vadd.f32 %v1897_v32, %v1755_v18  ;;  %v2121_v22 = vpop.f32.mrf.mxu1 }
 0x275   : > { %v1756_v1 = vadd.f32 %v4563_v60, %v1600_v53 }
 0x277   : > { %3434 = vmatmul.msk.bf16.gmra.mxu2 %vm221_vm0, %v2513_v34 }
 0x27a   : > { %v1591_v2 = vpop.f32.mrf.mxu3  ;;  %v1900_v56 = vpop.f32.mrf.mxu2 }
 0x27b   : > { %v1601_v47 = vadd.f32 %v1591_v2, %v4565_v24  ;;  %v1911_v31 = vadd.f32 %v1900_v56, %v1756_v1  ;;  %v2124_v24 = vpop.f32.mrf.mxu1 }
 0x27d   : > { %v1757_v61 = vadd.f32 %v4570_v55, %v1601_v47 }
 0x27f   : > { %3459 = vmatmul.msk.bf16.vlgmr.msrb.gmra.mxu3 %vm221_vm0, %v4143_v58 }
 0x282   : > { %v1902_v27 = vpop.f32.mrf.mxu2  ;;  %v1993_v25 = vpop.f32.mrf.mxu3 }
 0x283   : > { %v1912_v19 = vadd.f32 %v1902_v27, %v1757_v61  ;;  %v2013_v50 = vadd.f32 %v1993_v25, %v4572_v51  ;;  %v4611_v30 = vpop.f32.mrf.mxu1 }
 0x285   : > { %v2129_v8 = vadd.f32 %v2109_v39, %v2013_v50 }
 0x28a   : > { %v1995_v35 = vpop.f32.mrf.mxu3  ;;  %v2225_v60 = vpop.f32.mrf.mxu2 }
 0x28b   : > { %v2014_v5 = vadd.f32 %v1995_v35, %v1906_v29  ;;  %v2245_v14 = vadd.f32 %v2225_v60, %v2129_v8 }
 0x28d   : > { %v2130_v63 = vadd.f32 %v2111_v11, %v2014_v5  ;;  %v2448_v11 = vpop.f32.mrf.mxu1 }
 0x28f   : > { %3460 = vmatmul.msk.bf16.gmra.mxu3 %vm221_vm0, %v4195_v62 }
 0x292   : > { %v1998_v36 = vpop.f32.mrf.mxu3  ;;  %v2227_v58 = vpop.f32.mrf.mxu2 }
 0x293   : > { %v2015_v38 = vadd.f32 %v1998_v36, %v1907_v6  ;;  %v2246_v55 = vadd.f32 %v2227_v58, %v2130_v63 }
 0x295   : > { %v2131_v46 = vadd.f32 %v2114_v49, %v2015_v38  ;;  %v2450_v26 = vpop.f32.mrf.mxu1 }
 0x29a   : > { %v2000_v59 = vpop.f32.mrf.mxu3  ;;  %v2230_v17 = vpop.f32.mrf.mxu2 }
 0x29b   : > { %v2016_v51 = vadd.f32 %v2000_v59, %v1908_v41  ;;  %v2247_v39 = vadd.f32 %v2230_v17, %v2131_v46  ;;  %v4632_v46 = vperm.slane %v3698_v9, 0 }
 0x29d   : > { %v2132_v29 = vadd.f32 %v2116_v3, %v2016_v51  ;;  %v2453_v52 = vpop.f32.mrf.mxu1 }
 0x29f   : > { %3461 = vmatmul.msk.bf16.gmra.mxu3 %vm221_vm0, %v4239_v28 }
 0x2a2   : > { %v2003_v45 = vpop.f32.mrf.mxu3  ;;  %v2232_v42 = vpop.f32.mrf.mxu2 }
 0x2a3   : > { %v2017_v62 = vadd.f32 %v2003_v45, %v1909_v23  ;;  %v2248_v21 = vadd.f32 %v2232_v42, %v2132_v29 }
 0x2a5   : > { %v2133_v48 = vadd.f32 %v2119_v54, %v2017_v62  ;;  %v2455_v32 = vpop.f32.mrf.mxu1 }
 0x2aa   : > { %v2005_v15 = vpop.f32.mrf.mxu3  ;;  %v2235_v6 = vpop.f32.mrf.mxu2 }
 0x2ab   : > { %v2018_v13 = vadd.f32 %v2005_v15, %v1910_v12  ;;  %v2249_v20 = vadd.f32 %v2235_v6, %v2133_v48 }
 0x2ad   : > { %v2134_v41 = vadd.f32 %v2121_v22, %v2018_v13  ;;  %v4619_v53 = vpop.f32.mrf.mxu1 }
 0x2af   : > { %3462 = vmatmul.msk.bf16.gmra.mxu3 %vm221_vm0, %v4285_v44 }
 0x2b2   : > { %v2008_v43 = vpop.f32.mrf.mxu3  ;;  %v2237_v49 = vpop.f32.mrf.mxu2 }
 0x2b3   : > { %v2019_v40 = vadd.f32 %v2008_v43, %v1911_v31  ;;  %v2250_v28 = vadd.f32 %v2237_v49, %v2134_v41 }
 0x2b5   : > { %v2135_v16 = vadd.f32 %v2124_v24, %v2019_v40  ;;  %v2460_v33 = vpop.f32.mrf.mxu1  ;;  %v4732_v40 = vld [vmem:[#allocation12_spill] sm:$0xff] }
 0x2ba   : > { %v2010_v57 = vpop.f32.mrf.mxu3  ;;  %v2240_v23 = vpop.f32.mrf.mxu2 }
 0x2bb   : > { %v4617_v7 = vadd.f32 %v2010_v57, %v1912_v19  ;;  %v2251_v37 = vadd.f32 %v2240_v23, %v2135_v16 }
 0x2bd   : > { %v2463_v2 = vpop.f32.mrf.mxu1 }
 0x2c2   : > { %v2334_v18 = vpop.f32.mrf.mxu3  ;;  %v4621_v31 = vpop.f32.mrf.mxu2 }
 0x2c3   : > { %v2354_v0 = vadd.f32 %v2334_v18, %v2245_v14 }
 0x2c5   : > { %v4623_v27 = vpop.f32.mrf.mxu1  ;;  %v2468_v14 = vadd.f32 %v2448_v11, %v2354_v0 }
 0x2ca   : > { %v2336_v4 = vpop.f32.mrf.mxu3  ;;  %v2564_v19 = vpop.f32.mrf.mxu2 }
 0x2cb   : > { %v2355_v3 = vadd.f32 %v2336_v4, %v2246_v55  ;;  %v2584_v63 = vadd.f32 %v2564_v19, %v2468_v14 }
 0x2cd   : > { %v2786_v35 = vpop.f32.mrf.mxu1  ;;  %v2469_v59 = vadd.f32 %v2450_v26, %v2355_v3 }
 0x2d2   : > { %v2339_v44 = vpop.f32.mrf.mxu3  ;;  %v2566_v60 = vpop.f32.mrf.mxu2 }
 0x2d3   : > { %v2356_v12 = vadd.f32 %v2339_v44, %v2247_v39  ;;  %v2585_v17 = vadd.f32 %v2566_v60, %v2469_v59  ;;  %v4734_v60 = vld [vmem:[#allocation14_spill] sm:$0xff] }
 0x2d5   : > { %v2788_v24 = vpop.f32.mrf.mxu1  ;;  %v2470_v11 = vadd.f32 %v2453_v52, %v2356_v12  ;;  %v4733_v12 = vld [vmem:[#allocation13_spill] sm:$0xff] }
 0x2da   : > { %v2341_v34 = vpop.f32.mrf.mxu3  ;;  %v2569_v38 = vpop.f32.mrf.mxu2 }
 0x2db   : > { %v2357_v1 = vadd.f32 %v2341_v34, %v2248_v21  ;;  %v2586_v15 = vadd.f32 %v2569_v38, %v2470_v11 }
 0x2dd   : > { %v2791_v39 = vpop.f32.mrf.mxu1  ;;  %v2471_v23 = vadd.f32 %v2455_v32, %v2357_v1 }
 0x2e2   : > { %v2344_v56 = vpop.f32.mrf.mxu3  ;;  %v2571_v21 = vpop.f32.mrf.mxu2 }
 0x2e3   : > { %v2358_v47 = vadd.f32 %v2344_v56, %v2249_v20  ;;  %v2587_v18 = vadd.f32 %v2571_v21, %v2471_v23 }
 0x2e5   : > { %v2793_v43 = vpop.f32.mrf.mxu1 }
 0x2ea   : > { %v2346_v54 = vpop.f32.mrf.mxu3  ;;  %v2574_v52 = vpop.f32.mrf.mxu2 }
 0x2eb   : > { %v2359_v61 = vadd.f32 %v2346_v54, %v2250_v28  ;;  %v2472_v54 = vadd.f32 %v4619_v53, %v2358_v47 }
 0x2ed   : > { %v4625_v25 = vadd.f32 %v2460_v33, %v2359_v61  ;;  %v2588_v19 = vadd.f32 %v2574_v52, %v2472_v54 }
 0x2f2   : > { %v2349_v50 = vpop.f32.mrf.mxu3  ;;  %v2576_v1 = vpop.f32.mrf.mxu2 }
 0x2f3   : > { %v2360_v22 = vadd.f32 %v2349_v50, %v2251_v37  ;;  %v2589_v38 = vadd.f32 %v2576_v1, %v4625_v25  ;;  %v4739_v1 = vld [vmem:[#allocation19_spill] sm:$0xff] }
 0x2f5   : > { %v4627_v8 = vadd.f32 %v2463_v2, %v2360_v22  ;;  %v2796_v2 = vpop.f32.mrf.mxu1 }
 0x2fa   : > { %v4629_v5 = vpop.f32.mrf.mxu3 }
 0x302   : > { %v2677_v36 = vpop.f32.mrf.mxu3 }
 0x303   : > { %v2697_v58 = vadd.f32 %v2677_v36, %v2584_v63 }
 0x305   : > { %v2806_v55 = vadd.f32 %v2786_v35, %v2697_v58  ;;  %v2798_v58 = vpop.f32.mrf.mxu1 }
 0x307   : > { %v2817_v51 = vadd.f32 %v4632_v46, %v2806_v55 }
 0x309   : > { %v2833_v42 = vmul.f32 0.2, %v2817_v51  ;;  %vm2825_vm0 = vcmp.ge.f32.partialorder %v2817_v51, 0.0 }
 0x30a   : > { %v2679_v29 = vpop.f32.mrf.mxu3 }
 0x30b   : > { %v2698_v45 = vadd.f32 %v2679_v29, %v2585_v17  ;;  %v2841_v6 = vsel %vm2825_vm0, %v2817_v51, %v2833_v42  ;;  %v2579_v17 = vpop.f32.mrf.mxu2  ;;  %v4735_v51 = vld [vmem:[#allocation15_spill] sm:$0xff]  ;;  %v2136_v42 = vadd.f32 %v4611_v30, %v4617_v7 }
 0x30c   : > { %v2849_v49 = vmul.f32 %v2841_v6, %v3703_v10  ;;  %v2590_v11 = vadd.f32 %v2579_v17, %v4627_v8 }
 0x30d   : > { %v2807_v62 = vadd.f32 %v2788_v24, %v2698_v45  ;;  %v2252_v21 = vadd.f32 %v4621_v31, %v2136_v42 }
 0x30f   : > { %v2818_v48 = vadd.f32 %v4632_v46, %v2807_v62  ;;  %v2361_v6 = vadd.f32 %v4629_v5, %v2252_v21 }
 0x311   : > { %vm2826_vm8 = vcmp.ge.f32.partialorder %v2818_v48, 0.0  ;;  %v2834_v13 = vmul.f32 0.2, %v2818_v48  ;;  %v2475_v30 = vadd.f32 %v4623_v27, %v2361_v6 }
 0x312   : > { %v2682_v20 = vpop.f32.mrf.mxu3 }
 0x313   : > { %v2842_v41 = vsel %vm2826_vm8, %v2818_v48, %v2834_v13  ;;  %v2699_v26 = vadd.f32 %v2682_v20, %v2586_v15  ;;  %v2801_v48 = vpop.f32.mrf.mxu1 }
 0x314   : > { %v2850_v28 = vmul.f32 %v2842_v41, %v4732_v40  ;;  %v4736_v41 = vld [vmem:[#allocation16_spill] sm:$0xff] }
 0x315   : > { %v2808_v16 = vadd.f32 %v2791_v39, %v2699_v26 }
 0x316   : > { %v2857_v57 = vadd.f32 %v2850_v28, %v2849_v49  ;;  %v2581_v49 = vpop.f32.mrf.mxu2 }
 0x317   : > { %v2819_v37 = vadd.f32 %v4632_v46, %v2808_v16  ;;  %v2591_v31 = vadd.f32 %v2581_v49, %v2475_v30 }
 0x319   : > { %vm2827_vm4 = vcmp.ge.f32.partialorder %v2819_v37, 0.0  ;;  %v2835_v0 = vmul.f32 0.2, %v2819_v37 }
 0x31a   : > { %v2684_v4 = vpop.f32.mrf.mxu3 }
 0x31b   : > { %v2843_v3 = vsel %vm2827_vm4, %v2819_v37, %v2835_v0  ;;  %v2700_v44 = vadd.f32 %v2684_v4, %v2587_v18  ;;  %v2803_v23 = vpop.f32.mrf.mxu1  ;;  %v4737_v37 = vld [vmem:[#allocation17_spill] sm:$0xff] }
 0x31c   : > { %v2851_v33 = vmul.f32 %v2843_v3, %v4733_v12 }
 0x31d   : > { %v2809_v34 = vadd.f32 %v2793_v43, %v2700_v44  ;;  %v4738_v44 = vld [vmem:[#allocation18_spill] sm:$0xff] }
 0x31e   : > { %v2858_v56 = vadd.f32 %v2857_v57, %v2851_v33 }
 0x31f   : > { %v2820_v61 = vadd.f32 %v4632_v46, %v2809_v34 }
 0x321   : > { %vm2828_vm5 = vcmp.ge.f32.partialorder %v2820_v61, 0.0  ;;  %v2836_v32 = vmul.f32 0.2, %v2820_v61 }
 0x322   : > { %v2687_v50 = vpop.f32.mrf.mxu3 }
 0x323   : > { %v2844_v22 = vsel %vm2828_vm5, %v2820_v61, %v2836_v32  ;;  %v2701_v35 = vadd.f32 %v2687_v50, %v2588_v19 }
 0x324   : > { %v2852_v14 = vmul.f32 %v2844_v22, %v4734_v60 }
 0x325   : > { %v2810_v24 = vadd.f32 %v2796_v2, %v2701_v35 }
 0x326   : > { %v2859_v63 = vadd.f32 %v2858_v56, %v2852_v14 }
 0x327   : > { %v2821_v36 = vadd.f32 %v4632_v46, %v2810_v24 }
 0x329   : > { %vm2829_vm6 = vcmp.ge.f32.partialorder %v2821_v36, 0.0  ;;  %v2837_v53 = vmul.f32 0.2, %v2821_v36 }
 0x32a   : > { %v2689_v47 = vpop.f32.mrf.mxu3 }
 0x32b   : > { %v2702_v55 = vadd.f32 %v2689_v47, %v2589_v38  ;;  %v2845_v59 = vsel %vm2829_vm6, %v2821_v36, %v2837_v53 }
 0x32c   : > { %v2853_v39 = vmul.f32 %v2845_v59, %v4735_v51 }
 0x32d   : > { %v2811_v29 = vadd.f32 %v2798_v58, %v2702_v55 }
 0x32e   : > { %v2860_v45 = vadd.f32 %v2859_v63, %v2853_v39 }
 0x32f   : > { %v2822_v62 = vadd.f32 %v4632_v46, %v2811_v29 }
 0x331   : > { %v2838_v25 = vmul.f32 0.2, %v2822_v62  ;;  %vm2830_vm7 = vcmp.ge.f32.partialorder %v2822_v62, 0.0 }
 0x332   : > { %v2692_v15 = vpop.f32.mrf.mxu3 }
 0x333   : > { %v2703_v13 = vadd.f32 %v2692_v15, %v2590_v11  ;;  %v2846_v20 = vsel %vm2830_vm7, %v2822_v62, %v2838_v25 }
 0x334   : > { %v2854_v26 = vmul.f32 %v2846_v20, %v4736_v41 }
 0x335   : > { %v2812_v43 = vadd.f32 %v2801_v48, %v2703_v13 }
 0x336   : > { %v2861_v40 = vadd.f32 %v2860_v45, %v2854_v26 }
 0x337   : > { %v2823_v7 = vadd.f32 %v4632_v46, %v2812_v43 }
 0x339   : > { %vm2831_vm9 = vcmp.ge.f32.partialorder %v2823_v7, 0.0  ;;  %v2839_v8 = vmul.f32 0.2, %v2823_v7 }
 0x33a   : > { %v2694_v28 = vpop.f32.mrf.mxu3 }
 0x33b   : > { %v2704_v16 = vadd.f32 %v2694_v28, %v2591_v31  ;;  %v2847_v57 = vsel %vm2831_vm9, %v2823_v7, %v2839_v8 }
 0x33c   : > { %v2855_v5 = vmul.f32 %v2847_v57, %v4737_v37 }
 0x33d   : > { %v2813_v52 = vadd.f32 %v2803_v23, %v2704_v16 }
 0x33e   : > { %v2862_v18 = vadd.f32 %v2861_v40, %v2855_v5 }
 0x33f   : > { %v2824_v0 = vadd.f32 %v4632_v46, %v2813_v52 }
 0x341   : > { %vm2832_vm10 = vcmp.ge.f32.partialorder %v2824_v0, 0.0  ;;  %v2840_v4 = vmul.f32 0.2, %v2824_v0 }
 0x343   : > { %v2848_v3 = vsel %vm2832_vm10, %v2824_v0, %v2840_v4 }
 0x344   : > { %v2856_v27 = vmul.f32 %v2848_v3, %v4738_v44 }
 0x346   : > { %v2863_v12 = vadd.f32 %v2862_v18, %v2856_v27 }
 0x348   : > { %2864 = vadd.xlane.f32.xlu0 %v2863_v12 }
 0x3bb   : > { %v2865_v33 = vpop.xlane.xlu0 %2864 }
 0x3bc   : > { %v2866_v34 = vrot.slane %v2865_v33, 4 }
 0x3be   : > { %v2867_v2 = vadd.f32 %v2866_v34, %v2865_v33 }
 0x3c0   : > { %v2868_v56 = vrot.slane %v2867_v2, 2 }
 0x3c2   : > { %v2869_v54 = vadd.f32 %v2868_v56, %v2867_v2 }
 0x3c4   : > { %v2870_v61 = vrot.slane %v2869_v54, 1 }
 0x3c6   : > { %v2871_v19 = vadd.f32 %v2870_v61, %v2869_v54 }
 0x3c8   : > { %3593 = vpush %v2871_v19 }
 0x3f9   : > { %s3594_s27 = spop %3593 }
 0x3fa   : > { %v2873_v32 = vstv %s3594_s27 }
 0x3fb   : > { %v2874_v50 = vadd.f32 %v2873_v32, %v4739_v1 }
 0x3fd   : > { %v2875_v46 = vand.u32 2147483647, %v2874_v50  ;;  %vm2879_vm1 = vcmp.ge.f32.partialorder %v2874_v50, 0.0 }
 0x3ff   : > { %v2876_v22 = vsub.f32 0.0, %v2875_v46 }
 0x401   : > { %v2877_v35 = vmul.f32 1.442695, %v2876_v22 }
 0x403   : > { %3603 = vpow2.f32 %v2877_v35 }
 0x409   : > { %v3604_v60 = vpop.eup %3603 }
 0x40a   : > { %v2880_v14 = vadd.f32 1.0, %v3604_v60 }
 0x40c   : > { %3605 = vrcp.f32 %v2880_v14  ;;  %v2892_v58 = vand.u32 2147483648, %v2880_v14  ;;  %v2890_v53 = vand.u32 2147483647, %v2880_v14  ;;  %vm2886_vm12 = vweird.f32 %v2880_v14 }
 0x40e   : > { %v2893_v55 = vor.u32 1.1754944e-38, %v2892_v58  ;;  %vm2891_vm14 = vcmp.eq.f32.partialorder %v2890_v53, 8.507059e+37 }
 0x412   : > { %v3606_v24 = vpop.eup %3605 }
 0x413   : > { %v2882_v63 = vmul.f32 %v3606_v24, %v2880_v14  ;;  %vm2887_vm11 = vweird.f32 %v3606_v24 }
 0x414   : > { %vm2888_vm13 = vmor %vm2886_vm12, %vm2887_vm11 }
 0x415   : > { %v2883_v36 = vsub.f32 1.0, %v2882_v63 }
 0x417   : > { %v2884_v38 = vmul.f32 %v3606_v24, %v2883_v36 }
 0x419   : > { %v2885_v47 = vadd.f32 %v3606_v24, %v2884_v38 }
 0x41b   : > { %v2889_v59 = vsel %vm2888_vm13, %v3606_v24, %v2885_v47 }
 0x41c   : > { %v2894_v17 = vsel %vm2891_vm14, %v2893_v55, %v2889_v59  ;;  %48 = sbr.rel (!%p46_p0) target bundleno = 19 (0x13), region = 68 }
 0x41d   : > { %v2896_v51 = vmul.f32 %v3604_v60, %v2894_v17 }
 0x41f   : > { %v2897_v39 = vsel %vm2879_vm1, %v2894_v17, %v2896_v51 }
 0x420   : > { %2900 = vst.msk [vmem:[%s2898_s4] sm:$0x1] %vm2899_vm15, %v2897_v39 }

</bundles_post_ra>
